<compile_context>
chip_gen: v5e
topology: v5e:2x2
jax: 0.10.0
libtpu: 0.0.40
codegen_flags: <defaults>
</compile_context>

<pallas_src>
import functools
import math

import jax
import jax.numpy as jnp
from jax.experimental import pallas as pl
from jax.experimental.pallas import tpu as pltpu

# ----------------------------- small config ---------------------------------
VOCAB = 256
HIDDEN = 64
LAYERS = 2
HEADS = 4
KV_HEADS = 4          # toy config: no GQA (HEADS == KV_HEADS)
HEAD_DIM = 16
INTERMEDIATE = 128
MAX_SEQ = 16          # max_position_embeddings (== kv-cache length here)
RMS_EPS = 1e-6
ROPE_THETA = 10000.0

assert HEADS == KV_HEADS  # TODO(synk): generalize the fused kernel for GQA (KV_HEADS < HEADS).

Q_DIM = HEADS * HEAD_DIM
KV_DIM = KV_HEADS * HEAD_DIM


# --------------------------- in-kernel helpers --------------------------------
def _rmsnorm(x, w):
    """Gemma RMSNorm (f32 VPU math): x * rsqrt(mean(x^2)+eps) * (1 + w)."""
    var = jnp.mean(x * x, axis=-1, keepdims=True)
    return x * jax.lax.rsqrt(var + RMS_EPS) * (1.0 + w)


def _gelu_tanh(x):
    # PyTorch F.gelu(x, approximate="tanh")
    return 0.5 * x * (1.0 + jnp.tanh(0.7978845608028654 * (x + 0.044715 * x * x * x)))


# ---------------- fused whole-model kernel (grid over layers) -----------------
def _model_kernel(kcin_ref, vcin_ref, pos_ref, outpos_ref, mask_ref, hin_ref,
                  cos_ref, sin_ref, rot_ref,
                  ln1_ref, wq_ref, wk_ref, wv_ref, wo_ref, ln2_ref,
                  wg_ref, wu_ref, wd_ref, lnf_ref, embt_ref,
                  logits_ref, kcout_ref, vcout_ref,
                  h_scr, q_scr, k_scr, v_scr, attn_scr,
                  *, batch, seq, heads, head_dim, kv_groups, scale):
    f32 = jnp.float32
    bf16 = jnp.bfloat16
    layer = pl.program_id(0)

    # ---- residual stream lives in VMEM scratch across the whole grid ----
    @pl.when(layer == 0)
    def _():
        h_scr[...] = hin_ref[...]

    h = h_scr[...]                                        # (B*T, D) f32 residual

    # ---- input RMSNorm ----
    xn = _rmsnorm(h, ln1_ref[...]).astype(bf16)

    # ---- q/k/v projections (bf16 MXU operands, f32 accumulation) ----
    q = jnp.dot(xn, wq_ref[...], preferred_element_type=f32)    # (B*T, H*Dh)
    k = jnp.dot(xn, wk_ref[...], preferred_element_type=f32)    # (B*T, KVH*Dh)
    v = jnp.dot(xn, wv_ref[...], preferred_element_type=f32)

    # ---- fused RoPE: out = x*cos + (x @ P_rotate_half) * sin_signed ----
    rot = rot_ref[...]
    cos_t = cos_ref[...]
    sin_t = sin_ref[...]
    q = q * cos_t + jnp.dot(q.astype(bf16), rot, preferred_element_type=f32) * sin_t
    k = k * cos_t + jnp.dot(k.astype(bf16), rot, preferred_element_type=f32) * sin_t

    q_scr[...] = q * scale            # pre-scale q once (cheaper than scaling scores)
    k_scr[...] = k
    v_scr[...] = v

    # ---- KV-cache update: scatter new rows at kv_write_indices (= positions) ----
    kcout_ref[...] = kcin_ref[...]
    vcout_ref[...] = vcin_ref[...]
    for t in range(seq):
        p = pos_ref[t]
        for b in range(batch):
            r = b * seq + t
            kcout_ref[b, pl.ds(p, 1), :] = k_scr[r:r + 1, :]
            vcout_ref[b, pl.ds(p, 1), :] = v_scr[r:r + 1, :]

    # ---- attention over the full cache; all (batch, head) blocks this step ----
    mask = mask_ref[...]                                  # (T, S) additive mask, f32
    for b in range(batch):
        r0 = b * seq
        for hh in range(heads):
            c0 = hh * head_dim
            kc0 = (hh // kv_groups) * head_dim
            q_bh = q_scr[r0:r0 + seq, c0:c0 + head_dim].astype(bf16)   # (T, Dh)
            k_bh = kcout_ref[b, :, kc0:kc0 + head_dim].astype(bf16)    # (S, Dh)
            v_bh = vcout_ref[b, :, kc0:kc0 + head_dim].astype(bf16)    # (S, Dh)
            s = jax.lax.dot_general(q_bh, k_bh, (((1,), (1,)), ((), ())),
                                    preferred_element_type=f32)        # (T, S)
            s = s + mask
            s = s - jnp.max(s, axis=-1, keepdims=True)
            p_att = jnp.exp(s)
            denom = jnp.sum(p_att, axis=-1, keepdims=True)
            o_bh = jnp.dot(p_att.astype(bf16), v_bh, preferred_element_type=f32)
            attn_scr[r0:r0 + seq, c0:c0 + head_dim] = (
                o_bh * pl.reciprocal(denom, approx=True)
            )

    # ---- output projection + residual ----
    attn_out = jnp.dot(attn_scr[...].astype(bf16), wo_ref[...],
                       preferred_element_type=f32)
    h_mid = h + attn_out

    # ---- MLP: RMSNorm -> GeGLU (tanh-gelu) -> down-proj + residual ----
    xn2 = _rmsnorm(h_mid, ln2_ref[...]).astype(bf16)
    gate = jnp.dot(xn2, wg_ref[...], preferred_element_type=f32)
    up = jnp.dot(xn2, wu_ref[...], preferred_element_type=f32)
    act = (_gelu_tanh(gate) * up).astype(bf16)
    h_scr[...] = h_mid + jnp.dot(act, wd_ref[...], preferred_element_type=f32)

    # ---- fused sampler on the last layer step: final norm + tied-emb logits ----
    @pl.when(layer == pl.num_programs(0) - 1)
    def _():
        op = outpos_ref[0]
        rows = [h_scr[pl.ds(b * seq + op, 1), :] for b in range(batch)]   # (1, D) each
        h_sel = jnp.concatenate(rows, axis=0)                             # (B, D)
        xs = _rmsnorm(h_sel, lnf_ref[...]).astype(bf16)
        logits_ref[...] = jnp.dot(xs, embt_ref[...], preferred_element_type=f32)


def fused_forward(h2d, k_stack, v_stack, pos, outpos, mask2d, cos_t, sin_t, params):
    """Whole Gemma forward (all layers + sampler) in one pallas_call."""
    BT, D = h2d.shape
    L, B, S, KVD = k_stack.shape
    T = mask2d.shape[0]
    QD = cos_t.shape[1]
    I = params["wg_s"].shape[-1]
    V = params["emb_t"].shape[1]
    assert BT == B * T and QD == Q_DIM and KVD == KV_DIM

    kern = functools.partial(
        _model_kernel,
        batch=B, seq=T, heads=HEADS, head_dim=HEAD_DIM,
        kv_groups=HEADS // KV_HEADS, scale=HEAD_DIM ** -0.5,
    )

    return pl.pallas_call(
        kern,
        grid=(L,),
        in_specs=[
            pl.BlockSpec((None, B, S, KVD), lambda l: (l, 0, 0, 0)),     # 0: k cache (aliased)
            pl.BlockSpec((None, B, S, KVD), lambda l: (l, 0, 0, 0)),     # 1: v cache (aliased)
            pl.BlockSpec(memory_space=pltpu.MemorySpace.SMEM),           # 2: write positions
            pl.BlockSpec(memory_space=pltpu.MemorySpace.SMEM),           # 3: output position
            pl.BlockSpec((T, S), lambda l: (0, 0)),                      # 4: additive mask
            pl.BlockSpec((BT, D), lambda l: (0, 0)),                     # 5: initial hidden
            pl.BlockSpec((BT, QD), lambda l: (0, 0)),                    # 6: rope cos tile
            pl.BlockSpec((BT, QD), lambda l: (0, 0)),                    # 7: rope sin tile
            pl.BlockSpec((QD, QD), lambda l: (0, 0)),                    # 8: rotate-half perm
            pl.BlockSpec((None, 1, D), lambda l: (l, 0, 0)),             # 9: input_ln (stacked)
            pl.BlockSpec((None, D, QD), lambda l: (l, 0, 0)),            # 10: wq
            pl.BlockSpec((None, D, KVD), lambda l: (l, 0, 0)),           # 11: wk
            pl.BlockSpec((None, D, KVD), lambda l: (l, 0, 0)),           # 12: wv
            pl.BlockSpec((None, QD, D), lambda l: (l, 0, 0)),            # 13: wo
            pl.BlockSpec((None, 1, D), lambda l: (l, 0, 0)),             # 14: post_attn_ln
            pl.BlockSpec((None, D, I), lambda l: (l, 0, 0)),             # 15: wg
            pl.BlockSpec((None, D, I), lambda l: (l, 0, 0)),             # 16: wu
            pl.BlockSpec((None, I, D), lambda l: (l, 0, 0)),             # 17: wd
            pl.BlockSpec((1, D), lambda l: (0, 0)),                      # 18: final_ln
            pl.BlockSpec((D, V), lambda l: (0, 0)),                      # 19: tied emb^T
        ],
        out_specs=(
            pl.BlockSpec((B, V), lambda l: (0, 0)),                      # logits
            pl.BlockSpec((None, B, S, KVD), lambda l: (l, 0, 0, 0)),     # k cache out
            pl.BlockSpec((None, B, S, KVD), lambda l: (l, 0, 0, 0)),     # v cache out
        ),
        out_shape=(
            jax.ShapeDtypeStruct((B, V), jnp.float32),
            jax.ShapeDtypeStruct((L, B, S, KVD), jnp.float32),
            jax.ShapeDtypeStruct((L, B, S, KVD), jnp.float32),
        ),
        scratch_shapes=[
            pltpu.VMEM((BT, D), jnp.float32),    # residual stream (persists across layers)
            pltpu.VMEM((BT, QD), jnp.float32),   # q (rope'd, pre-scaled)
            pltpu.VMEM((BT, KVD), jnp.float32),  # k (rope'd)
            pltpu.VMEM((BT, KVD), jnp.float32),  # v
            pltpu.VMEM((BT, QD), jnp.float32),   # attention output slab
        ],
        input_output_aliases={0: 1, 1: 2},       # in-place KV-cache update
        compiler_params=pltpu.CompilerParams(dimension_semantics=("arbitrary",)),
    )(k_stack, v_stack, pos, outpos, mask2d, h2d, cos_t, sin_t, params["rope_rot"],
      params["ln1_s"], params["wq_s"], params["wk_s"], params["wv_s"], params["wo_s"],
      params["ln2_s"], params["wg_s"], params["wu_s"], params["wd_s"],
      params["final_ln"], params["emb_t"])


# ----------------------------- params / rope ----------------------------------
def precompute_freqs_cis(dim, end, theta):
    freqs = 1.0 / (theta ** (jnp.arange(0, dim, 2, dtype=jnp.float32) / dim))
    t = jnp.arange(end, dtype=jnp.float32)
    freqs = jnp.outer(t, freqs)               # (end, dim//2)
    return jnp.cos(freqs), jnp.sin(freqs)


def _make_rope_rot(width, head_dim):
    """Permutation matrix P with (x @ P)[:, j] = x[:, partner(j)] (rotate-half partner)."""
    idx = jnp.arange(width)
    d = idx % head_dim
    src = jnp.where(d < head_dim // 2, idx + head_dim // 2, idx - head_dim // 2)
    return (jnp.arange(width)[:, None] == src[None, :]).astype(jnp.float32)


def init_params(key):
    kemb, klyr = jax.random.split(key, 2)
    emb = 0.02 * jax.random.normal(kemb, (VOCAB, HIDDEN), jnp.float32)
    q_sz, kv_sz = Q_DIM, KV_DIM
    ln1, ln2, wq, wk, wv, wo, wg, wu, wd = ([] for _ in range(9))
    for l in range(LAYERS):
        ks = jax.random.split(jax.random.fold_in(klyr, l), 5)
        wqkv = 0.02 * jax.random.normal(
            ks[0], (HIDDEN, (HEADS + 2 * KV_HEADS) * HEAD_DIM), jnp.float32)
        ln1.append(jnp.zeros((1, HIDDEN), jnp.float32))
        ln2.append(jnp.zeros((1, HIDDEN), jnp.float32))
        wq.append(wqkv[:, :q_sz].astype(jnp.bfloat16))
        wk.append(wqkv[:, q_sz:q_sz + kv_sz].astype(jnp.bfloat16))
        wv.append(wqkv[:, q_sz + kv_sz:].astype(jnp.bfloat16))
        wo.append((0.02 * jax.random.normal(ks[1], (Q_DIM, HIDDEN), jnp.float32)
                   ).astype(jnp.bfloat16))
        wg.append((0.02 * jax.random.normal(ks[2], (HIDDEN, INTERMEDIATE), jnp.float32)
                   ).astype(jnp.bfloat16))
        wu.append((0.02 * jax.random.normal(ks[3], (HIDDEN, INTERMEDIATE), jnp.float32)
                   ).astype(jnp.bfloat16))
        wd.append((0.02 * jax.random.normal(ks[4], (INTERMEDIATE, HIDDEN), jnp.float32)
                   ).astype(jnp.bfloat16))
    cos, sin = precompute_freqs_cis(HEAD_DIM, MAX_SEQ * 2, ROPE_THETA)
    return {
        "embedding": emb,                                    # f32, used for token gather
        "emb_t": emb.T.astype(jnp.bfloat16),                 # precomputed weight-tied head
        "final_ln": jnp.zeros((1, HIDDEN), jnp.float32),
        "rope_rot": _make_rope_rot(Q_DIM, HEAD_DIM).astype(jnp.bfloat16),
        "ln1_s": jnp.stack(ln1), "ln2_s": jnp.stack(ln2),    # (L, 1, D)
        "wq_s": jnp.stack(wq), "wk_s": jnp.stack(wk), "wv_s": jnp.stack(wv),
        "wo_s": jnp.stack(wo),
        "wg_s": jnp.stack(wg), "wu_s": jnp.stack(wu), "wd_s": jnp.stack(wd),
        "freqs_cos": cos, "freqs_sin": sin,
    }


# ----------------------------- forward (jitted) -------------------------------
def gemma_forward(params, input_token_ids, input_positions, kv_caches, mask,
                  output_positions, temperatures=None, top_ps=None, top_ks=None):
    """Mirrors GemmaForCausalLM.forward (greedy path: temperatures=None)."""
    # TODO(synk): temperature / top-p / top-k sampling path not implemented (greedy argmax only).
    del temperatures, top_ps, top_ks

    B, T = input_token_ids.shape
    emb = params["embedding"]

    # embedder + normalizer
    h = jnp.take(emb, input_token_ids, axis=0) * jnp.float32(math.sqrt(HIDDEN))
    h2d = h.reshape(B * T, HIDDEN)

    # RoPE cos/sin tiles laid out to match the flattened (B*T, HEADS*HEAD_DIM) q/k
    cos = params["freqs_cos"][input_positions]               # (T, Dh/2)
    sin = params["freqs_sin"][input_positions]
    cos_full = jnp.concatenate([cos, cos], axis=-1)          # (T, Dh)
    sin_full = jnp.concatenate([-sin, sin], axis=-1)         # signed (rotate-half)
    cos_tile = jnp.tile(jnp.tile(cos_full, (1, HEADS)), (B, 1))   # (B*T, H*Dh)
    sin_tile = jnp.tile(jnp.tile(sin_full, (1, HEADS)), (B, 1))

    mask2d = mask[0, 0]                                      # (T, S)
    pos_i32 = input_positions.astype(jnp.int32)              # kv_write_indices
    outpos_i32 = output_positions.astype(jnp.int32).reshape(-1)[:1]

    # stack per-layer caches along a leading layer dim (kernel streams per layer)
    k_stack = jnp.stack([kv[0] for kv in kv_caches], axis=0)  # (L, B, S, KVD)
    v_stack = jnp.stack([kv[1] for kv in kv_caches], axis=0)

    logits, k_stack, v_stack = fused_forward(
        h2d, k_stack, v_stack, pos_i32, outpos_i32, mask2d, cos_tile, sin_tile, params)

    next_tokens = jnp.argmax(logits, axis=-1)
    new_kv = [(k_stack[l], v_stack[l]) for l in range(LAYERS)]
    return next_tokens, logits, new_kv


# ----------------------------- main ------------------------------------------
if __name__ == "__main__":
    key = jax.random.PRNGKey(0)
    params = init_params(key)

    B, T = 2, 8
    input_token_ids = jax.random.randint(
        jax.random.fold_in(key, 123), (B, T), 0, VOCAB, dtype=jnp.int32)
    input_positions = jnp.arange(T, dtype=jnp.int32)
    kv_caches = [
        (jnp.zeros((B, MAX_SEQ, KV_DIM), jnp.float32),
         jnp.zeros((B, MAX_SEQ, KV_DIM), jnp.float32))
        for _ in range(LAYERS)
    ]
    full_mask = jnp.triu(
        jnp.full((MAX_SEQ, MAX_SEQ), -2.3819763e38, dtype=jnp.float32), 1)
    mask = full_mask[input_positions][None, None]            # (1, 1, T, MAX_SEQ)
    output_positions = jnp.array([T - 1], dtype=jnp.int32)
    top_ps = jnp.full((B,), 1.0, jnp.float32)                # unused (greedy)
    top_ks = jnp.full((B,), 100, jnp.int32)                  # unused (greedy)

    fwd = jax.jit(gemma_forward)
    next_tokens, logits, new_kv = fwd(
        params, input_token_ids, input_positions, kv_caches, mask,
        output_positions, temperatures=None, top_ps=top_ps, top_ks=top_ks)
    jax.block_until_ready((next_tokens, logits, new_kv))

    assert next_tokens.shape == (B,)
    assert logits.shape == (B, VOCAB)
    print("KERNEL_OK")
</pallas_src>

<mosaic_0001>
module attributes {stable_mosaic.version = 11 : i64} {
  func.func @_model_kernel(%arg0: i32, %arg1: memref<1x2x16x64xf32, #tpu.memory_space<vmem>>, %arg2: memref<1x2x16x64xf32, #tpu.memory_space<vmem>>, %arg3: memref<8xi32, #tpu.memory_space<smem>>, %arg4: memref<1xi32, #tpu.memory_space<smem>>, %arg5: memref<8x16xf32, #tpu.memory_space<vmem>>, %arg6: memref<16x64xf32, #tpu.memory_space<vmem>>, %arg7: memref<16x64xf32, #tpu.memory_space<vmem>>, %arg8: memref<16x64xf32, #tpu.memory_space<vmem>>, %arg9: memref<64x64xbf16, #tpu.memory_space<vmem>>, %arg10: memref<1x1x64xf32, #tpu.memory_space<vmem>>, %arg11: memref<1x64x64xbf16, #tpu.memory_space<vmem>>, %arg12: memref<1x64x64xbf16, #tpu.memory_space<vmem>>, %arg13: memref<1x64x64xbf16, #tpu.memory_space<vmem>>, %arg14: memref<1x64x64xbf16, #tpu.memory_space<vmem>>, %arg15: memref<1x1x64xf32, #tpu.memory_space<vmem>>, %arg16: memref<1x64x128xbf16, #tpu.memory_space<vmem>>, %arg17: memref<1x64x128xbf16, #tpu.memory_space<vmem>>, %arg18: memref<1x128x64xbf16, #tpu.memory_space<vmem>>, %arg19: memref<1x64xf32, #tpu.memory_space<vmem>>, %arg20: memref<64x256xbf16, #tpu.memory_space<vmem>>, %arg21: memref<2x256xf32, #tpu.memory_space<vmem>>, %arg22: memref<1x2x16x64xf32, #tpu.memory_space<vmem>>, %arg23: memref<1x2x16x64xf32, #tpu.memory_space<vmem>>, %arg24: memref<16x64xf32, #tpu.memory_space<vmem>>, %arg25: memref<16x64xf32, #tpu.memory_space<vmem>>, %arg26: memref<16x64xf32, #tpu.memory_space<vmem>>, %arg27: memref<16x64xf32, #tpu.memory_space<vmem>>, %arg28: memref<16x64xf32, #tpu.memory_space<vmem>>) attributes {dimension_semantics = [#tpu.dimension_semantics<arbitrary>], iteration_bounds = array<i64: 2>, scalar_prefetch = 0 : i64, scratch_operands = 5 : i64, tpu.core_type = #tpu.core_type<tc>, window_params = [{transform_indices = @transform_0, window_bounds = array<i64: 1, 2, 16, 64>}, {transform_indices = @transform_1, window_bounds = array<i64: 1, 2, 16, 64>}, {transform_indices = @transform_2, window_bounds = array<i64: 8>}, {transform_indices = @transform_3, window_bounds = array<i64: 1>}, {pipeline_mode = #tpu.pipeline_mode<synchronous>, transform_indices = @transform_4, window_bounds = array<i64: 8, 16>}, {pipeline_mode = #tpu.pipeline_mode<synchronous>, transform_indices = @transform_5, window_bounds = array<i64: 16, 64>}, {pipeline_mode = #tpu.pipeline_mode<synchronous>, transform_indices = @transform_6, window_bounds = array<i64: 16, 64>}, {pipeline_mode = #tpu.pipeline_mode<synchronous>, transform_indices = @transform_7, window_bounds = array<i64: 16, 64>}, {pipeline_mode = #tpu.pipeline_mode<synchronous>, transform_indices = @transform_8, window_bounds = array<i64: 64, 64>}, {transform_indices = @transform_9, window_bounds = array<i64: 1, 1, 64>}, {transform_indices = @transform_10, window_bounds = array<i64: 1, 64, 64>}, {transform_indices = @transform_11, window_bounds = array<i64: 1, 64, 64>}, {transform_indices = @transform_12, window_bounds = array<i64: 1, 64, 64>}, {transform_indices = @transform_13, window_bounds = array<i64: 1, 64, 64>}, {transform_indices = @transform_14, window_bounds = array<i64: 1, 1, 64>}, {transform_indices = @transform_15, window_bounds = array<i64: 1, 64, 128>}, {transform_indices = @transform_16, window_bounds = array<i64: 1, 64, 128>}, {transform_indices = @transform_17, window_bounds = array<i64: 1, 128, 64>}, {pipeline_mode = #tpu.pipeline_mode<synchronous>, transform_indices = @transform_18, window_bounds = array<i64: 1, 64>}, {pipeline_mode = #tpu.pipeline_mode<synchronous>, transform_indices = @transform_19, window_bounds = array<i64: 64, 256>}, {pipeline_mode = #tpu.pipeline_mode<synchronous>, transform_indices = @transform_20, window_bounds = array<i64: 2, 256>}, {transform_indices = @transform_21, window_bounds = array<i64: 1, 2, 16, 64>}, {transform_indices = @transform_22, window_bounds = array<i64: 1, 2, 16, 64>}]} {
    %c0_i32 = arith.constant 0 : i32
    %0 = arith.cmpi eq, %arg0, %c0_i32 : i32
    %1 = arith.extui %0 : i1 to i32
    %c0_i32_0 = arith.constant 0 : i32
    %2 = arith.cmpi ne, %1, %c0_i32_0 : i32
    scf.if %2 {
      %c0_363 = arith.constant 0 : index
      %c0_364 = arith.constant 0 : index
      %463 = vector.load %arg6[%c0_363, %c0_364] : memref<16x64xf32, #tpu.memory_space<vmem>>, vector<16x64xf32>
      %c0_365 = arith.constant 0 : index
      %c0_366 = arith.constant 0 : index
      %464 = vector.load %arg24[%c0_365, %c0_366] : memref<16x64xf32, #tpu.memory_space<vmem>>, vector<16x64xf32>
      tpu.vector_store %arg24[%c0_365, %c0_366], %463 {strides = array<i32>} : memref<16x64xf32, #tpu.memory_space<vmem>>, vector<16x64xf32>,
    } else {
    }
    %c0 = arith.constant 0 : index
    %c0_1 = arith.constant 0 : index
    %3 = vector.load %arg24[%c0, %c0_1] : memref<16x64xf32, #tpu.memory_space<vmem>>, vector<16x64xf32>
    %c0_2 = arith.constant 0 : index
    %c0_3 = arith.constant 0 : index
    %c0_4 = arith.constant 0 : index
    %4 = vector.load %arg10[%c0_2, %c0_3, %c0_4] : memref<1x1x64xf32, #tpu.memory_space<vmem>>, vector<1x1x64xf32>
    %5 = vector.shape_cast %4 : vector<1x1x64xf32> to vector<1x64xf32>
    %6 = arith.mulf %3, %3 : vector<16x64xf32>
    %cst = arith.constant dense<0.000000e+00> : vector<16xf32>
    %7 = vector.multi_reduction <add>, %6, %cst [1] : vector<16x64xf32> to vector<16xf32>
    %8 = vector.shape_cast %7 : vector<16xf32> to vector<16x1xf32>
    %cst_5 = arith.constant 6.400000e+01 : f32
    %9 = vector.broadcast %cst_5 : f32 to vector<16x1xf32>
    %10 = arith.divf %8, %9 : vector<16x1xf32>
    %cst_6 = arith.constant 9.99999997E-7 : f32
    %11 = vector.broadcast %cst_6 : f32 to vector<16x1xf32>
    %12 = arith.addf %10, %11 : vector<16x1xf32>
    %13 = math.rsqrt %12 : vector<16x1xf32>
    %14 = vector.broadcast %13 : vector<16x1xf32> to vector<16x64xf32>
    %15 = arith.mulf %3, %14 : vector<16x64xf32>
    %cst_7 = arith.constant 1.000000e+00 : f32
    %16 = vector.broadcast %cst_7 : f32 to vector<1x64xf32>
    %17 = arith.addf %16, %5 : vector<1x64xf32>
    %18 = vector.broadcast %17 : vector<1x64xf32> to vector<16x64xf32>
    %19 = arith.mulf %15, %18 : vector<16x64xf32>
    %20 = arith.truncf %19 : vector<16x64xf32> to vector<16x64xbf16>
    %c0_8 = arith.constant 0 : index
    %c0_9 = arith.constant 0 : index
    %c0_10 = arith.constant 0 : index
    %21 = vector.load %arg11[%c0_8, %c0_9, %c0_10] : memref<1x64x64xbf16, #tpu.memory_space<vmem>>, vector<1x64x64xbf16>
    %22 = vector.shape_cast %21 : vector<1x64x64xbf16> to vector<64x64xbf16>
    %cst_11 = arith.constant dense<0.000000e+00> : vector<16x64xf32>
    %23 = tpu.matmul %20, %22, %cst_11 {dimension_numbers = #tpu.dot_dimension_numbers<[1], [0], [0], [1], [0, 0, 1, 1], [], []>} : vector<16x64xbf16>, vector<64x64xbf16>, vector<16x64xf32> -> vector<16x64xf32>
    %c0_12 = arith.constant 0 : index
    %c0_13 = arith.constant 0 : index
    %c0_14 = arith.constant 0 : index
    %24 = vector.load %arg12[%c0_12, %c0_13, %c0_14] : memref<1x64x64xbf16, #tpu.memory_space<vmem>>, vector<1x64x64xbf16>
    %25 = vector.shape_cast %24 : vector<1x64x64xbf16> to vector<64x64xbf16>
    %cst_15 = arith.constant dense<0.000000e+00> : vector<16x64xf32>
    %26 = tpu.matmul %20, %25, %cst_15 {dimension_numbers = #tpu.dot_dimension_numbers<[1], [0], [0], [1], [0, 0, 1, 1], [], []>} : vector<16x64xbf16>, vector<64x64xbf16>, vector<16x64xf32> -> vector<16x64xf32>
    %c0_16 = arith.constant 0 : index
    %c0_17 = arith.constant 0 : index
    %c0_18 = arith.constant 0 : index
    %27 = vector.load %arg13[%c0_16, %c0_17, %c0_18] : memref<1x64x64xbf16, #tpu.memory_space<vmem>>, vector<1x64x64xbf16>
    %28 = vector.shape_cast %27 : vector<1x64x64xbf16> to vector<64x64xbf16>
    %cst_19 = arith.constant dense<0.000000e+00> : vector<16x64xf32>
    %29 = tpu.matmul %20, %28, %cst_19 {dimension_numbers = #tpu.dot_dimension_numbers<[1], [0], [0], [1], [0, 0, 1, 1], [], []>} : vector<16x64xbf16>, vector<64x64xbf16>, vector<16x64xf32> -> vector<16x64xf32>
    %c0_20 = arith.constant 0 : index
    %c0_21 = arith.constant 0 : index
    %30 = vector.load %arg9[%c0_20, %c0_21] : memref<64x64xbf16, #tpu.memory_space<vmem>>, vector<64x64xbf16>
    %c0_22 = arith.constant 0 : index
    %c0_23 = arith.constant 0 : index
    %31 = vector.load %arg7[%c0_22, %c0_23] : memref<16x64xf32, #tpu.memory_space<vmem>>, vector<16x64xf32>
    %c0_24 = arith.constant 0 : index
    %c0_25 = arith.constant 0 : index
    %32 = vector.load %arg8[%c0_24, %c0_25] : memref<16x64xf32, #tpu.memory_space<vmem>>, vector<16x64xf32>
    %33 = arith.mulf %23, %31 : vector<16x64xf32>
    %34 = arith.truncf %23 : vector<16x64xf32> to vector<16x64xbf16>
    %cst_26 = arith.constant dense<0.000000e+00> : vector<16x64xf32>
    %35 = tpu.matmul %34, %30, %cst_26 {dimension_numbers = #tpu.dot_dimension_numbers<[1], [0], [0], [1], [0, 0, 1, 1], [], []>} : vector<16x64xbf16>, vector<64x64xbf16>, vector<16x64xf32> -> vector<16x64xf32>
    %36 = arith.mulf %35, %32 : vector<16x64xf32>
    %37 = arith.addf %33, %36 : vector<16x64xf32>
    %38 = arith.mulf %26, %31 : vector<16x64xf32>
    %39 = arith.truncf %26 : vector<16x64xf32> to vector<16x64xbf16>
    %cst_27 = arith.constant dense<0.000000e+00> : vector<16x64xf32>
    %40 = tpu.matmul %39, %30, %cst_27 {dimension_numbers = #tpu.dot_dimension_numbers<[1], [0], [0], [1], [0, 0, 1, 1], [], []>} : vector<16x64xbf16>, vector<64x64xbf16>, vector<16x64xf32> -> vector<16x64xf32>
    %41 = arith.mulf %40, %32 : vector<16x64xf32>
    %42 = arith.addf %38, %41 : vector<16x64xf32>
    %cst_28 = arith.constant 2.500000e-01 : f32
    %43 = vector.broadcast %cst_28 : f32 to vector<16x64xf32>
    %44 = arith.mulf %37, %43 : vector<16x64xf32>
    %c0_29 = arith.constant 0 : index
    %c0_30 = arith.constant 0 : index
    %45 = vector.load %arg25[%c0_29, %c0_30] : memref<16x64xf32, #tpu.memory_space<vmem>>, vector<16x64xf32>
    tpu.vector_store %arg25[%c0_29, %c0_30], %44 {strides = array<i32>} : memref<16x64xf32, #tpu.memory_space<vmem>>, vector<16x64xf32>,
    %c0_31 = arith.constant 0 : index
    %c0_32 = arith.constant 0 : index
    %46 = vector.load %arg26[%c0_31, %c0_32] : memref<16x64xf32, #tpu.memory_space<vmem>>, vector<16x64xf32>
    tpu.vector_store %arg26[%c0_31, %c0_32], %42 {strides = array<i32>} : memref<16x64xf32, #tpu.memory_space<vmem>>, vector<16x64xf32>,
    %c0_33 = arith.constant 0 : index
    %c0_34 = arith.constant 0 : index
    %47 = vector.load %arg27[%c0_33, %c0_34] : memref<16x64xf32, #tpu.memory_space<vmem>>, vector<16x64xf32>
    tpu.vector_store %arg27[%c0_33, %c0_34], %29 {strides = array<i32>} : memref<16x64xf32, #tpu.memory_space<vmem>>, vector<16x64xf32>,
    %c0_35 = arith.constant 0 : index
    %c0_36 = arith.constant 0 : index
    %c0_37 = arith.constant 0 : index
    %c0_38 = arith.constant 0 : index
    %48 = vector.load %arg1[%c0_35, %c0_36, %c0_37, %c0_38] : memref<1x2x16x64xf32, #tpu.memory_space<vmem>>, vector<1x2x16x64xf32>
    %49 = vector.shape_cast %48 : vector<1x2x16x64xf32> to vector<2x16x64xf32>
    %c0_39 = arith.constant 0 : index
    %c0_40 = arith.constant 0 : index
    %c0_41 = arith.constant 0 : index
    %c0_42 = arith.constant 0 : index
    %50 = vector.load %arg22[%c0_39, %c0_40, %c0_41, %c0_42] : memref<1x2x16x64xf32, #tpu.memory_space<vmem>>, vector<1x2x16x64xf32>
    %51 = vector.shape_cast %50 : vector<1x2x16x64xf32> to vector<2x16x64xf32>
    %52 = vector.shape_cast %49 : vector<2x16x64xf32> to vector<1x2x16x64xf32>
    tpu.vector_store %arg22[%c0_39, %c0_40, %c0_41, %c0_42], %52 {strides = array<i32>} : memref<1x2x16x64xf32, #tpu.memory_space<vmem>>, vector<1x2x16x64xf32>,
    %c0_43 = arith.constant 0 : index
    %c0_44 = arith.constant 0 : index
    %c0_45 = arith.constant 0 : index
    %c0_46 = arith.constant 0 : index
    %53 = vector.load %arg2[%c0_43, %c0_44, %c0_45, %c0_46] : memref<1x2x16x64xf32, #tpu.memory_space<vmem>>, vector<1x2x16x64xf32>
    %54 = vector.shape_cast %53 : vector<1x2x16x64xf32> to vector<2x16x64xf32>
    %c0_47 = arith.constant 0 : index
    %c0_48 = arith.constant 0 : index
    %c0_49 = arith.constant 0 : index
    %c0_50 = arith.constant 0 : index
    %55 = vector.load %arg23[%c0_47, %c0_48, %c0_49, %c0_50] : memref<1x2x16x64xf32, #tpu.memory_space<vmem>>, vector<1x2x16x64xf32>
    %56 = vector.shape_cast %55 : vector<1x2x16x64xf32> to vector<2x16x64xf32>
    %57 = vector.shape_cast %54 : vector<2x16x64xf32> to vector<1x2x16x64xf32>
    tpu.vector_store %arg23[%c0_47, %c0_48, %c0_49, %c0_50], %57 {strides = array<i32>} : memref<1x2x16x64xf32, #tpu.memory_space<vmem>>, vector<1x2x16x64xf32>,
    %c0_51 = arith.constant 0 : index
    %58 = memref.load %arg3[%c0_51] : memref<8xi32, #tpu.memory_space<smem>>
    %c0_52 = arith.constant 0 : index
    %c0_53 = arith.constant 0 : index
    %59 = vector.load %arg26[%c0_52, %c0_53] : memref<16x64xf32, #tpu.memory_space<vmem>>, vector<1x64xf32>
    %c0_54 = arith.constant 0 : index
    %c0_55 = arith.constant 0 : index
    %60 = arith.index_cast %58 : i32 to index
    %c0_56 = arith.constant 0 : index
    %61 = vector.load %arg22[%c0_54, %c0_55, %60, %c0_56] : memref<1x2x16x64xf32, #tpu.memory_space<vmem>>, vector<1x1x1x64xf32>
    %62 = vector.shape_cast %61 : vector<1x1x1x64xf32> to vector<1x64xf32>
    %63 = vector.shape_cast %59 : vector<1x64xf32> to vector<1x1x1x64xf32>
    tpu.vector_store %arg22[%c0_54, %c0_55, %60, %c0_56], %63 {strides = array<i32>} : memref<1x2x16x64xf32, #tpu.memory_space<vmem>>, vector<1x1x1x64xf32>,
    %c0_57 = arith.constant 0 : index
    %c0_58 = arith.constant 0 : index
    %64 = vector.load %arg27[%c0_57, %c0_58] : memref<16x64xf32, #tpu.memory_space<vmem>>, vector<1x64xf32>
    %c0_59 = arith.constant 0 : index
    %c0_60 = arith.constant 0 : index
    %65 = arith.index_cast %58 : i32 to index
    %c0_61 = arith.constant 0 : index
    %66 = vector.load %arg23[%c0_59, %c0_60, %65, %c0_61] : memref<1x2x16x64xf32, #tpu.memory_space<vmem>>, vector<1x1x1x64xf32>
    %67 = vector.shape_cast %66 : vector<1x1x1x64xf32> to vector<1x64xf32>
    %68 = vector.shape_cast %64 : vector<1x64xf32> to vector<1x1x1x64xf32>
    tpu.vector_store %arg23[%c0_59, %c0_60, %65, %c0_61], %68 {strides = array<i32>} : memref<1x2x16x64xf32, #tpu.memory_space<vmem>>, vector<1x1x1x64xf32>,
    %c8 = arith.constant 8 : index
    %c0_62 = arith.constant 0 : index
    %69 = vector.load %arg26[%c8, %c0_62] : memref<16x64xf32, #tpu.memory_space<vmem>>, vector<1x64xf32>
    %c0_63 = arith.constant 0 : index
    %c1 = arith.constant 1 : index
    %70 = arith.index_cast %58 : i32 to index
    %c0_64 = arith.constant 0 : index
    %71 = vector.load %arg22[%c0_63, %c1, %70, %c0_64] : memref<1x2x16x64xf32, #tpu.memory_space<vmem>>, vector<1x1x1x64xf32>
    %72 = vector.shape_cast %71 : vector<1x1x1x64xf32> to vector<1x64xf32>
    %73 = vector.shape_cast %69 : vector<1x64xf32> to vector<1x1x1x64xf32>
    tpu.vector_store %arg22[%c0_63, %c1, %70, %c0_64], %73 {strides = array<i32>} : memref<1x2x16x64xf32, #tpu.memory_space<vmem>>, vector<1x1x1x64xf32>,
    %c8_65 = arith.constant 8 : index
    %c0_66 = arith.constant 0 : index
    %74 = vector.load %arg27[%c8_65, %c0_66] : memref<16x64xf32, #tpu.memory_space<vmem>>, vector<1x64xf32>
    %c0_67 = arith.constant 0 : index
    %c1_68 = arith.constant 1 : index
    %75 = arith.index_cast %58 : i32 to index
    %c0_69 = arith.constant 0 : index
    %76 = vector.load %arg23[%c0_67, %c1_68, %75, %c0_69] : memref<1x2x16x64xf32, #tpu.memory_space<vmem>>, vector<1x1x1x64xf32>
    %77 = vector.shape_cast %76 : vector<1x1x1x64xf32> to vector<1x64xf32>
    %78 = vector.shape_cast %74 : vector<1x64xf32> to vector<1x1x1x64xf32>
    tpu.vector_store %arg23[%c0_67, %c1_68, %75, %c0_69], %78 {strides = array<i32>} : memref<1x2x16x64xf32, #tpu.memory_space<vmem>>, vector<1x1x1x64xf32>,
    %c1_70 = arith.constant 1 : index
    %79 = memref.load %arg3[%c1_70] : memref<8xi32, #tpu.memory_space<smem>>
    %c1_71 = arith.constant 1 : index
    %c0_72 = arith.constant 0 : index
    %80 = vector.load %arg26[%c1_71, %c0_72] : memref<16x64xf32, #tpu.memory_space<vmem>>, vector<1x64xf32>
    %c0_73 = arith.constant 0 : index
    %c0_74 = arith.constant 0 : index
    %81 = arith.index_cast %79 : i32 to index
    %c0_75 = arith.constant 0 : index
    %82 = vector.load %arg22[%c0_73, %c0_74, %81, %c0_75] : memref<1x2x16x64xf32, #tpu.memory_space<vmem>>, vector<1x1x1x64xf32>
    %83 = vector.shape_cast %82 : vector<1x1x1x64xf32> to vector<1x64xf32>
    %84 = vector.shape_cast %80 : vector<1x64xf32> to vector<1x1x1x64xf32>
    tpu.vector_store %arg22[%c0_73, %c0_74, %81, %c0_75], %84 {strides = array<i32>} : memref<1x2x16x64xf32, #tpu.memory_space<vmem>>, vector<1x1x1x64xf32>,
    %c1_76 = arith.constant 1 : index
    %c0_77 = arith.constant 0 : index
    %85 = vector.load %arg27[%c1_76, %c0_77] : memref<16x64xf32, #tpu.memory_space<vmem>>, vector<1x64xf32>
    %c0_78 = arith.constant 0 : index
    %c0_79 = arith.constant 0 : index
    %86 = arith.index_cast %79 : i32 to index
    %c0_80 = arith.constant 0 : index
    %87 = vector.load %arg23[%c0_78, %c0_79, %86, %c0_80] : memref<1x2x16x64xf32, #tpu.memory_space<vmem>>, vector<1x1x1x64xf32>
    %88 = vector.shape_cast %87 : vector<1x1x1x64xf32> to vector<1x64xf32>
    %89 = vector.shape_cast %85 : vector<1x64xf32> to vector<1x1x1x64xf32>
    tpu.vector_store %arg23[%c0_78, %c0_79, %86, %c0_80], %89 {strides = array<i32>} : memref<1x2x16x64xf32, #tpu.memory_space<vmem>>, vector<1x1x1x64xf32>,
    %c9 = arith.constant 9 : index
    %c0_81 = arith.constant 0 : index
    %90 = vector.load %arg26[%c9, %c0_81] : memref<16x64xf32, #tpu.memory_space<vmem>>, vector<1x64xf32>
    %c0_82 = arith.constant 0 : index
    %c1_83 = arith.constant 1 : index
    %91 = arith.index_cast %79 : i32 to index
    %c0_84 = arith.constant 0 : index
    %92 = vector.load %arg22[%c0_82, %c1_83, %91, %c0_84] : memref<1x2x16x64xf32, #tpu.memory_space<vmem>>, vector<1x1x1x64xf32>
    %93 = vector.shape_cast %92 : vector<1x1x1x64xf32> to vector<1x64xf32>
    %94 = vector.shape_cast %90 : vector<1x64xf32> to vector<1x1x1x64xf32>
    tpu.vector_store %arg22[%c0_82, %c1_83, %91, %c0_84], %94 {strides = array<i32>} : memref<1x2x16x64xf32, #tpu.memory_space<vmem>>, vector<1x1x1x64xf32>,
    %c9_85 = arith.constant 9 : index
    %c0_86 = arith.constant 0 : index
    %95 = vector.load %arg27[%c9_85, %c0_86] : memref<16x64xf32, #tpu.memory_space<vmem>>, vector<1x64xf32>
    %c0_87 = arith.constant 0 : index
    %c1_88 = arith.constant 1 : index
    %96 = arith.index_cast %79 : i32 to index
    %c0_89 = arith.constant 0 : index
    %97 = vector.load %arg23[%c0_87, %c1_88, %96, %c0_89] : memref<1x2x16x64xf32, #tpu.memory_space<vmem>>, vector<1x1x1x64xf32>
    %98 = vector.shape_cast %97 : vector<1x1x1x64xf32> to vector<1x64xf32>
    %99 = vector.shape_cast %95 : vector<1x64xf32> to vector<1x1x1x64xf32>
    tpu.vector_store %arg23[%c0_87, %c1_88, %96, %c0_89], %99 {strides = array<i32>} : memref<1x2x16x64xf32, #tpu.memory_space<vmem>>, vector<1x1x1x64xf32>,
    %c2 = arith.constant 2 : index
    %100 = memref.load %arg3[%c2] : memref<8xi32, #tpu.memory_space<smem>>
    %c2_90 = arith.constant 2 : index
    %c0_91 = arith.constant 0 : index
    %101 = vector.load %arg26[%c2_90, %c0_91] : memref<16x64xf32, #tpu.memory_space<vmem>>, vector<1x64xf32>
    %c0_92 = arith.constant 0 : index
    %c0_93 = arith.constant 0 : index
    %102 = arith.index_cast %100 : i32 to index
    %c0_94 = arith.constant 0 : index
    %103 = vector.load %arg22[%c0_92, %c0_93, %102, %c0_94] : memref<1x2x16x64xf32, #tpu.memory_space<vmem>>, vector<1x1x1x64xf32>
    %104 = vector.shape_cast %103 : vector<1x1x1x64xf32> to vector<1x64xf32>
    %105 = vector.shape_cast %101 : vector<1x64xf32> to vector<1x1x1x64xf32>
    tpu.vector_store %arg22[%c0_92, %c0_93, %102, %c0_94], %105 {strides = array<i32>} : memref<1x2x16x64xf32, #tpu.memory_space<vmem>>, vector<1x1x1x64xf32>,
    %c2_95 = arith.constant 2 : index
    %c0_96 = arith.constant 0 : index
    %106 = vector.load %arg27[%c2_95, %c0_96] : memref<16x64xf32, #tpu.memory_space<vmem>>, vector<1x64xf32>
    %c0_97 = arith.constant 0 : index
    %c0_98 = arith.constant 0 : index
    %107 = arith.index_cast %100 : i32 to index
    %c0_99 = arith.constant 0 : index
    %108 = vector.load %arg23[%c0_97, %c0_98, %107, %c0_99] : memref<1x2x16x64xf32, #tpu.memory_space<vmem>>, vector<1x1x1x64xf32>
    %109 = vector.shape_cast %108 : vector<1x1x1x64xf32> to vector<1x64xf32>
    %110 = vector.shape_cast %106 : vector<1x64xf32> to vector<1x1x1x64xf32>
    tpu.vector_store %arg23[%c0_97, %c0_98, %107, %c0_99], %110 {strides = array<i32>} : memref<1x2x16x64xf32, #tpu.memory_space<vmem>>, vector<1x1x1x64xf32>,
    %c10 = arith.constant 10 : index
    %c0_100 = arith.constant 0 : index
    %111 = vector.load %arg26[%c10, %c0_100] : memref<16x64xf32, #tpu.memory_space<vmem>>, vector<1x64xf32>
    %c0_101 = arith.constant 0 : index
    %c1_102 = arith.constant 1 : index
    %112 = arith.index_cast %100 : i32 to index
    %c0_103 = arith.constant 0 : index
    %113 = vector.load %arg22[%c0_101, %c1_102, %112, %c0_103] : memref<1x2x16x64xf32, #tpu.memory_space<vmem>>, vector<1x1x1x64xf32>
    %114 = vector.shape_cast %113 : vector<1x1x1x64xf32> to vector<1x64xf32>
    %115 = vector.shape_cast %111 : vector<1x64xf32> to vector<1x1x1x64xf32>
    tpu.vector_store %arg22[%c0_101, %c1_102, %112, %c0_103], %115 {strides = array<i32>} : memref<1x2x16x64xf32, #tpu.memory_space<vmem>>, vector<1x1x1x64xf32>,
    %c10_104 = arith.constant 10 : index
    %c0_105 = arith.constant 0 : index
    %116 = vector.load %arg27[%c10_104, %c0_105] : memref<16x64xf32, #tpu.memory_space<vmem>>, vector<1x64xf32>
    %c0_106 = arith.constant 0 : index
    %c1_107 = arith.constant 1 : index
    %117 = arith.index_cast %100 : i32 to index
    %c0_108 = arith.constant 0 : index
    %118 = vector.load %arg23[%c0_106, %c1_107, %117, %c0_108] : memref<1x2x16x64xf32, #tpu.memory_space<vmem>>, vector<1x1x1x64xf32>
    %119 = vector.shape_cast %118 : vector<1x1x1x64xf32> to vector<1x64xf32>
    %120 = vector.shape_cast %116 : vector<1x64xf32> to vector<1x1x1x64xf32>
    tpu.vector_store %arg23[%c0_106, %c1_107, %117, %c0_108], %120 {strides = array<i32>} : memref<1x2x16x64xf32, #tpu.memory_space<vmem>>, vector<1x1x1x64xf32>,
    %c3 = arith.constant 3 : index
    %121 = memref.load %arg3[%c3] : memref<8xi32, #tpu.memory_space<smem>>
    %c3_109 = arith.constant 3 : index
    %c0_110 = arith.constant 0 : index
    %122 = vector.load %arg26[%c3_109, %c0_110] : memref<16x64xf32, #tpu.memory_space<vmem>>, vector<1x64xf32>
    %c0_111 = arith.constant 0 : index
    %c0_112 = arith.constant 0 : index
    %123 = arith.index_cast %121 : i32 to index
    %c0_113 = arith.constant 0 : index
    %124 = vector.load %arg22[%c0_111, %c0_112, %123, %c0_113] : memref<1x2x16x64xf32, #tpu.memory_space<vmem>>, vector<1x1x1x64xf32>
    %125 = vector.shape_cast %124 : vector<1x1x1x64xf32> to vector<1x64xf32>
    %126 = vector.shape_cast %122 : vector<1x64xf32> to vector<1x1x1x64xf32>
    tpu.vector_store %arg22[%c0_111, %c0_112, %123, %c0_113], %126 {strides = array<i32>} : memref<1x2x16x64xf32, #tpu.memory_space<vmem>>, vector<1x1x1x64xf32>,
    %c3_114 = arith.constant 3 : index
    %c0_115 = arith.constant 0 : index
    %127 = vector.load %arg27[%c3_114, %c0_115] : memref<16x64xf32, #tpu.memory_space<vmem>>, vector<1x64xf32>
    %c0_116 = arith.constant 0 : index
    %c0_117 = arith.constant 0 : index
    %128 = arith.index_cast %121 : i32 to index
    %c0_118 = arith.constant 0 : index
    %129 = vector.load %arg23[%c0_116, %c0_117, %128, %c0_118] : memref<1x2x16x64xf32, #tpu.memory_space<vmem>>, vector<1x1x1x64xf32>
    %130 = vector.shape_cast %129 : vector<1x1x1x64xf32> to vector<1x64xf32>
    %131 = vector.shape_cast %127 : vector<1x64xf32> to vector<1x1x1x64xf32>
    tpu.vector_store %arg23[%c0_116, %c0_117, %128, %c0_118], %131 {strides = array<i32>} : memref<1x2x16x64xf32, #tpu.memory_space<vmem>>, vector<1x1x1x64xf32>,
    %c11 = arith.constant 11 : index
    %c0_119 = arith.constant 0 : index
    %132 = vector.load %arg26[%c11, %c0_119] : memref<16x64xf32, #tpu.memory_space<vmem>>, vector<1x64xf32>
    %c0_120 = arith.constant 0 : index
    %c1_121 = arith.constant 1 : index
    %133 = arith.index_cast %121 : i32 to index
    %c0_122 = arith.constant 0 : index
    %134 = vector.load %arg22[%c0_120, %c1_121, %133, %c0_122] : memref<1x2x16x64xf32, #tpu.memory_space<vmem>>, vector<1x1x1x64xf32>
    %135 = vector.shape_cast %134 : vector<1x1x1x64xf32> to vector<1x64xf32>
    %136 = vector.shape_cast %132 : vector<1x64xf32> to vector<1x1x1x64xf32>
    tpu.vector_store %arg22[%c0_120, %c1_121, %133, %c0_122], %136 {strides = array<i32>} : memref<1x2x16x64xf32, #tpu.memory_space<vmem>>, vector<1x1x1x64xf32>,
    %c11_123 = arith.constant 11 : index
    %c0_124 = arith.constant 0 : index
    %137 = vector.load %arg27[%c11_123, %c0_124] : memref<16x64xf32, #tpu.memory_space<vmem>>, vector<1x64xf32>
    %c0_125 = arith.constant 0 : index
    %c1_126 = arith.constant 1 : index
    %138 = arith.index_cast %121 : i32 to index
    %c0_127 = arith.constant 0 : index
    %139 = vector.load %arg23[%c0_125, %c1_126, %138, %c0_127] : memref<1x2x16x64xf32, #tpu.memory_space<vmem>>, vector<1x1x1x64xf32>
    %140 = vector.shape_cast %139 : vector<1x1x1x64xf32> to vector<1x64xf32>
    %141 = vector.shape_cast %137 : vector<1x64xf32> to vector<1x1x1x64xf32>
    tpu.vector_store %arg23[%c0_125, %c1_126, %138, %c0_127], %141 {strides = array<i32>} : memref<1x2x16x64xf32, #tpu.memory_space<vmem>>, vector<1x1x1x64xf32>,
    %c4 = arith.constant 4 : index
    %142 = memref.load %arg3[%c4] : memref<8xi32, #tpu.memory_space<smem>>
    %c4_128 = arith.constant 4 : index
    %c0_129 = arith.constant 0 : index
    %143 = vector.load %arg26[%c4_128, %c0_129] : memref<16x64xf32, #tpu.memory_space<vmem>>, vector<1x64xf32>
    %c0_130 = arith.constant 0 : index
    %c0_131 = arith.constant 0 : index
    %144 = arith.index_cast %142 : i32 to index
    %c0_132 = arith.constant 0 : index
    %145 = vector.load %arg22[%c0_130, %c0_131, %144, %c0_132] : memref<1x2x16x64xf32, #tpu.memory_space<vmem>>, vector<1x1x1x64xf32>
    %146 = vector.shape_cast %145 : vector<1x1x1x64xf32> to vector<1x64xf32>
    %147 = vector.shape_cast %143 : vector<1x64xf32> to vector<1x1x1x64xf32>
    tpu.vector_store %arg22[%c0_130, %c0_131, %144, %c0_132], %147 {strides = array<i32>} : memref<1x2x16x64xf32, #tpu.memory_space<vmem>>, vector<1x1x1x64xf32>,
    %c4_133 = arith.constant 4 : index
    %c0_134 = arith.constant 0 : index
    %148 = vector.load %arg27[%c4_133, %c0_134] : memref<16x64xf32, #tpu.memory_space<vmem>>, vector<1x64xf32>
    %c0_135 = arith.constant 0 : index
    %c0_136 = arith.constant 0 : index
    %149 = arith.index_cast %142 : i32 to index
    %c0_137 = arith.constant 0 : index
    %150 = vector.load %arg23[%c0_135, %c0_136, %149, %c0_137] : memref<1x2x16x64xf32, #tpu.memory_space<vmem>>, vector<1x1x1x64xf32>
    %151 = vector.shape_cast %150 : vector<1x1x1x64xf32> to vector<1x64xf32>
    %152 = vector.shape_cast %148 : vector<1x64xf32> to vector<1x1x1x64xf32>
    tpu.vector_store %arg23[%c0_135, %c0_136, %149, %c0_137], %152 {strides = array<i32>} : memref<1x2x16x64xf32, #tpu.memory_space<vmem>>, vector<1x1x1x64xf32>,
    %c12 = arith.constant 12 : index
    %c0_138 = arith.constant 0 : index
    %153 = vector.load %arg26[%c12, %c0_138] : memref<16x64xf32, #tpu.memory_space<vmem>>, vector<1x64xf32>
    %c0_139 = arith.constant 0 : index
    %c1_140 = arith.constant 1 : index
    %154 = arith.index_cast %142 : i32 to index
    %c0_141 = arith.constant 0 : index
    %155 = vector.load %arg22[%c0_139, %c1_140, %154, %c0_141] : memref<1x2x16x64xf32, #tpu.memory_space<vmem>>, vector<1x1x1x64xf32>
    %156 = vector.shape_cast %155 : vector<1x1x1x64xf32> to vector<1x64xf32>
    %157 = vector.shape_cast %153 : vector<1x64xf32> to vector<1x1x1x64xf32>
    tpu.vector_store %arg22[%c0_139, %c1_140, %154, %c0_141], %157 {strides = array<i32>} : memref<1x2x16x64xf32, #tpu.memory_space<vmem>>, vector<1x1x1x64xf32>,
    %c12_142 = arith.constant 12 : index
    %c0_143 = arith.constant 0 : index
    %158 = vector.load %arg27[%c12_142, %c0_143] : memref<16x64xf32, #tpu.memory_space<vmem>>, vector<1x64xf32>
    %c0_144 = arith.constant 0 : index
    %c1_145 = arith.constant 1 : index
    %159 = arith.index_cast %142 : i32 to index
    %c0_146 = arith.constant 0 : index
    %160 = vector.load %arg23[%c0_144, %c1_145, %159, %c0_146] : memref<1x2x16x64xf32, #tpu.memory_space<vmem>>, vector<1x1x1x64xf32>
    %161 = vector.shape_cast %160 : vector<1x1x1x64xf32> to vector<1x64xf32>
    %162 = vector.shape_cast %158 : vector<1x64xf32> to vector<1x1x1x64xf32>
    tpu.vector_store %arg23[%c0_144, %c1_145, %159, %c0_146], %162 {strides = array<i32>} : memref<1x2x16x64xf32, #tpu.memory_space<vmem>>, vector<1x1x1x64xf32>,
    %c5 = arith.constant 5 : index
    %163 = memref.load %arg3[%c5] : memref<8xi32, #tpu.memory_space<smem>>
    %c5_147 = arith.constant 5 : index
    %c0_148 = arith.constant 0 : index
    %164 = vector.load %arg26[%c5_147, %c0_148] : memref<16x64xf32, #tpu.memory_space<vmem>>, vector<1x64xf32>
    %c0_149 = arith.constant 0 : index
    %c0_150 = arith.constant 0 : index
    %165 = arith.index_cast %163 : i32 to index
    %c0_151 = arith.constant 0 : index
    %166 = vector.load %arg22[%c0_149, %c0_150, %165, %c0_151] : memref<1x2x16x64xf32, #tpu.memory_space<vmem>>, vector<1x1x1x64xf32>
    %167 = vector.shape_cast %166 : vector<1x1x1x64xf32> to vector<1x64xf32>
    %168 = vector.shape_cast %164 : vector<1x64xf32> to vector<1x1x1x64xf32>
    tpu.vector_store %arg22[%c0_149, %c0_150, %165, %c0_151], %168 {strides = array<i32>} : memref<1x2x16x64xf32, #tpu.memory_space<vmem>>, vector<1x1x1x64xf32>,
    %c5_152 = arith.constant 5 : index
    %c0_153 = arith.constant 0 : index
    %169 = vector.load %arg27[%c5_152, %c0_153] : memref<16x64xf32, #tpu.memory_space<vmem>>, vector<1x64xf32>
    %c0_154 = arith.constant 0 : index
    %c0_155 = arith.constant 0 : index
    %170 = arith.index_cast %163 : i32 to index
    %c0_156 = arith.constant 0 : index
    %171 = vector.load %arg23[%c0_154, %c0_155, %170, %c0_156] : memref<1x2x16x64xf32, #tpu.memory_space<vmem>>, vector<1x1x1x64xf32>
    %172 = vector.shape_cast %171 : vector<1x1x1x64xf32> to vector<1x64xf32>
    %173 = vector.shape_cast %169 : vector<1x64xf32> to vector<1x1x1x64xf32>
    tpu.vector_store %arg23[%c0_154, %c0_155, %170, %c0_156], %173 {strides = array<i32>} : memref<1x2x16x64xf32, #tpu.memory_space<vmem>>, vector<1x1x1x64xf32>,
    %c13 = arith.constant 13 : index
    %c0_157 = arith.constant 0 : index
    %174 = vector.load %arg26[%c13, %c0_157] : memref<16x64xf32, #tpu.memory_space<vmem>>, vector<1x64xf32>
    %c0_158 = arith.constant 0 : index
    %c1_159 = arith.constant 1 : index
    %175 = arith.index_cast %163 : i32 to index
    %c0_160 = arith.constant 0 : index
    %176 = vector.load %arg22[%c0_158, %c1_159, %175, %c0_160] : memref<1x2x16x64xf32, #tpu.memory_space<vmem>>, vector<1x1x1x64xf32>
    %177 = vector.shape_cast %176 : vector<1x1x1x64xf32> to vector<1x64xf32>
    %178 = vector.shape_cast %174 : vector<1x64xf32> to vector<1x1x1x64xf32>
    tpu.vector_store %arg22[%c0_158, %c1_159, %175, %c0_160], %178 {strides = array<i32>} : memref<1x2x16x64xf32, #tpu.memory_space<vmem>>, vector<1x1x1x64xf32>,
    %c13_161 = arith.constant 13 : index
    %c0_162 = arith.constant 0 : index
    %179 = vector.load %arg27[%c13_161, %c0_162] : memref<16x64xf32, #tpu.memory_space<vmem>>, vector<1x64xf32>
    %c0_163 = arith.constant 0 : index
    %c1_164 = arith.constant 1 : index
    %180 = arith.index_cast %163 : i32 to index
    %c0_165 = arith.constant 0 : index
    %181 = vector.load %arg23[%c0_163, %c1_164, %180, %c0_165] : memref<1x2x16x64xf32, #tpu.memory_space<vmem>>, vector<1x1x1x64xf32>
    %182 = vector.shape_cast %181 : vector<1x1x1x64xf32> to vector<1x64xf32>
    %183 = vector.shape_cast %179 : vector<1x64xf32> to vector<1x1x1x64xf32>
    tpu.vector_store %arg23[%c0_163, %c1_164, %180, %c0_165], %183 {strides = array<i32>} : memref<1x2x16x64xf32, #tpu.memory_space<vmem>>, vector<1x1x1x64xf32>,
    %c6 = arith.constant 6 : index
    %184 = memref.load %arg3[%c6] : memref<8xi32, #tpu.memory_space<smem>>
    %c6_166 = arith.constant 6 : index
    %c0_167 = arith.constant 0 : index
    %185 = vector.load %arg26[%c6_166, %c0_167] : memref<16x64xf32, #tpu.memory_space<vmem>>, vector<1x64xf32>
    %c0_168 = arith.constant 0 : index
    %c0_169 = arith.constant 0 : index
    %186 = arith.index_cast %184 : i32 to index
    %c0_170 = arith.constant 0 : index
    %187 = vector.load %arg22[%c0_168, %c0_169, %186, %c0_170] : memref<1x2x16x64xf32, #tpu.memory_space<vmem>>, vector<1x1x1x64xf32>
    %188 = vector.shape_cast %187 : vector<1x1x1x64xf32> to vector<1x64xf32>
    %189 = vector.shape_cast %185 : vector<1x64xf32> to vector<1x1x1x64xf32>
    tpu.vector_store %arg22[%c0_168, %c0_169, %186, %c0_170], %189 {strides = array<i32>} : memref<1x2x16x64xf32, #tpu.memory_space<vmem>>, vector<1x1x1x64xf32>,
    %c6_171 = arith.constant 6 : index
    %c0_172 = arith.constant 0 : index
    %190 = vector.load %arg27[%c6_171, %c0_172] : memref<16x64xf32, #tpu.memory_space<vmem>>, vector<1x64xf32>
    %c0_173 = arith.constant 0 : index
    %c0_174 = arith.constant 0 : index
    %191 = arith.index_cast %184 : i32 to index
    %c0_175 = arith.constant 0 : index
    %192 = vector.load %arg23[%c0_173, %c0_174, %191, %c0_175] : memref<1x2x16x64xf32, #tpu.memory_space<vmem>>, vector<1x1x1x64xf32>
    %193 = vector.shape_cast %192 : vector<1x1x1x64xf32> to vector<1x64xf32>
    %194 = vector.shape_cast %190 : vector<1x64xf32> to vector<1x1x1x64xf32>
    tpu.vector_store %arg23[%c0_173, %c0_174, %191, %c0_175], %194 {strides = array<i32>} : memref<1x2x16x64xf32, #tpu.memory_space<vmem>>, vector<1x1x1x64xf32>,
    %c14 = arith.constant 14 : index
    %c0_176 = arith.constant 0 : index
    %195 = vector.load %arg26[%c14, %c0_176] : memref<16x64xf32, #tpu.memory_space<vmem>>, vector<1x64xf32>
    %c0_177 = arith.constant 0 : index
    %c1_178 = arith.constant 1 : index
    %196 = arith.index_cast %184 : i32 to index
    %c0_179 = arith.constant 0 : index
    %197 = vector.load %arg22[%c0_177, %c1_178, %196, %c0_179] : memref<1x2x16x64xf32, #tpu.memory_space<vmem>>, vector<1x1x1x64xf32>
    %198 = vector.shape_cast %197 : vector<1x1x1x64xf32> to vector<1x64xf32>
    %199 = vector.shape_cast %195 : vector<1x64xf32> to vector<1x1x1x64xf32>
    tpu.vector_store %arg22[%c0_177, %c1_178, %196, %c0_179], %199 {strides = array<i32>} : memref<1x2x16x64xf32, #tpu.memory_space<vmem>>, vector<1x1x1x64xf32>,
    %c14_180 = arith.constant 14 : index
    %c0_181 = arith.constant 0 : index
    %200 = vector.load %arg27[%c14_180, %c0_181] : memref<16x64xf32, #tpu.memory_space<vmem>>, vector<1x64xf32>
    %c0_182 = arith.constant 0 : index
    %c1_183 = arith.constant 1 : index
    %201 = arith.index_cast %184 : i32 to index
    %c0_184 = arith.constant 0 : index
    %202 = vector.load %arg23[%c0_182, %c1_183, %201, %c0_184] : memref<1x2x16x64xf32, #tpu.memory_space<vmem>>, vector<1x1x1x64xf32>
    %203 = vector.shape_cast %202 : vector<1x1x1x64xf32> to vector<1x64xf32>
    %204 = vector.shape_cast %200 : vector<1x64xf32> to vector<1x1x1x64xf32>
    tpu.vector_store %arg23[%c0_182, %c1_183, %201, %c0_184], %204 {strides = array<i32>} : memref<1x2x16x64xf32, #tpu.memory_space<vmem>>, vector<1x1x1x64xf32>,
    %c7 = arith.constant 7 : index
    %205 = memref.load %arg3[%c7] : memref<8xi32, #tpu.memory_space<smem>>
    %c7_185 = arith.constant 7 : index
    %c0_186 = arith.constant 0 : index
    %206 = vector.load %arg26[%c7_185, %c0_186] : memref<16x64xf32, #tpu.memory_space<vmem>>, vector<1x64xf32>
    %c0_187 = arith.constant 0 : index
    %c0_188 = arith.constant 0 : index
    %207 = arith.index_cast %205 : i32 to index
    %c0_189 = arith.constant 0 : index
    %208 = vector.load %arg22[%c0_187, %c0_188, %207, %c0_189] : memref<1x2x16x64xf32, #tpu.memory_space<vmem>>, vector<1x1x1x64xf32>
    %209 = vector.shape_cast %208 : vector<1x1x1x64xf32> to vector<1x64xf32>
    %210 = vector.shape_cast %206 : vector<1x64xf32> to vector<1x1x1x64xf32>
    tpu.vector_store %arg22[%c0_187, %c0_188, %207, %c0_189], %210 {strides = array<i32>} : memref<1x2x16x64xf32, #tpu.memory_space<vmem>>, vector<1x1x1x64xf32>,
    %c7_190 = arith.constant 7 : index
    %c0_191 = arith.constant 0 : index
    %211 = vector.load %arg27[%c7_190, %c0_191] : memref<16x64xf32, #tpu.memory_space<vmem>>, vector<1x64xf32>
    %c0_192 = arith.constant 0 : index
    %c0_193 = arith.constant 0 : index
    %212 = arith.index_cast %205 : i32 to index
    %c0_194 = arith.constant 0 : index
    %213 = vector.load %arg23[%c0_192, %c0_193, %212, %c0_194] : memref<1x2x16x64xf32, #tpu.memory_space<vmem>>, vector<1x1x1x64xf32>
    %214 = vector.shape_cast %213 : vector<1x1x1x64xf32> to vector<1x64xf32>
    %215 = vector.shape_cast %211 : vector<1x64xf32> to vector<1x1x1x64xf32>
    tpu.vector_store %arg23[%c0_192, %c0_193, %212, %c0_194], %215 {strides = array<i32>} : memref<1x2x16x64xf32, #tpu.memory_space<vmem>>, vector<1x1x1x64xf32>,
    %c15 = arith.constant 15 : index
    %c0_195 = arith.constant 0 : index
    %216 = vector.load %arg26[%c15, %c0_195] : memref<16x64xf32, #tpu.memory_space<vmem>>, vector<1x64xf32>
    %c0_196 = arith.constant 0 : index
    %c1_197 = arith.constant 1 : index
    %217 = arith.index_cast %205 : i32 to index
    %c0_198 = arith.constant 0 : index
    %218 = vector.load %arg22[%c0_196, %c1_197, %217, %c0_198] : memref<1x2x16x64xf32, #tpu.memory_space<vmem>>, vector<1x1x1x64xf32>
    %219 = vector.shape_cast %218 : vector<1x1x1x64xf32> to vector<1x64xf32>
    %220 = vector.shape_cast %216 : vector<1x64xf32> to vector<1x1x1x64xf32>
    tpu.vector_store %arg22[%c0_196, %c1_197, %217, %c0_198], %220 {strides = array<i32>} : memref<1x2x16x64xf32, #tpu.memory_space<vmem>>, vector<1x1x1x64xf32>,
    %c15_199 = arith.constant 15 : index
    %c0_200 = arith.constant 0 : index
    %221 = vector.load %arg27[%c15_199, %c0_200] : memref<16x64xf32, #tpu.memory_space<vmem>>, vector<1x64xf32>
    %c0_201 = arith.constant 0 : index
    %c1_202 = arith.constant 1 : index
    %222 = arith.index_cast %205 : i32 to index
    %c0_203 = arith.constant 0 : index
    %223 = vector.load %arg23[%c0_201, %c1_202, %222, %c0_203] : memref<1x2x16x64xf32, #tpu.memory_space<vmem>>, vector<1x1x1x64xf32>
    %224 = vector.shape_cast %223 : vector<1x1x1x64xf32> to vector<1x64xf32>
    %225 = vector.shape_cast %221 : vector<1x64xf32> to vector<1x1x1x64xf32>
    tpu.vector_store %arg23[%c0_201, %c1_202, %222, %c0_203], %225 {strides = array<i32>} : memref<1x2x16x64xf32, #tpu.memory_space<vmem>>, vector<1x1x1x64xf32>,
    %c0_204 = arith.constant 0 : index
    %c0_205 = arith.constant 0 : index
    %226 = vector.load %arg5[%c0_204, %c0_205] : memref<8x16xf32, #tpu.memory_space<vmem>>, vector<8x16xf32>
    %c0_206 = arith.constant 0 : index
    %c0_207 = arith.constant 0 : index
    %227 = vector.load %arg25[%c0_206, %c0_207] : memref<16x64xf32, #tpu.memory_space<vmem>>, vector<8x16xf32>
    %228 = arith.truncf %227 : vector<8x16xf32> to vector<8x16xbf16>
    %c0_208 = arith.constant 0 : index
    %c0_209 = arith.constant 0 : index
    %c0_210 = arith.constant 0 : index
    %c0_211 = arith.constant 0 : index
    %229 = vector.load %arg22[%c0_208, %c0_209, %c0_210, %c0_211] : memref<1x2x16x64xf32, #tpu.memory_space<vmem>>, vector<1x1x16x16xf32>
    %230 = vector.shape_cast %229 : vector<1x1x16x16xf32> to vector<16x16xf32>
    %231 = arith.truncf %230 : vector<16x16xf32> to vector<16x16xbf16>
    %c0_212 = arith.constant 0 : index
    %c0_213 = arith.constant 0 : index
    %c0_214 = arith.constant 0 : index
    %c0_215 = arith.constant 0 : index
    %232 = vector.load %arg23[%c0_212, %c0_213, %c0_214, %c0_215] : memref<1x2x16x64xf32, #tpu.memory_space<vmem>>, vector<1x1x16x16xf32>
    %233 = vector.shape_cast %232 : vector<1x1x16x16xf32> to vector<16x16xf32>
    %234 = arith.truncf %233 : vector<16x16xf32> to vector<16x16xbf16>
    %cst_216 = arith.constant dense<0.000000e+00> : vector<8x16xf32>
    %235 = tpu.matmul %228, %231, %cst_216 {dimension_numbers = #tpu.dot_dimension_numbers<[1], [1], [0], [0], [0, 0, 1, 0], [], []>} : vector<8x16xbf16>, vector<16x16xbf16>, vector<8x16xf32> -> vector<8x16xf32>
    %236 = arith.addf %235, %226 : vector<8x16xf32>
    %cst_217 = arith.constant dense<0xFF800000> : vector<8xf32>
    %237 = vector.multi_reduction <maximumf>, %236, %cst_217 [1] : vector<8x16xf32> to vector<8xf32>
    %238 = vector.shape_cast %237 : vector<8xf32> to vector<8x1xf32>
    %239 = vector.broadcast %238 : vector<8x1xf32> to vector<8x16xf32>
    %240 = arith.subf %236, %239 : vector<8x16xf32>
    %241 = math.exp %240 : vector<8x16xf32>
    %cst_218 = arith.constant dense<0.000000e+00> : vector<8xf32>
    %242 = vector.multi_reduction <add>, %241, %cst_218 [1] : vector<8x16xf32> to vector<8xf32>
    %243 = vector.shape_cast %242 : vector<8xf32> to vector<8x1xf32>
    %244 = arith.truncf %241 : vector<8x16xf32> to vector<8x16xbf16>
    %cst_219 = arith.constant dense<0.000000e+00> : vector<8x16xf32>
    %245 = tpu.matmul %244, %234, %cst_219 {dimension_numbers = #tpu.dot_dimension_numbers<[1], [0], [0], [1], [0, 0, 1, 1], [], []>} : vector<8x16xbf16>, vector<16x16xbf16>, vector<8x16xf32> -> vector<8x16xf32>
    %246 = tpu.reciprocal %243 {approx = true} : vector<8x1xf32> -> vector<8x1xf32>
    %247 = vector.broadcast %246 : vector<8x1xf32> to vector<8x16xf32>
    %248 = arith.mulf %245, %247 : vector<8x16xf32>
    %c0_220 = arith.constant 0 : index
    %c0_221 = arith.constant 0 : index
    %249 = vector.load %arg28[%c0_220, %c0_221] : memref<16x64xf32, #tpu.memory_space<vmem>>, vector<8x16xf32>
    tpu.vector_store %arg28[%c0_220, %c0_221], %248 {strides = array<i32>} : memref<16x64xf32, #tpu.memory_space<vmem>>, vector<8x16xf32>,
    %c0_222 = arith.constant 0 : index
    %c16 = arith.constant 16 : index
    %250 = vector.load %arg25[%c0_222, %c16] : memref<16x64xf32, #tpu.memory_space<vmem>>, vector<8x16xf32>
    %251 = arith.truncf %250 : vector<8x16xf32> to vector<8x16xbf16>
    %c0_223 = arith.constant 0 : index
    %c0_224 = arith.constant 0 : index
    %c0_225 = arith.constant 0 : index
    %c16_226 = arith.constant 16 : index
    %252 = vector.load %arg22[%c0_223, %c0_224, %c0_225, %c16_226] : memref<1x2x16x64xf32, #tpu.memory_space<vmem>>, vector<1x1x16x16xf32>
    %253 = vector.shape_cast %252 : vector<1x1x16x16xf32> to vector<16x16xf32>
    %254 = arith.truncf %253 : vector<16x16xf32> to vector<16x16xbf16>
    %c0_227 = arith.constant 0 : index
    %c0_228 = arith.constant 0 : index
    %c0_229 = arith.constant 0 : index
    %c16_230 = arith.constant 16 : index
    %255 = vector.load %arg23[%c0_227, %c0_228, %c0_229, %c16_230] : memref<1x2x16x64xf32, #tpu.memory_space<vmem>>, vector<1x1x16x16xf32>
    %256 = vector.shape_cast %255 : vector<1x1x16x16xf32> to vector<16x16xf32>
    %257 = arith.truncf %256 : vector<16x16xf32> to vector<16x16xbf16>
    %cst_231 = arith.constant dense<0.000000e+00> : vector<8x16xf32>
    %258 = tpu.matmul %251, %254, %cst_231 {dimension_numbers = #tpu.dot_dimension_numbers<[1], [1], [0], [0], [0, 0, 1, 0], [], []>} : vector<8x16xbf16>, vector<16x16xbf16>, vector<8x16xf32> -> vector<8x16xf32>
    %259 = arith.addf %258, %226 : vector<8x16xf32>
    %cst_232 = arith.constant dense<0xFF800000> : vector<8xf32>
    %260 = vector.multi_reduction <maximumf>, %259, %cst_232 [1] : vector<8x16xf32> to vector<8xf32>
    %261 = vector.shape_cast %260 : vector<8xf32> to vector<8x1xf32>
    %262 = vector.broadcast %261 : vector<8x1xf32> to vector<8x16xf32>
    %263 = arith.subf %259, %262 : vector<8x16xf32>
    %264 = math.exp %263 : vector<8x16xf32>
    %cst_233 = arith.constant dense<0.000000e+00> : vector<8xf32>
    %265 = vector.multi_reduction <add>, %264, %cst_233 [1] : vector<8x16xf32> to vector<8xf32>
    %266 = vector.shape_cast %265 : vector<8xf32> to vector<8x1xf32>
    %267 = arith.truncf %264 : vector<8x16xf32> to vector<8x16xbf16>
    %cst_234 = arith.constant dense<0.000000e+00> : vector<8x16xf32>
    %268 = tpu.matmul %267, %257, %cst_234 {dimension_numbers = #tpu.dot_dimension_numbers<[1], [0], [0], [1], [0, 0, 1, 1], [], []>} : vector<8x16xbf16>, vector<16x16xbf16>, vector<8x16xf32> -> vector<8x16xf32>
    %269 = tpu.reciprocal %266 {approx = true} : vector<8x1xf32> -> vector<8x1xf32>
    %270 = vector.broadcast %269 : vector<8x1xf32> to vector<8x16xf32>
    %271 = arith.mulf %268, %270 : vector<8x16xf32>
    %c0_235 = arith.constant 0 : index
    %c16_236 = arith.constant 16 : index
    %272 = vector.load %arg28[%c0_235, %c16_236] : memref<16x64xf32, #tpu.memory_space<vmem>>, vector<8x16xf32>
    tpu.vector_store %arg28[%c0_235, %c16_236], %271 {strides = array<i32>} : memref<16x64xf32, #tpu.memory_space<vmem>>, vector<8x16xf32>,
    %c0_237 = arith.constant 0 : index
    %c32 = arith.constant 32 : index
    %273 = vector.load %arg25[%c0_237, %c32] : memref<16x64xf32, #tpu.memory_space<vmem>>, vector<8x16xf32>
    %274 = arith.truncf %273 : vector<8x16xf32> to vector<8x16xbf16>
    %c0_238 = arith.constant 0 : index
    %c0_239 = arith.constant 0 : index
    %c0_240 = arith.constant 0 : index
    %c32_241 = arith.constant 32 : index
    %275 = vector.load %arg22[%c0_238, %c0_239, %c0_240, %c32_241] : memref<1x2x16x64xf32, #tpu.memory_space<vmem>>, vector<1x1x16x16xf32>
    %276 = vector.shape_cast %275 : vector<1x1x16x16xf32> to vector<16x16xf32>
    %277 = arith.truncf %276 : vector<16x16xf32> to vector<16x16xbf16>
    %c0_242 = arith.constant 0 : index
    %c0_243 = arith.constant 0 : index
    %c0_244 = arith.constant 0 : index
    %c32_245 = arith.constant 32 : index
    %278 = vector.load %arg23[%c0_242, %c0_243, %c0_244, %c32_245] : memref<1x2x16x64xf32, #tpu.memory_space<vmem>>, vector<1x1x16x16xf32>
    %279 = vector.shape_cast %278 : vector<1x1x16x16xf32> to vector<16x16xf32>
    %280 = arith.truncf %279 : vector<16x16xf32> to vector<16x16xbf16>
    %cst_246 = arith.constant dense<0.000000e+00> : vector<8x16xf32>
    %281 = tpu.matmul %274, %277, %cst_246 {dimension_numbers = #tpu.dot_dimension_numbers<[1], [1], [0], [0], [0, 0, 1, 0], [], []>} : vector<8x16xbf16>, vector<16x16xbf16>, vector<8x16xf32> -> vector<8x16xf32>
    %282 = arith.addf %281, %226 : vector<8x16xf32>
    %cst_247 = arith.constant dense<0xFF800000> : vector<8xf32>
    %283 = vector.multi_reduction <maximumf>, %282, %cst_247 [1] : vector<8x16xf32> to vector<8xf32>
    %284 = vector.shape_cast %283 : vector<8xf32> to vector<8x1xf32>
    %285 = vector.broadcast %284 : vector<8x1xf32> to vector<8x16xf32>
    %286 = arith.subf %282, %285 : vector<8x16xf32>
    %287 = math.exp %286 : vector<8x16xf32>
    %cst_248 = arith.constant dense<0.000000e+00> : vector<8xf32>
    %288 = vector.multi_reduction <add>, %287, %cst_248 [1] : vector<8x16xf32> to vector<8xf32>
    %289 = vector.shape_cast %288 : vector<8xf32> to vector<8x1xf32>
    %290 = arith.truncf %287 : vector<8x16xf32> to vector<8x16xbf16>
    %cst_249 = arith.constant dense<0.000000e+00> : vector<8x16xf32>
    %291 = tpu.matmul %290, %280, %cst_249 {dimension_numbers = #tpu.dot_dimension_numbers<[1], [0], [0], [1], [0, 0, 1, 1], [], []>} : vector<8x16xbf16>, vector<16x16xbf16>, vector<8x16xf32> -> vector<8x16xf32>
    %292 = tpu.reciprocal %289 {approx = true} : vector<8x1xf32> -> vector<8x1xf32>
    %293 = vector.broadcast %292 : vector<8x1xf32> to vector<8x16xf32>
    %294 = arith.mulf %291, %293 : vector<8x16xf32>
    %c0_250 = arith.constant 0 : index
    %c32_251 = arith.constant 32 : index
    %295 = vector.load %arg28[%c0_250, %c32_251] : memref<16x64xf32, #tpu.memory_space<vmem>>, vector<8x16xf32>
    tpu.vector_store %arg28[%c0_250, %c32_251], %294 {strides = array<i32>} : memref<16x64xf32, #tpu.memory_space<vmem>>, vector<8x16xf32>,
    %c0_252 = arith.constant 0 : index
    %c48 = arith.constant 48 : index
    %296 = vector.load %arg25[%c0_252, %c48] : memref<16x64xf32, #tpu.memory_space<vmem>>, vector<8x16xf32>
    %297 = arith.truncf %296 : vector<8x16xf32> to vector<8x16xbf16>
    %c0_253 = arith.constant 0 : index
    %c0_254 = arith.constant 0 : index
    %c0_255 = arith.constant 0 : index
    %c48_256 = arith.constant 48 : index
    %298 = vector.load %arg22[%c0_253, %c0_254, %c0_255, %c48_256] : memref<1x2x16x64xf32, #tpu.memory_space<vmem>>, vector<1x1x16x16xf32>
    %299 = vector.shape_cast %298 : vector<1x1x16x16xf32> to vector<16x16xf32>
    %300 = arith.truncf %299 : vector<16x16xf32> to vector<16x16xbf16>
    %c0_257 = arith.constant 0 : index
    %c0_258 = arith.constant 0 : index
    %c0_259 = arith.constant 0 : index
    %c48_260 = arith.constant 48 : index
    %301 = vector.load %arg23[%c0_257, %c0_258, %c0_259, %c48_260] : memref<1x2x16x64xf32, #tpu.memory_space<vmem>>, vector<1x1x16x16xf32>
    %302 = vector.shape_cast %301 : vector<1x1x16x16xf32> to vector<16x16xf32>
    %303 = arith.truncf %302 : vector<16x16xf32> to vector<16x16xbf16>
    %cst_261 = arith.constant dense<0.000000e+00> : vector<8x16xf32>
    %304 = tpu.matmul %297, %300, %cst_261 {dimension_numbers = #tpu.dot_dimension_numbers<[1], [1], [0], [0], [0, 0, 1, 0], [], []>} : vector<8x16xbf16>, vector<16x16xbf16>, vector<8x16xf32> -> vector<8x16xf32>
    %305 = arith.addf %304, %226 : vector<8x16xf32>
    %cst_262 = arith.constant dense<0xFF800000> : vector<8xf32>
    %306 = vector.multi_reduction <maximumf>, %305, %cst_262 [1] : vector<8x16xf32> to vector<8xf32>
    %307 = vector.shape_cast %306 : vector<8xf32> to vector<8x1xf32>
    %308 = vector.broadcast %307 : vector<8x1xf32> to vector<8x16xf32>
    %309 = arith.subf %305, %308 : vector<8x16xf32>
    %310 = math.exp %309 : vector<8x16xf32>
    %cst_263 = arith.constant dense<0.000000e+00> : vector<8xf32>
    %311 = vector.multi_reduction <add>, %310, %cst_263 [1] : vector<8x16xf32> to vector<8xf32>
    %312 = vector.shape_cast %311 : vector<8xf32> to vector<8x1xf32>
    %313 = arith.truncf %310 : vector<8x16xf32> to vector<8x16xbf16>
    %cst_264 = arith.constant dense<0.000000e+00> : vector<8x16xf32>
    %314 = tpu.matmul %313, %303, %cst_264 {dimension_numbers = #tpu.dot_dimension_numbers<[1], [0], [0], [1], [0, 0, 1, 1], [], []>} : vector<8x16xbf16>, vector<16x16xbf16>, vector<8x16xf32> -> vector<8x16xf32>
    %315 = tpu.reciprocal %312 {approx = true} : vector<8x1xf32> -> vector<8x1xf32>
    %316 = vector.broadcast %315 : vector<8x1xf32> to vector<8x16xf32>
    %317 = arith.mulf %314, %316 : vector<8x16xf32>
    %c0_265 = arith.constant 0 : index
    %c48_266 = arith.constant 48 : index
    %318 = vector.load %arg28[%c0_265, %c48_266] : memref<16x64xf32, #tpu.memory_space<vmem>>, vector<8x16xf32>
    tpu.vector_store %arg28[%c0_265, %c48_266], %317 {strides = array<i32>} : memref<16x64xf32, #tpu.memory_space<vmem>>, vector<8x16xf32>,
    %c8_267 = arith.constant 8 : index
    %c0_268 = arith.constant 0 : index
    %319 = vector.load %arg25[%c8_267, %c0_268] : memref<16x64xf32, #tpu.memory_space<vmem>>, vector<8x16xf32>
    %320 = arith.truncf %319 : vector<8x16xf32> to vector<8x16xbf16>
    %c0_269 = arith.constant 0 : index
    %c1_270 = arith.constant 1 : index
    %c0_271 = arith.constant 0 : index
    %c0_272 = arith.constant 0 : index
    %321 = vector.load %arg22[%c0_269, %c1_270, %c0_271, %c0_272] : memref<1x2x16x64xf32, #tpu.memory_space<vmem>>, vector<1x1x16x16xf32>
    %322 = vector.shape_cast %321 : vector<1x1x16x16xf32> to vector<16x16xf32>
    %323 = arith.truncf %322 : vector<16x16xf32> to vector<16x16xbf16>
    %c0_273 = arith.constant 0 : index
    %c1_274 = arith.constant 1 : index
    %c0_275 = arith.constant 0 : index
    %c0_276 = arith.constant 0 : index
    %324 = vector.load %arg23[%c0_273, %c1_274, %c0_275, %c0_276] : memref<1x2x16x64xf32, #tpu.memory_space<vmem>>, vector<1x1x16x16xf32>
    %325 = vector.shape_cast %324 : vector<1x1x16x16xf32> to vector<16x16xf32>
    %326 = arith.truncf %325 : vector<16x16xf32> to vector<16x16xbf16>
    %cst_277 = arith.constant dense<0.000000e+00> : vector<8x16xf32>
    %327 = tpu.matmul %320, %323, %cst_277 {dimension_numbers = #tpu.dot_dimension_numbers<[1], [1], [0], [0], [0, 0, 1, 0], [], []>} : vector<8x16xbf16>, vector<16x16xbf16>, vector<8x16xf32> -> vector<8x16xf32>
    %328 = arith.addf %327, %226 : vector<8x16xf32>
    %cst_278 = arith.constant dense<0xFF800000> : vector<8xf32>
    %329 = vector.multi_reduction <maximumf>, %328, %cst_278 [1] : vector<8x16xf32> to vector<8xf32>
    %330 = vector.shape_cast %329 : vector<8xf32> to vector<8x1xf32>
    %331 = vector.broadcast %330 : vector<8x1xf32> to vector<8x16xf32>
    %332 = arith.subf %328, %331 : vector<8x16xf32>
    %333 = math.exp %332 : vector<8x16xf32>
    %cst_279 = arith.constant dense<0.000000e+00> : vector<8xf32>
    %334 = vector.multi_reduction <add>, %333, %cst_279 [1] : vector<8x16xf32> to vector<8xf32>
    %335 = vector.shape_cast %334 : vector<8xf32> to vector<8x1xf32>
    %336 = arith.truncf %333 : vector<8x16xf32> to vector<8x16xbf16>
    %cst_280 = arith.constant dense<0.000000e+00> : vector<8x16xf32>
    %337 = tpu.matmul %336, %326, %cst_280 {dimension_numbers = #tpu.dot_dimension_numbers<[1], [0], [0], [1], [0, 0, 1, 1], [], []>} : vector<8x16xbf16>, vector<16x16xbf16>, vector<8x16xf32> -> vector<8x16xf32>
    %338 = tpu.reciprocal %335 {approx = true} : vector<8x1xf32> -> vector<8x1xf32>
    %339 = vector.broadcast %338 : vector<8x1xf32> to vector<8x16xf32>
    %340 = arith.mulf %337, %339 : vector<8x16xf32>
    %c8_281 = arith.constant 8 : index
    %c0_282 = arith.constant 0 : index
    %341 = vector.load %arg28[%c8_281, %c0_282] : memref<16x64xf32, #tpu.memory_space<vmem>>, vector<8x16xf32>
    tpu.vector_store %arg28[%c8_281, %c0_282], %340 {strides = array<i32>} : memref<16x64xf32, #tpu.memory_space<vmem>>, vector<8x16xf32>,
    %c8_283 = arith.constant 8 : index
    %c16_284 = arith.constant 16 : index
    %342 = vector.load %arg25[%c8_283, %c16_284] : memref<16x64xf32, #tpu.memory_space<vmem>>, vector<8x16xf32>
    %343 = arith.truncf %342 : vector<8x16xf32> to vector<8x16xbf16>
    %c0_285 = arith.constant 0 : index
    %c1_286 = arith.constant 1 : index
    %c0_287 = arith.constant 0 : index
    %c16_288 = arith.constant 16 : index
    %344 = vector.load %arg22[%c0_285, %c1_286, %c0_287, %c16_288] : memref<1x2x16x64xf32, #tpu.memory_space<vmem>>, vector<1x1x16x16xf32>
    %345 = vector.shape_cast %344 : vector<1x1x16x16xf32> to vector<16x16xf32>
    %346 = arith.truncf %345 : vector<16x16xf32> to vector<16x16xbf16>
    %c0_289 = arith.constant 0 : index
    %c1_290 = arith.constant 1 : index
    %c0_291 = arith.constant 0 : index
    %c16_292 = arith.constant 16 : index
    %347 = vector.load %arg23[%c0_289, %c1_290, %c0_291, %c16_292] : memref<1x2x16x64xf32, #tpu.memory_space<vmem>>, vector<1x1x16x16xf32>
    %348 = vector.shape_cast %347 : vector<1x1x16x16xf32> to vector<16x16xf32>
    %349 = arith.truncf %348 : vector<16x16xf32> to vector<16x16xbf16>
    %cst_293 = arith.constant dense<0.000000e+00> : vector<8x16xf32>
    %350 = tpu.matmul %343, %346, %cst_293 {dimension_numbers = #tpu.dot_dimension_numbers<[1], [1], [0], [0], [0, 0, 1, 0], [], []>} : vector<8x16xbf16>, vector<16x16xbf16>, vector<8x16xf32> -> vector<8x16xf32>
    %351 = arith.addf %350, %226 : vector<8x16xf32>
    %cst_294 = arith.constant dense<0xFF800000> : vector<8xf32>
    %352 = vector.multi_reduction <maximumf>, %351, %cst_294 [1] : vector<8x16xf32> to vector<8xf32>
    %353 = vector.shape_cast %352 : vector<8xf32> to vector<8x1xf32>
    %354 = vector.broadcast %353 : vector<8x1xf32> to vector<8x16xf32>
    %355 = arith.subf %351, %354 : vector<8x16xf32>
    %356 = math.exp %355 : vector<8x16xf32>
    %cst_295 = arith.constant dense<0.000000e+00> : vector<8xf32>
    %357 = vector.multi_reduction <add>, %356, %cst_295 [1] : vector<8x16xf32> to vector<8xf32>
    %358 = vector.shape_cast %357 : vector<8xf32> to vector<8x1xf32>
    %359 = arith.truncf %356 : vector<8x16xf32> to vector<8x16xbf16>
    %cst_296 = arith.constant dense<0.000000e+00> : vector<8x16xf32>
    %360 = tpu.matmul %359, %349, %cst_296 {dimension_numbers = #tpu.dot_dimension_numbers<[1], [0], [0], [1], [0, 0, 1, 1], [], []>} : vector<8x16xbf16>, vector<16x16xbf16>, vector<8x16xf32> -> vector<8x16xf32>
    %361 = tpu.reciprocal %358 {approx = true} : vector<8x1xf32> -> vector<8x1xf32>
    %362 = vector.broadcast %361 : vector<8x1xf32> to vector<8x16xf32>
    %363 = arith.mulf %360, %362 : vector<8x16xf32>
    %c8_297 = arith.constant 8 : index
    %c16_298 = arith.constant 16 : index
    %364 = vector.load %arg28[%c8_297, %c16_298] : memref<16x64xf32, #tpu.memory_space<vmem>>, vector<8x16xf32>
    tpu.vector_store %arg28[%c8_297, %c16_298], %363 {strides = array<i32>} : memref<16x64xf32, #tpu.memory_space<vmem>>, vector<8x16xf32>,
    %c8_299 = arith.constant 8 : index
    %c32_300 = arith.constant 32 : index
    %365 = vector.load %arg25[%c8_299, %c32_300] : memref<16x64xf32, #tpu.memory_space<vmem>>, vector<8x16xf32>
    %366 = arith.truncf %365 : vector<8x16xf32> to vector<8x16xbf16>
    %c0_301 = arith.constant 0 : index
    %c1_302 = arith.constant 1 : index
    %c0_303 = arith.constant 0 : index
    %c32_304 = arith.constant 32 : index
    %367 = vector.load %arg22[%c0_301, %c1_302, %c0_303, %c32_304] : memref<1x2x16x64xf32, #tpu.memory_space<vmem>>, vector<1x1x16x16xf32>
    %368 = vector.shape_cast %367 : vector<1x1x16x16xf32> to vector<16x16xf32>
    %369 = arith.truncf %368 : vector<16x16xf32> to vector<16x16xbf16>
    %c0_305 = arith.constant 0 : index
    %c1_306 = arith.constant 1 : index
    %c0_307 = arith.constant 0 : index
    %c32_308 = arith.constant 32 : index
    %370 = vector.load %arg23[%c0_305, %c1_306, %c0_307, %c32_308] : memref<1x2x16x64xf32, #tpu.memory_space<vmem>>, vector<1x1x16x16xf32>
    %371 = vector.shape_cast %370 : vector<1x1x16x16xf32> to vector<16x16xf32>
    %372 = arith.truncf %371 : vector<16x16xf32> to vector<16x16xbf16>
    %cst_309 = arith.constant dense<0.000000e+00> : vector<8x16xf32>
    %373 = tpu.matmul %366, %369, %cst_309 {dimension_numbers = #tpu.dot_dimension_numbers<[1], [1], [0], [0], [0, 0, 1, 0], [], []>} : vector<8x16xbf16>, vector<16x16xbf16>, vector<8x16xf32> -> vector<8x16xf32>
    %374 = arith.addf %373, %226 : vector<8x16xf32>
    %cst_310 = arith.constant dense<0xFF800000> : vector<8xf32>
    %375 = vector.multi_reduction <maximumf>, %374, %cst_310 [1] : vector<8x16xf32> to vector<8xf32>
    %376 = vector.shape_cast %375 : vector<8xf32> to vector<8x1xf32>
    %377 = vector.broadcast %376 : vector<8x1xf32> to vector<8x16xf32>
    %378 = arith.subf %374, %377 : vector<8x16xf32>
    %379 = math.exp %378 : vector<8x16xf32>
    %cst_311 = arith.constant dense<0.000000e+00> : vector<8xf32>
    %380 = vector.multi_reduction <add>, %379, %cst_311 [1] : vector<8x16xf32> to vector<8xf32>
    %381 = vector.shape_cast %380 : vector<8xf32> to vector<8x1xf32>
    %382 = arith.truncf %379 : vector<8x16xf32> to vector<8x16xbf16>
    %cst_312 = arith.constant dense<0.000000e+00> : vector<8x16xf32>
    %383 = tpu.matmul %382, %372, %cst_312 {dimension_numbers = #tpu.dot_dimension_numbers<[1], [0], [0], [1], [0, 0, 1, 1], [], []>} : vector<8x16xbf16>, vector<16x16xbf16>, vector<8x16xf32> -> vector<8x16xf32>
    %384 = tpu.reciprocal %381 {approx = true} : vector<8x1xf32> -> vector<8x1xf32>
    %385 = vector.broadcast %384 : vector<8x1xf32> to vector<8x16xf32>
    %386 = arith.mulf %383, %385 : vector<8x16xf32>
    %c8_313 = arith.constant 8 : index
    %c32_314 = arith.constant 32 : index
    %387 = vector.load %arg28[%c8_313, %c32_314] : memref<16x64xf32, #tpu.memory_space<vmem>>, vector<8x16xf32>
    tpu.vector_store %arg28[%c8_313, %c32_314], %386 {strides = array<i32>} : memref<16x64xf32, #tpu.memory_space<vmem>>, vector<8x16xf32>,
    %c8_315 = arith.constant 8 : index
    %c48_316 = arith.constant 48 : index
    %388 = vector.load %arg25[%c8_315, %c48_316] : memref<16x64xf32, #tpu.memory_space<vmem>>, vector<8x16xf32>
    %389 = arith.truncf %388 : vector<8x16xf32> to vector<8x16xbf16>
    %c0_317 = arith.constant 0 : index
    %c1_318 = arith.constant 1 : index
    %c0_319 = arith.constant 0 : index
    %c48_320 = arith.constant 48 : index
    %390 = vector.load %arg22[%c0_317, %c1_318, %c0_319, %c48_320] : memref<1x2x16x64xf32, #tpu.memory_space<vmem>>, vector<1x1x16x16xf32>
    %391 = vector.shape_cast %390 : vector<1x1x16x16xf32> to vector<16x16xf32>
    %392 = arith.truncf %391 : vector<16x16xf32> to vector<16x16xbf16>
    %c0_321 = arith.constant 0 : index
    %c1_322 = arith.constant 1 : index
    %c0_323 = arith.constant 0 : index
    %c48_324 = arith.constant 48 : index
    %393 = vector.load %arg23[%c0_321, %c1_322, %c0_323, %c48_324] : memref<1x2x16x64xf32, #tpu.memory_space<vmem>>, vector<1x1x16x16xf32>
    %394 = vector.shape_cast %393 : vector<1x1x16x16xf32> to vector<16x16xf32>
    %395 = arith.truncf %394 : vector<16x16xf32> to vector<16x16xbf16>
    %cst_325 = arith.constant dense<0.000000e+00> : vector<8x16xf32>
    %396 = tpu.matmul %389, %392, %cst_325 {dimension_numbers = #tpu.dot_dimension_numbers<[1], [1], [0], [0], [0, 0, 1, 0], [], []>} : vector<8x16xbf16>, vector<16x16xbf16>, vector<8x16xf32> -> vector<8x16xf32>
    %397 = arith.addf %396, %226 : vector<8x16xf32>
    %cst_326 = arith.constant dense<0xFF800000> : vector<8xf32>
    %398 = vector.multi_reduction <maximumf>, %397, %cst_326 [1] : vector<8x16xf32> to vector<8xf32>
    %399 = vector.shape_cast %398 : vector<8xf32> to vector<8x1xf32>
    %400 = vector.broadcast %399 : vector<8x1xf32> to vector<8x16xf32>
    %401 = arith.subf %397, %400 : vector<8x16xf32>
    %402 = math.exp %401 : vector<8x16xf32>
    %cst_327 = arith.constant dense<0.000000e+00> : vector<8xf32>
    %403 = vector.multi_reduction <add>, %402, %cst_327 [1] : vector<8x16xf32> to vector<8xf32>
    %404 = vector.shape_cast %403 : vector<8xf32> to vector<8x1xf32>
    %405 = arith.truncf %402 : vector<8x16xf32> to vector<8x16xbf16>
    %cst_328 = arith.constant dense<0.000000e+00> : vector<8x16xf32>
    %406 = tpu.matmul %405, %395, %cst_328 {dimension_numbers = #tpu.dot_dimension_numbers<[1], [0], [0], [1], [0, 0, 1, 1], [], []>} : vector<8x16xbf16>, vector<16x16xbf16>, vector<8x16xf32> -> vector<8x16xf32>
    %407 = tpu.reciprocal %404 {approx = true} : vector<8x1xf32> -> vector<8x1xf32>
    %408 = vector.broadcast %407 : vector<8x1xf32> to vector<8x16xf32>
    %409 = arith.mulf %406, %408 : vector<8x16xf32>
    %c8_329 = arith.constant 8 : index
    %c48_330 = arith.constant 48 : index
    %410 = vector.load %arg28[%c8_329, %c48_330] : memref<16x64xf32, #tpu.memory_space<vmem>>, vector<8x16xf32>
    tpu.vector_store %arg28[%c8_329, %c48_330], %409 {strides = array<i32>} : memref<16x64xf32, #tpu.memory_space<vmem>>, vector<8x16xf32>,
    %c0_331 = arith.constant 0 : index
    %c0_332 = arith.constant 0 : index
    %411 = vector.load %arg28[%c0_331, %c0_332] : memref<16x64xf32, #tpu.memory_space<vmem>>, vector<16x64xf32>
    %412 = arith.truncf %411 : vector<16x64xf32> to vector<16x64xbf16>
    %c0_333 = arith.constant 0 : index
    %c0_334 = arith.constant 0 : index
    %c0_335 = arith.constant 0 : index
    %413 = vector.load %arg14[%c0_333, %c0_334, %c0_335] : memref<1x64x64xbf16, #tpu.memory_space<vmem>>, vector<1x64x64xbf16>
    %414 = vector.shape_cast %413 : vector<1x64x64xbf16> to vector<64x64xbf16>
    %cst_336 = arith.constant dense<0.000000e+00> : vector<16x64xf32>
    %415 = tpu.matmul %412, %414, %cst_336 {dimension_numbers = #tpu.dot_dimension_numbers<[1], [0], [0], [1], [0, 0, 1, 1], [], []>} : vector<16x64xbf16>, vector<64x64xbf16>, vector<16x64xf32> -> vector<16x64xf32>
    %416 = arith.addf %3, %415 : vector<16x64xf32>
    %c0_337 = arith.constant 0 : index
    %c0_338 = arith.constant 0 : index
    %c0_339 = arith.constant 0 : index
    %417 = vector.load %arg15[%c0_337, %c0_338, %c0_339] : memref<1x1x64xf32, #tpu.memory_space<vmem>>, vector<1x1x64xf32>
    %418 = vector.shape_cast %417 : vector<1x1x64xf32> to vector<1x64xf32>
    %419 = arith.mulf %416, %416 : vector<16x64xf32>
    %cst_340 = arith.constant dense<0.000000e+00> : vector<16xf32>
    %420 = vector.multi_reduction <add>, %419, %cst_340 [1] : vector<16x64xf32> to vector<16xf32>
    %421 = vector.shape_cast %420 : vector<16xf32> to vector<16x1xf32>
    %cst_341 = arith.constant 6.400000e+01 : f32
    %422 = vector.broadcast %cst_341 : f32 to vector<16x1xf32>
    %423 = arith.divf %421, %422 : vector<16x1xf32>
    %cst_342 = arith.constant 9.99999997E-7 : f32
    %424 = vector.broadcast %cst_342 : f32 to vector<16x1xf32>
    %425 = arith.addf %423, %424 : vector<16x1xf32>
    %426 = math.rsqrt %425 : vector<16x1xf32>
    %427 = vector.broadcast %426 : vector<16x1xf32> to vector<16x64xf32>
    %428 = arith.mulf %416, %427 : vector<16x64xf32>
    %cst_343 = arith.constant 1.000000e+00 : f32
    %429 = vector.broadcast %cst_343 : f32 to vector<1x64xf32>
    %430 = arith.addf %429, %418 : vector<1x64xf32>
    %431 = vector.broadcast %430 : vector<1x64xf32> to vector<16x64xf32>
    %432 = arith.mulf %428, %431 : vector<16x64xf32>
    %433 = arith.truncf %432 : vector<16x64xf32> to vector<16x64xbf16>
    %c0_344 = arith.constant 0 : index
    %c0_345 = arith.constant 0 : index
    %c0_346 = arith.constant 0 : index
    %434 = vector.load %arg16[%c0_344, %c0_345, %c0_346] : memref<1x64x128xbf16, #tpu.memory_space<vmem>>, vector<1x64x128xbf16>
    %435 = vector.shape_cast %434 : vector<1x64x128xbf16> to vector<64x128xbf16>
    %cst_347 = arith.constant dense<0.000000e+00> : vector<16x128xf32>
    %436 = tpu.matmul %433, %435, %cst_347 {dimension_numbers = #tpu.dot_dimension_numbers<[1], [0], [0], [1], [0, 0, 1, 1], [], []>} : vector<16x64xbf16>, vector<64x128xbf16>, vector<16x128xf32> -> vector<16x128xf32>
    %c0_348 = arith.constant 0 : index
    %c0_349 = arith.constant 0 : index
    %c0_350 = arith.constant 0 : index
    %437 = vector.load %arg17[%c0_348, %c0_349, %c0_350] : memref<1x64x128xbf16, #tpu.memory_space<vmem>>, vector<1x64x128xbf16>
    %438 = vector.shape_cast %437 : vector<1x64x128xbf16> to vector<64x128xbf16>
    %cst_351 = arith.constant dense<0.000000e+00> : vector<16x128xf32>
    %439 = tpu.matmul %433, %438, %cst_351 {dimension_numbers = #tpu.dot_dimension_numbers<[1], [0], [0], [1], [0, 0, 1, 1], [], []>} : vector<16x64xbf16>, vector<64x128xbf16>, vector<16x128xf32> -> vector<16x128xf32>
    %cst_352 = arith.constant 5.000000e-01 : f32
    %440 = vector.broadcast %cst_352 : f32 to vector<16x128xf32>
    %441 = arith.mulf %440, %436 : vector<16x128xf32>
    %cst_353 = arith.constant 4.471500e-02 : f32
    %442 = vector.broadcast %cst_353 : f32 to vector<16x128xf32>
    %443 = arith.mulf %442, %436 : vector<16x128xf32>
    %444 = arith.mulf %443, %436 : vector<16x128xf32>
    %445 = arith.mulf %444, %436 : vector<16x128xf32>
    %446 = arith.addf %436, %445 : vector<16x128xf32>
    %cst_354 = arith.constant 0.797884583 : f32
    %447 = vector.broadcast %cst_354 : f32 to vector<16x128xf32>
    %448 = arith.mulf %447, %446 : vector<16x128xf32>
    %449 = math.tanh %448 : vector<16x128xf32>
    %cst_355 = arith.constant 1.000000e+00 : f32
    %450 = vector.broadcast %cst_355 : f32 to vector<16x128xf32>
    %451 = arith.addf %450, %449 : vector<16x128xf32>
    %452 = arith.mulf %441, %451 : vector<16x128xf32>
    %453 = arith.mulf %452, %439 : vector<16x128xf32>
    %454 = arith.truncf %453 : vector<16x128xf32> to vector<16x128xbf16>
    %c0_356 = arith.constant 0 : index
    %c0_357 = arith.constant 0 : index
    %c0_358 = arith.constant 0 : index
    %455 = vector.load %arg18[%c0_356, %c0_357, %c0_358] : memref<1x128x64xbf16, #tpu.memory_space<vmem>>, vector<1x128x64xbf16>
    %456 = vector.shape_cast %455 : vector<1x128x64xbf16> to vector<128x64xbf16>
    %cst_359 = arith.constant dense<0.000000e+00> : vector<16x64xf32>
    %457 = tpu.matmul %454, %456, %cst_359 {dimension_numbers = #tpu.dot_dimension_numbers<[1], [0], [0], [1], [0, 0, 1, 1], [], []>} : vector<16x128xbf16>, vector<128x64xbf16>, vector<16x64xf32> -> vector<16x64xf32>
    %458 = arith.addf %416, %457 : vector<16x64xf32>
    %c0_360 = arith.constant 0 : index
    %c0_361 = arith.constant 0 : index
    %459 = vector.load %arg24[%c0_360, %c0_361] : memref<16x64xf32, #tpu.memory_space<vmem>>, vector<16x64xf32>
    tpu.vector_store %arg24[%c0_360, %c0_361], %458 {strides = array<i32>} : memref<16x64xf32, #tpu.memory_space<vmem>>, vector<16x64xf32>,
    %c1_i32 = arith.constant 1 : i32
    %460 = arith.cmpi eq, %arg0, %c1_i32 : i32
    %461 = arith.extui %460 : i1 to i32
    %c0_i32_362 = arith.constant 0 : i32
    %462 = arith.cmpi ne, %461, %c0_i32_362 : i32
    scf.if %462 {
      %c0_363 = arith.constant 0 : index
      %463 = memref.load %arg4[%c0_363] : memref<1xi32, #tpu.memory_space<smem>>
      %c0_i32_364 = arith.constant 0 : i32
      %464 = arith.addi %c0_i32_364, %463 : i32
      %465 = arith.index_cast %464 : i32 to index
      %c0_365 = arith.constant 0 : index
      %466 = vector.load %arg24[%465, %c0_365] : memref<16x64xf32, #tpu.memory_space<vmem>>, vector<1x64xf32>
      %c8_i32 = arith.constant 8 : i32
      %467 = arith.addi %c8_i32, %463 : i32
      %468 = arith.index_cast %467 : i32 to index
      %c0_366 = arith.constant 0 : index
      %469 = vector.load %arg24[%468, %c0_366] : memref<16x64xf32, #tpu.memory_space<vmem>>, vector<1x64xf32>
      %470 = tpu.concatenate %466, %469 in 0 : vector<1x64xf32>, vector<1x64xf32> -> vector<2x64xf32>
      %c0_367 = arith.constant 0 : index
      %c0_368 = arith.constant 0 : index
      %471 = vector.load %arg19[%c0_367, %c0_368] : memref<1x64xf32, #tpu.memory_space<vmem>>, vector<1x64xf32>
      %472 = arith.mulf %470, %470 : vector<2x64xf32>
      %cst_369 = arith.constant dense<0.000000e+00> : vector<2xf32>
      %473 = vector.multi_reduction <add>, %472, %cst_369 [1] : vector<2x64xf32> to vector<2xf32>
      %474 = vector.shape_cast %473 : vector<2xf32> to vector<2x1xf32>
      %cst_370 = arith.constant 6.400000e+01 : f32
      %475 = vector.broadcast %cst_370 : f32 to vector<2x1xf32>
      %476 = arith.divf %474, %475 : vector<2x1xf32>
      %cst_371 = arith.constant 9.99999997E-7 : f32
      %477 = vector.broadcast %cst_371 : f32 to vector<2x1xf32>
      %478 = arith.addf %476, %477 : vector<2x1xf32>
      %479 = math.rsqrt %478 : vector<2x1xf32>
      %480 = vector.broadcast %479 : vector<2x1xf32> to vector<2x64xf32>
      %481 = arith.mulf %470, %480 : vector<2x64xf32>
      %cst_372 = arith.constant 1.000000e+00 : f32
      %482 = vector.broadcast %cst_372 : f32 to vector<1x64xf32>
      %483 = arith.addf %482, %471 : vector<1x64xf32>
      %484 = vector.broadcast %483 : vector<1x64xf32> to vector<2x64xf32>
      %485 = arith.mulf %481, %484 : vector<2x64xf32>
      %486 = arith.truncf %485 : vector<2x64xf32> to vector<2x64xbf16>
      %c0_373 = arith.constant 0 : index
      %c0_374 = arith.constant 0 : index
      %487 = vector.load %arg20[%c0_373, %c0_374] : memref<64x256xbf16, #tpu.memory_space<vmem>>, vector<64x256xbf16>
      %cst_375 = arith.constant dense<0.000000e+00> : vector<2x256xf32>
      %488 = tpu.matmul %486, %487, %cst_375 {dimension_numbers = #tpu.dot_dimension_numbers<[1], [0], [0], [1], [0, 0, 1, 1], [], []>} : vector<2x64xbf16>, vector<64x256xbf16>, vector<2x256xf32> -> vector<2x256xf32>
      %c0_376 = arith.constant 0 : index
      %c0_377 = arith.constant 0 : index
      %489 = vector.load %arg21[%c0_376, %c0_377] : memref<2x256xf32, #tpu.memory_space<vmem>>, vector<2x256xf32>
      tpu.vector_store %arg21[%c0_376, %c0_377], %488 {strides = array<i32>} : memref<2x256xf32, #tpu.memory_space<vmem>>, vector<2x256xf32>,
    } else {
    }
    return
  }
  func.func @transform_0(%arg0: i32) -> (i32, i32, i32, i32) {
    %c0_i32 = arith.constant 0 : i32
    %c0_i32_0 = arith.constant 0 : i32
    %c0_i32_1 = arith.constant 0 : i32
    %c0_i32_2 = arith.constant 0 : i32
    return %arg0, %c0_i32, %c0_i32_0, %c0_i32_1 : i32, i32, i32, i32
  }
  func.func @transform_1(%arg0: i32) -> (i32, i32, i32, i32) {
    %c0_i32 = arith.constant 0 : i32
    %c0_i32_0 = arith.constant 0 : i32
    %c0_i32_1 = arith.constant 0 : i32
    %c0_i32_2 = arith.constant 0 : i32
    return %arg0, %c0_i32, %c0_i32_0, %c0_i32_1 : i32, i32, i32, i32
  }
  func.func @transform_2(%arg0: i32) -> i32 {
    %c0_i32 = arith.constant 0 : i32
    %c0_i32_0 = arith.constant 0 : i32
    return %c0_i32 : i32
  }
  func.func @transform_3(%arg0: i32) -> i32 {
    %c0_i32 = arith.constant 0 : i32
    %c0_i32_0 = arith.constant 0 : i32
    return %c0_i32 : i32
  }
  func.func @transform_4(%arg0: i32) -> (i32, i32) {
    %c0_i32 = arith.constant 0 : i32
    %c0_i32_0 = arith.constant 0 : i32
    %c0_i32_1 = arith.constant 0 : i32
    return %c0_i32, %c0_i32_0 : i32, i32
  }
  func.func @transform_5(%arg0: i32) -> (i32, i32) {
    %c0_i32 = arith.constant 0 : i32
    %c0_i32_0 = arith.constant 0 : i32
    %c0_i32_1 = arith.constant 0 : i32
    return %c0_i32, %c0_i32_0 : i32, i32
  }
  func.func @transform_6(%arg0: i32) -> (i32, i32) {
    %c0_i32 = arith.constant 0 : i32
    %c0_i32_0 = arith.constant 0 : i32
    %c0_i32_1 = arith.constant 0 : i32
    return %c0_i32, %c0_i32_0 : i32, i32
  }
  func.func @transform_7(%arg0: i32) -> (i32, i32) {
    %c0_i32 = arith.constant 0 : i32
    %c0_i32_0 = arith.constant 0 : i32
    %c0_i32_1 = arith.constant 0 : i32
    return %c0_i32, %c0_i32_0 : i32, i32
  }
  func.func @transform_8(%arg0: i32) -> (i32, i32) {
    %c0_i32 = arith.constant 0 : i32
    %c0_i32_0 = arith.constant 0 : i32
    %c0_i32_1 = arith.constant 0 : i32
    return %c0_i32, %c0_i32_0 : i32, i32
  }
  func.func @transform_9(%arg0: i32) -> (i32, i32, i32) {
    %c0_i32 = arith.constant 0 : i32
    %c0_i32_0 = arith.constant 0 : i32
    %c0_i32_1 = arith.constant 0 : i32
    return %arg0, %c0_i32, %c0_i32_0 : i32, i32, i32
  }
  func.func @transform_10(%arg0: i32) -> (i32, i32, i32) {
    %c0_i32 = arith.constant 0 : i32
    %c0_i32_0 = arith.constant 0 : i32
    %c0_i32_1 = arith.constant 0 : i32
    return %arg0, %c0_i32, %c0_i32_0 : i32, i32, i32
  }
  func.func @transform_11(%arg0: i32) -> (i32, i32, i32) {
    %c0_i32 = arith.constant 0 : i32
    %c0_i32_0 = arith.constant 0 : i32
    %c0_i32_1 = arith.constant 0 : i32
    return %arg0, %c0_i32, %c0_i32_0 : i32, i32, i32
  }
  func.func @transform_12(%arg0: i32) -> (i32, i32, i32) {
    %c0_i32 = arith.constant 0 : i32
    %c0_i32_0 = arith.constant 0 : i32
    %c0_i32_1 = arith.constant 0 : i32
    return %arg0, %c0_i32, %c0_i32_0 : i32, i32, i32
  }
  func.func @transform_13(%arg0: i32) -> (i32, i32, i32) {
    %c0_i32 = arith.constant 0 : i32
    %c0_i32_0 = arith.constant 0 : i32
    %c0_i32_1 = arith.constant 0 : i32
    return %arg0, %c0_i32, %c0_i32_0 : i32, i32, i32
  }
  func.func @transform_14(%arg0: i32) -> (i32, i32, i32) {
    %c0_i32 = arith.constant 0 : i32
    %c0_i32_0 = arith.constant 0 : i32
    %c0_i32_1 = arith.constant 0 : i32
    return %arg0, %c0_i32, %c0_i32_0 : i32, i32, i32
  }
  func.func @transform_15(%arg0: i32) -> (i32, i32, i32) {
    %c0_i32 = arith.constant 0 : i32
    %c0_i32_0 = arith.constant 0 : i32
    %c0_i32_1 = arith.constant 0 : i32
    return %arg0, %c0_i32, %c0_i32_0 : i32, i32, i32
  }
  func.func @transform_16(%arg0: i32) -> (i32, i32, i32) {
    %c0_i32 = arith.constant 0 : i32
    %c0_i32_0 = arith.constant 0 : i32
    %c0_i32_1 = arith.constant 0 : i32
    return %arg0, %c0_i32, %c0_i32_0 : i32, i32, i32
  }
  func.func @transform_17(%arg0: i32) -> (i32, i32, i32) {
    %c0_i32 = arith.constant 0 : i32
    %c0_i32_0 = arith.constant 0 : i32
    %c0_i32_1 = arith.constant 0 : i32
    return %arg0, %c0_i32, %c0_i32_0 : i32, i32, i32
  }
  func.func @transform_18(%arg0: i32) -> (i32, i32) {
    %c0_i32 = arith.constant 0 : i32
    %c0_i32_0 = arith.constant 0 : i32
    %c0_i32_1 = arith.constant 0 : i32
    return %c0_i32, %c0_i32_0 : i32, i32
  }
  func.func @transform_19(%arg0: i32) -> (i32, i32) {
    %c0_i32 = arith.constant 0 : i32
    %c0_i32_0 = arith.constant 0 : i32
    %c0_i32_1 = arith.constant 0 : i32
    return %c0_i32, %c0_i32_0 : i32, i32
  }
  func.func @transform_20(%arg0: i32) -> (i32, i32) {
    %c0_i32 = arith.constant 0 : i32
    %c0_i32_0 = arith.constant 0 : i32
    %c0_i32_1 = arith.constant 0 : i32
    return %c0_i32, %c0_i32_0 : i32, i32
  }
  func.func @transform_21(%arg0: i32) -> (i32, i32, i32, i32) {
    %c0_i32 = arith.constant 0 : i32
    %c0_i32_0 = arith.constant 0 : i32
    %c0_i32_1 = arith.constant 0 : i32
    %c0_i32_2 = arith.constant 0 : i32
    return %arg0, %c0_i32, %c0_i32_0, %c0_i32_1 : i32, i32, i32, i32
  }
  func.func @transform_22(%arg0: i32) -> (i32, i32, i32, i32) {
    %c0_i32 = arith.constant 0 : i32
    %c0_i32_0 = arith.constant 0 : i32
    %c0_i32_1 = arith.constant 0 : i32
    %c0_i32_2 = arith.constant 0 : i32
    return %arg0, %c0_i32, %c0_i32_0, %c0_i32_1 : i32, i32, i32, i32
  }
}

</mosaic_0001>

<bundles_post_ra>
// kernel: neg.1
= control target key start
LH: loop header
LB: loop body
LE: loop exit
PB: predicated region body
PF: predicated region fallthrough
CT: control target
= control target key end

     0   :  { %s24_s0 = inlined_call_operand.vmem [shape: f32[8,8], index: 0, kind: input, shape index: {}]   ;;  %s25_s1 = inlined_call_operand.vmem [shape: f32[8,8], index: 1, kind: output, shape index: {}]  }
   0x1   :  { %v2_v0 = vld [vmem:[%s24_s0] sm:$0xff] }
   0x2   :  { %v5_v1 = vxor.u32 2147483648, %v2_v0 }
   0x4   :  { %7 = vst [vmem:[%s25_s1] sm:$0xff] %v5_v1 }

// kernel: gemma_forward.1
= control target key start
LH: loop header
LB: loop body
LE: loop exit
PB: predicated region body
PF: predicated region fallthrough
CT: control target
= control target key end

     0   :  { %s3612_s0 = inlined_call_operand.vmem [shape: f32[2,2,16,64], index: 0, kind: input, shape index: {}, may-alias: {0,21}]   ;;  %s3613_s1 = inlined_call_operand.vmem [shape: f32[2,2,16,64], index: 1, kind: input, shape index: {}, may-alias: {1,22}]   ;;  %s3614_s2 = inlined_call_operand.vmem [shape: s32[8], index: 2, kind: input, shape index: {}]   ;;  %s3615_s3 = inlined_call_operand.<no memory space> [shape: s32[1], index: 3, kind: input, shape index: {}]   ;;  %s3616_s4 = inlined_call_operand.vmem [shape: f32[8,16], index: 4, kind: input, shape index: {}]   ;;  %s3617_s5 = inlined_call_operand.vmem [shape: f32[16,64], index: 5, kind: input, shape index: {}]   ;;  %s3618_s6 = inlined_call_operand.vmem [shape: f32[16,64], index: 6, kind: input, shape index: {}]   ;;  %s3619_s7 = inlined_call_operand.vmem [shape: f32[16,64], index: 7, kind: input, shape index: {}]   ;;  %s3620_s8 = inlined_call_operand.vmem [shape: bf16[64,64], index: 8, kind: input, shape index: {}]   ;;  %s3621_s9 = inlined_call_operand.vmem [shape: f32[2,1,64], index: 9, kind: input, shape index: {}]   ;;  %s3622_s10 = inlined_call_operand.vmem [shape: bf16[2,64,64], index: 10, kind: input, shape index: {}]   ;;  %s3623_s11 = inlined_call_operand.vmem [shape: bf16[2,64,64], index: 11, kind: input, shape index: {}]   ;;  %s3624_s12 = inlined_call_operand.vmem [shape: bf16[2,64,64], index: 12, kind: input, shape index: {}]   ;;  %s3625_s13 = inlined_call_operand.vmem [shape: bf16[2,64,64], index: 13, kind: input, shape index: {}]   ;;  %s3626_s14 = inlined_call_operand.vmem [shape: f32[2,1,64], index: 14, kind: input, shape index: {}]   ;;  %s3627_s15 = inlined_call_operand.vmem [shape: bf16[2,64,128], index: 15, kind: input, shape index: {}]   ;;  %s3628_s16 = inlined_call_operand.vmem [shape: bf16[2,64,128], index: 16, kind: input, shape index: {}]   ;;  %s3629_s17 = inlined_call_operand.vmem [shape: bf16[2,128,64], index: 17, kind: input, shape index: {}]   ;;  %s3630_s18 = inlined_call_operand.vmem [shape: f32[1,64], index: 18, kind: input, shape index: {}]   ;;  %s3631_s19 = inlined_call_operand.vmem [shape: bf16[64,256], index: 19, kind: input, shape index: {}]   ;;  %s3632_s20 = inlined_call_operand.vmem [shape: f32[2,256], index: 20, kind: output, shape index: {0}]   ;;  %s3633_s21 = inlined_call_operand.vmem [shape: f32[2,2,16,64], index: 21, kind: output, shape index: {1}, may-alias: {0,21}]   ;;  %s3634_s22 = inlined_call_operand.vmem [shape: f32[2,2,16,64], index: 22, kind: output, shape index: {2}, may-alias: {1,22}]  }
   0x1   :  { %3641 = sst [smem:[#allocation13_spill]] %s3612_s0 }
   0x2   :  { %3642 = sst [smem:[#allocation14_spill]] %s3613_s1 }
   0x3   :  { %3643 = sst [smem:[#allocation15_spill]] %s3614_s2 }
   0x4   :  { %3644 = sst [smem:[#allocation16_spill]] %s3615_s3 }
   0x5   :  { %3645 = sst [smem:[#allocation17_spill]] %s3616_s4 }
   0x6   :  { %3646 = sst [smem:[#allocation18_spill]] %s3617_s5 }
   0x7   :  { %3647 = sst [smem:[#allocation19_spill]] %s3618_s6 }
   0x8   :  { %3648 = sst [smem:[#allocation20_spill]] %s3619_s7 }
   0x9   :  { %3649 = sst [smem:[#allocation21_spill]] %s3620_s8 }
   0xa   :  { %3650 = sst [smem:[#allocation22_spill]] %s3621_s9 }
   0xb   :  { %3651 = sst [smem:[#allocation23_spill]] %s3622_s10 }
   0xc   :  { %3652 = sst [smem:[#allocation24_spill]] %s3623_s11 }
   0xd   :  { %3653 = sst [smem:[#allocation25_spill]] %s3624_s12 }
   0xe   :  { %3654 = sst [smem:[#allocation26_spill]] %s3625_s13 }
   0xf   :  { %3655 = sst [smem:[#allocation27_spill]] %s3630_s18 }
  0x10   :  { %3656 = sst [smem:[#allocation28_spill]] %s3631_s19 }
  0x11   :  { %3657 = sst [smem:[#allocation29_spill]] %s3632_s20 }
  0x12   :  { %s3658_s29 = sld [smem:[#allocation16_spill]] }
  0x18   :  { %28 = sst [smem:[#allocation7]] %s3658_s29 }
  0x19   :  { %29 = vsyncpa [#allocation9], 0  ;;  %s3108_s30 = smov 0  }
  0x1a LB: > { %3659 = sst [smem:[#allocation11_spill]] %s2980_s30  ;;  %s3114_s4 = sadd.s32 4294967295, %s2980_s30   ;;  %s2980_s30 = sphi %s3108_s30, %s35_s30  }
  0x1b   : > { %p2551_p0 = scmp.ge.s32.totalorder %s2980_s30, 1  ;;  %p588_p1 = scmp.lt.s32.totalorder %s2980_s30, 3 }
  0x1c   : > { %p2552_p2 = scmp.ne.s32.totalorder %s3114_s4, 0  ;;  %s3660_s1 = sld [smem:[#allocation15_spill]] }
  0x1d   : > { %p589_p3 = pnand %p2551_p0, %p588_p1  ;;  %p2887_p4 = scmp.eq.s32.totalorder %s3114_s4, 0 }
  0x1e   : > { %s2982_s24 = smov [#allocation8]  }
  0x1f   : > { %p2883_p5 = pneg %p589_p3  ;;  %721 = sbr.rel (%p589_p3) target bundleno = 2143 (0x85f), region = 100 }
  0x21   : > { %p2884_p6 = pnand %p2887_p4, %p2883_p5 }
  0x22   : > { %s600_s5 = sshll.u32 %s3660_s1, 4  ;;  %s601_s5 = int_to_ptr.vmem [resolvable:$true] %s600_s5 }
  0x23   : > { %2886 = dma.vmem_to_smem (!%p2884_p6), %s601_s5, 16, %s2982_s24, [#allocation9]  }
  0x24   : > { %2975 = dma.done.wait (%p2887_p4), [#allocation9], 16  }
  0x25   : > { %2977 = vsyncadd (%p2887_p4), [#allocation9], 4294967280 }
  0x26   : > { %728 = sfence }
  0x27   : > { %p836_p7 = scmp.lt.s32.totalorder %s3114_s4, 1  ;;  %s3662_s29 = sld [smem:[#allocation13_spill]] }
  0x28   : > { %s3664_s5 = sld [smem:[#allocation14_spill]] }
  0x29   : > { %s3125_s6 = scalar_select %p836_p7, %s3114_s4, 1 }
  0x2a   : > { %s3665_s10 = sld [smem:[#allocation23_spill]] }
  0x2b   : > { %s2824_s25 = sshll.u32 %s3125_s6, 5  ;;  %s3666_s11 = sld [smem:[#allocation24_spill]] }
  0x2c   : > { %s3667_s12 = sld [smem:[#allocation25_spill]]  ;;  %s3169_s7 = scalar_lea.vmem %s3627_s15, %s2824_s25 }
  0x2d   : > { %s3135_s0 = scalar_lea.vmem %s3662_s29, %s2824_s25  ;;  %s3668_s13 = sld [smem:[#allocation26_spill]] }
  0x2e   : > { %3663 = sst [smem:[#allocation12_spill]] %s3135_s0  ;;  %s3140_s24 = scalar_lea.vmem %s3664_s5, %s2824_s25 }
  0x2f   : > { %s3174_s27 = scalar_lea.vmem %s3628_s16, %s2824_s25  ;;  %s2832_s2 = sshll.u32 %s3125_s6, 6 }
  0x30   : > { %s3145_s18 = scalar_lea.vmem %s3665_s10, %s2824_s25  ;;  %s3180_s28 = scalar_lea.vmem %s3629_s17, %s2832_s2 }
  0x31   : > { %s3150_s26 = scalar_lea.vmem %s3666_s11, %s2824_s25  ;;  %s3185_s1 = scalar_lea.vmem %s3633_s21, %s2824_s25 }
  0x32   : > { %s3155_s3 = scalar_lea.vmem %s3667_s12, %s2824_s25  ;;  %s3190_s30 = scalar_lea.vmem %s3634_s22, %s2824_s25 }
  0x33   : > { %s3160_s23 = scalar_lea.vmem %s3668_s13, %s2824_s25  ;;  %901 = sbr.rel (%p2552_p2) target bundleno = 61 (0x3d), region = 108 }
  0x34   : > { %s3669_s20 = sld [smem:[#allocation18_spill]] (!%p2552_p2) }
  0x38   : > { %vm904_vm0 = vcmask 523264  }
  0x3a   : > { %v902_v0 = vld [vmem:[%s3669_s20] sm:$0xff]  ;;  %v903_v1 = vld [vmem:[%s3669_s20 + $0x8] sm:$0xff] }
  0x3b   : > { %905 = vst.msk [vmem:[#allocation2] sm:$0xff] %vm904_vm0, %v902_v0 }
  0x3c   : > { %906 = vst.msk [vmem:[#allocation2 + $0x8] sm:$0xff] %vm904_vm0, %v903_v1 }
  0x3d PF: > { %vm912_vm1 = vcmask 523264   ;;  %v2983_v8 = vmov 64.0   ;;  %v2838_v12 = vld [vmem:[%s3145_s18 + $0x18] sm:$0xff]  ;;  %v2837_v15 = vld [vmem:[%s3145_s18 + $0x10] sm:$0xff]  ;;  %v2836_v18 = vld [vmem:[%s3145_s18 + $0x8] sm:$0xff]  ;;  %s3670_s8 = sld [smem:[#allocation21_spill]] }
  0x3e   : > { %2905 = vrcp.f32 %v2983_v8  ;;  %v2846_v13 = vld [vmem:[%s3155_s3 + $0x18] sm:$0xff]  ;;  %998 = vmatpush.bf16.msra.mxu1 %v2838_v12  ;;  %v2845_v16 = vld [vmem:[%s3155_s3 + $0x10] sm:$0xff]  ;;  %v2844_v19 = vld [vmem:[%s3155_s3 + $0x8] sm:$0xff]  ;;  %s3671_s9 = sld [smem:[#allocation22_spill]]  ;;  %vm1211_vm9 = vcmask 516096   ;;  %vm1330_vm10 = vcmask 130048  }
  0x3f   : > { %1090 = vmatpush.bf16.msra.mxu2 %v2846_v13  ;;  %v2835_v21 = vld [vmem:[%s3145_s18] sm:$0xff]  ;;  %v2842_v26 = vld [vmem:[%s3150_s26 + $0x18] sm:$0xff]  ;;  %v2841_v27 = vld [vmem:[%s3150_s26 + $0x10] sm:$0xff]  ;;  %s3262_s12 = sld [smem:[#allocation8]]  ;;  %vm1448_vm11 = vcmask 261248   ;;  %vm1519_vm12 = vcmask 392448  }
  0x40   : > { %v2843_v22 = vld [vmem:[%s3155_s3] sm:$0xff]  ;;  %v2840_v30 = vld [vmem:[%s3150_s26 + $0x8] sm:$0xff]  ;;  %v1202_v61 = vld [vmem:[%s3140_s24 + $0x10] sm:$0xff]  ;;  %s3272_s0 = sld [smem:[#allocation8 + $0x1]]  ;;  %vm1590_vm13 = vcmask 523648   ;;  %p2786_p8 = scmp.ne.s32.totalorder %s3114_s4, 1 }
  0x41   : > { %v2839_v35 = vld [vmem:[%s3150_s26] sm:$0xff]  ;;  %v1201_v60 = vld [vmem:[%s3140_s24 + $0x8] sm:$0xff]  ;;  %v1203_v62 = vld [vmem:[%s3140_s24 + $0x18] sm:$0xff]  ;;  %s3278_s13 = sld [smem:[#allocation8 + $0x2]] }
  0x42   : > { %v3200_v2 = vld [vmem:[#allocation2] sm:$0xff]  ;;  %999 = vmatpush.bf16.msra.mxu1 %v2837_v15  ;;  %s3280_s18 = sld [smem:[#allocation8 + $0x3]] }
  0x43   : > { %v910_v3 = vmul.f32 %v3200_v2, %v3200_v2  ;;  %v3204_v4 = vld [vmem:[#allocation2 + $0x8] sm:$0xff]  ;;  %1091 = vmatpush.bf16.msra.mxu2 %v2845_v16  ;;  %v2850_v40 = vld [vmem:[%s3670_s8 + $0x18] sm:$0xff]  ;;  %v2849_v56 = vld [vmem:[%s3670_s8 + $0x10] sm:$0xff]  ;;  %s3282_s25 = sld [smem:[#allocation8 + $0x4]] }
  0x44   : > { %v911_v6 = vmul.f32 %v3204_v4, %v3204_v4  ;;  %v2906_v9 = vpop.eup %2905  ;;  %s3672_s2 = scalar_lea.vmem %s3671_s9, %s3125_s6  ;;  %1146 = vmatpush.bf16.msra.mxu3 %v2850_v40  ;;  %1170 = vmatpush.bf16.msra.mxu0 %v2850_v40  ;;  %v2848_v57 = vld [vmem:[%s3670_s8 + $0x8] sm:$0xff]  ;;  %v2847_v58 = vld [vmem:[%s3670_s8] sm:$0xff]  ;;  %s3295_s29 = sld [smem:[#allocation8 + $0x6]] }
  0x45   : > { %v913_v5 = vsel %vm912_vm1, %v910_v3, 0.0  ;;  %v920_v10 = vmul.f32 64.0, %v2906_v9  ;;  %vm924_vm2 = vweird.f32 %v2906_v9  ;;  %v909_v43 = vld [vmem:[%s3672_s2] sm:$0x1]  ;;  %s3286_s2 = sld [smem:[#allocation8 + $0x5]]  ;;  %s2985_s8 = smov 80  }
  0x46   : > { %914 = vadd.xlane.f32.xlu0 %v913_v5  ;;  %v916_v7 = vsel %vm912_vm1, %v911_v6, 0.0  ;;  %1000 = vmatpush.bf16.msra.mxu1 %v2836_v18  ;;  %v952_v45 = vadd.f32 1.0, %v909_v43  ;;  %v1200_v59 = vld [vmem:[%s3140_s24] sm:$0xff]  ;;  %s1214_s24 = scalar_lea.vmem %s3190_s30, %s3262_s12  ;;  %s1228_s3 = scalar_lea.vmem %s3190_s30, %s3272_s0 }
  0x47   : > { %v921_v11 = vsub.f32 1.0, %v920_v10  ;;  %1092 = vmatpush.bf16.msra.mxu2 %v2844_v19  ;;  %1204 = vst.msk [vmem:[%s3190_s30] sm:$0xff] %vm912_vm1, %v1200_v59  ;;  %s1242_s26 = scalar_lea.vmem %s3190_s30, %s3278_s13  ;;  %s3302_s10 = sld [smem:[#allocation8 + $0x7]] }
  0x48   : > { %v954_v50 = vperm.slane %v952_v45, 0  ;;  %1147 = vmatpush.bf16.msra.mxu3 %v2849_v56  ;;  %1171 = vmatpush.bf16.msra.mxu0 %v2849_v56  ;;  %1205 = vst.msk [vmem:[%s3190_s30 + $0x8] sm:$0xff] %vm912_vm1, %v1201_v60  ;;  %s1256_s5 = scalar_lea.vmem %s3190_s30, %s3280_s18  ;;  %s3675_s9 = sld [smem:[#allocation20_spill]] }
  0x49   : > { %v922_v14 = vmul.f32 %v2906_v9, %v921_v11  ;;  %1206 = vst.msk [vmem:[%s3190_s30 + $0x10] sm:$0xff] %vm912_vm1, %v1202_v61  ;;  %s1270_s11 = scalar_lea.vmem %s3190_s30, %s3282_s25 }
  0x4a   : > { %1001 = vmatpush.bf16.msra.mxu1 %v2835_v21  ;;  %1207 = vst.msk [vmem:[%s3190_s30 + $0x18] sm:$0xff] %vm912_vm1, %v1203_v62 }
  0x4b   : > { %v923_v17 = vadd.f32 %v2906_v9, %v922_v14  ;;  %1093 = vmatpush.bf16.msra.mxu2 %v2843_v22  ;;  %s1284_s19 = scalar_lea.vmem %s3190_s30, %s3286_s2 }
  0x4c   : > { %1148 = vmatpush.bf16.msra.mxu3 %v2848_v57  ;;  %1172 = vmatpush.bf16.msra.mxu0 %v2848_v57 }
  0x4d   : > { %v3216_v20 = vsel %vm924_vm2, %v2906_v9, %v923_v17 }
  0x4e   : > { %917 = vadd.xlane.f32.xlu0 %v916_v7  ;;  %1044 = vmatpush.bf16.msrb.mxu1 %v2842_v26 }
  0x50   : > { %1149 = vmatpush.bf16.msra.mxu3 %v2847_v58  ;;  %1173 = vmatpush.bf16.msra.mxu0 %v2847_v58 }
  0x52   : > { %1045 = vmatpush.bf16.msrb.mxu1 %v2841_v27 }
  0x56   : > { %1046 = vmatpush.bf16.msrb.mxu1 %v2840_v30 }
  0x5a   : > { %1047 = vmatpush.bf16.msrb.mxu1 %v2839_v35 }
  0xb9   : > { %v915_v23 = vpop.xlane.xlu0 %914 }
  0xba   : > { %v926_v24 = vmul.f32 %v3216_v20, %v915_v23 }
  0xbc   : > { %v928_v25 = vadd.f32 1e-06, %v926_v24 }
  0xbe   : > { %2907 = vrsqrt.f32 %v928_v25  ;;  %vm936_vm4 = vweird.f32 %v928_v25 }
  0xc1   : > { %v918_v28 = vpop.xlane.xlu0 %917 }
  0xc2   : > { %v927_v29 = vmul.f32 %v3216_v20, %v918_v28  ;;  %v1110_v28 = vld [vmem:[%s3675_s9] sm:$0xff] }
  0xc4   : > { %v2908_v31 = vpop.eup %2907  ;;  %v929_v32 = vadd.f32 1e-06, %v927_v29 }
  0xc5   : > { %v931_v33 = vmul.f32 %v2908_v31, %v928_v25  ;;  %vm937_vm3 = vweird.f32 %v2908_v31 }
  0xc6   : > { %2909 = vrsqrt.f32 %v929_v32  ;;  %vm938_vm5 = vmor %vm936_vm4, %vm937_vm3  ;;  %vm946_vm7 = vweird.f32 %v929_v32 }
  0xc7   : > { %v932_v34 = vmul.f32 %v2908_v31, %v931_v33 }
  0xc9   : > { %v933_v36 = vmul.f32 0.5, %v932_v34 }
  0xcb   : > { %v934_v37 = vsub.f32 1.5, %v933_v36 }
  0xcc   : > { %v2910_v38 = vpop.eup %2909 }
  0xcd   : > { %v941_v39 = vmul.f32 %v2910_v38, %v929_v32  ;;  %v935_v41 = vmul.f32 %v2908_v31, %v934_v37  ;;  %vm947_vm6 = vweird.f32 %v2910_v38 }
  0xce   : > { %vm948_vm8 = vmor %vm946_vm7, %vm947_vm6 }
  0xcf   : > { %v942_v42 = vmul.f32 %v2910_v38, %v941_v39  ;;  %v939_v46 = vsel %vm938_vm5, %v2908_v31, %v935_v41  ;;  %v1111_v39 = vld [vmem:[%s3675_s9 + $0x8] sm:$0xff] }
  0xd0   : > { %v950_v49 = vmul.f32 %v939_v46, %v3200_v2 }
  0xd1   : > { %v943_v44 = vmul.f32 0.5, %v942_v42 }
  0xd2   : > { %v956_v53 = vmul.f32 %v954_v50, %v950_v49 }
  0xd3   : > { %v944_v47 = vsub.f32 1.5, %v943_v44 }
  0xd5   : > { %v945_v48 = vmul.f32 %v2910_v38, %v944_v47 }
  0xd7   : > { %v949_v51 = vsel %vm948_vm8, %v2910_v38, %v945_v48 }
  0xd8   : > { %v951_v52 = vmul.f32 %v949_v51, %v3204_v4 }
  0xda   : > { %v957_v54 = vmul.f32 %v954_v50, %v951_v52 }
  0xdc   : > { %v958_v55 = vpack.c.bf16 %v957_v54, %v956_v53 }
  0xde   : > { %2595 = vmatmul.msk.bf16.vlgmr.msra.gmra.mxu1 %vm912_vm1, %v958_v55  ;;  %2629 = vmatmul.msk.bf16.vlgmr.msra.gmra.mxu2 %vm912_vm1, %v958_v55 }
  0xee   : > { %2612 = vmatmul.msk.bf16.vlgmr.msrb.gmra.mxu1 %vm912_vm1, %v958_v55 }
 0x15b   : > { %v3260_v63 = vpop.f32.mrf.mxu1 }
 0x161   : > { %v1095_v0 = vpop.f32.mrf.mxu2 }
 0x162   : > { %1190 = vst.msk [vmem:[#allocation5] sm:$0xff] %vm912_vm1, %v1095_v0 }
 0x163   : > { %v3265_v1 = vpop.f32.mrf.mxu1 }
 0x164   : > { %v1114_v2 = vpack.c.bf16 %v3265_v1, %v3260_v63 }
 0x166   : > { %2646 = vmatmul.msk.bf16.vlgmr.msra.gmra.mxu3 %vm912_vm1, %v1114_v2 }
 0x169   : > { %v1213_v3 = vld [vmem:[#allocation5] sm:$0x1]  ;;  %v1097_v4 = vpop.f32.mrf.mxu2  ;;  %v1227_v9 = vld [vmem:[#allocation5 + $0x1] sm:$0x1]  ;;  %v1241_v11 = vld [vmem:[#allocation5 + $0x2] sm:$0x1] }
 0x16a   : > { %1191 = vst.msk [vmem:[#allocation5 + $0x8] sm:$0xff] %vm912_vm1, %v1097_v4  ;;  %v1255_v13 = vld [vmem:[#allocation5 + $0x3] sm:$0x1]  ;;  %v1269_v15 = vld [vmem:[#allocation5 + $0x4] sm:$0x1] }
 0x16b   : > { %v3275_v5 = vpop.f32.mrf.mxu1  ;;  %1215 = vst.msk [vmem:[%s1214_s24] sm:$0x1] %vm1211_vm9, %v1213_v3  ;;  %v1283_v17 = vld [vmem:[#allocation5 + $0x5] sm:$0x1]  ;;  %v1297_v19 = vld [vmem:[#allocation5 + $0x6] sm:$0x1] }
 0x16c   : > { %v1311_v22 = vld [vmem:[#allocation5 + $0x7] sm:$0x1] }
 0x171   : > { %v1220_v6 = vld [vmem:[#allocation5 + $0x8] sm:$0x1]  ;;  %v1234_v7 = vld [vmem:[#allocation5 + $0x9] sm:$0x1]  ;;  %v1248_v12 = vld [vmem:[#allocation5 + $0xa] sm:$0x1] }
 0x172   : > { %2649 = vst.msk [vmem:[%s1214_s24 + $0x10] sm:$0x1] %vm1211_vm9, %v1220_v6  ;;  %v1262_v14 = vld [vmem:[#allocation5 + $0xb] sm:$0x1]  ;;  %v1276_v16 = vld [vmem:[#allocation5 + $0xc] sm:$0x1]  ;;  %s1298_s24 = scalar_lea.vmem %s3190_s30, %s3295_s29 }
 0x173   : > { %v3288_v8 = vpop.f32.mrf.mxu1  ;;  %1229 = vst.msk [vmem:[%s1228_s3] sm:$0x1] %vm1211_vm9, %v1227_v9  ;;  %v1290_v18 = vld [vmem:[#allocation5 + $0xd] sm:$0x1]  ;;  %v1304_v21 = vld [vmem:[#allocation5 + $0xe] sm:$0x1] }
 0x174   : > { %v1162_v10 = vpack.c.bf16 %v3288_v8, %v3275_v5  ;;  %2652 = vst.msk [vmem:[%s1228_s3 + $0x10] sm:$0x1] %vm1211_vm9, %v1234_v7  ;;  %s3673_s3 = sld [smem:[#allocation12_spill]]  ;;  %v1318_v23 = vld [vmem:[#allocation5 + $0xf] sm:$0x1] }
 0x175   : > { %1243 = vst.msk [vmem:[%s1242_s26] sm:$0x1] %vm1211_vm9, %v1241_v11 }
 0x176   : > { %2647 = vmatmul.msk.bf16.vlgmr.msra.gmra.mxu0 %vm912_vm1, %v1162_v10  ;;  %2655 = vst.msk [vmem:[%s1242_s26 + $0x10] sm:$0x1] %vm1211_vm9, %v1248_v12  ;;  %s1312_s26 = scalar_lea.vmem %s3190_s30, %s3302_s10 }
 0x177   : > { %1257 = vst.msk [vmem:[%s1256_s5] sm:$0x1] %vm1211_vm9, %v1255_v13 }
 0x178   : > { %2658 = vst.msk [vmem:[%s1256_s5 + $0x10] sm:$0x1] %vm1211_vm9, %v1262_v14  ;;  %s1239_s5 = scalar_lea.vmem %s3185_s1, %s3278_s13  ;;  %s1281_s13 = scalar_lea.vmem %s3185_s1, %s3286_s2 }
 0x179   : > { %1271 = vst.msk [vmem:[%s1270_s11] sm:$0x1] %vm1211_vm9, %v1269_v15  ;;  %s2986_s2 = smov 112  }
 0x17a   : > { %2661 = vst.msk [vmem:[%s1270_s11 + $0x10] sm:$0x1] %vm1211_vm9, %v1276_v16  ;;  %v1192_v29 = vld [vmem:[%s3673_s3] sm:$0xff]  ;;  %v1193_v30 = vld [vmem:[%s3673_s3 + $0x8] sm:$0xff]  ;;  %v1194_v31 = vld [vmem:[%s3673_s3 + $0x10] sm:$0xff]  ;;  %s2984_s11 = smov 96  }
 0x17b   : > { %1285 = vst.msk [vmem:[%s1284_s19] sm:$0x1] %vm1211_vm9, %v1283_v17  ;;  %v1195_v32 = vld [vmem:[%s3673_s3 + $0x18] sm:$0xff]  ;;  %s2988_s3 = smov 16  }
 0x17c   : > { %2664 = vst.msk [vmem:[%s1284_s19 + $0x10] sm:$0x1] %vm1211_vm9, %v1290_v18  ;;  %s3674_s19 = sld [smem:[#allocation19_spill]] }
 0x17d   : > { %1299 = vst.msk [vmem:[%s1298_s24] sm:$0x1] %vm1211_vm9, %v1297_v19 }
 0x17e   : > { %2667 = vst.msk [vmem:[%s1298_s24 + $0x10] sm:$0x1] %vm1211_vm9, %v1304_v21  ;;  %s1210_s24 = scalar_lea.vmem %s3185_s1, %s3262_s12  ;;  %s1253_s12 = scalar_lea.vmem %s3185_s1, %s3280_s18 }
 0x17f   : > { %1313 = vst.msk [vmem:[%s1312_s26] sm:$0x1] %vm1211_vm9, %v1311_v22  ;;  %s1295_s18 = scalar_lea.vmem %s3185_s1, %s3295_s29 }
 0x180   : > { %2670 = vst.msk [vmem:[%s1312_s26 + $0x10] sm:$0x1] %vm1211_vm9, %v1318_v23  ;;  %s1225_s26 = scalar_lea.vmem %s3185_s1, %s3272_s0  ;;  %s1267_s0 = scalar_lea.vmem %s3185_s1, %s3282_s25 }
 0x181   : > { %1196 = vst.msk [vmem:[%s3185_s1] sm:$0xff] %vm912_vm1, %v1192_v29  ;;  %s1309_s25 = scalar_lea.vmem %s3185_s1, %s3302_s10  ;;  %s3676_s10 = sld [smem:[#allocation17_spill]] }
 0x182   : > { %v1108_v27 = vld [vmem:[%s3674_s19] sm:$0xff]  ;;  %1197 = vst.msk [vmem:[%s3185_s1 + $0x8] sm:$0xff] %vm912_vm1, %v1193_v30  ;;  %v1109_v38 = vld [vmem:[%s3674_s19 + $0x8] sm:$0xff] }
 0x183   : > { %v1112_v34 = vmul.f32 %v1108_v27, %v3260_v63  ;;  %1198 = vst.msk [vmem:[%s3185_s1 + $0x10] sm:$0xff] %vm912_vm1, %v1194_v31  ;;  %v1113_v41 = vmul.f32 %v1109_v38, %v3265_v1  ;;  %v1160_v44 = vmul.f32 %v1108_v27, %v3275_v5  ;;  %v1161_v52 = vmul.f32 %v1109_v38, %v3288_v8 }
 0x184   : > { %1199 = vst.msk [vmem:[%s3185_s1 + $0x18] sm:$0xff] %vm912_vm1, %v1195_v32 }
 0x187   : > { %v1327_v24 = vld [vmem:[%s3190_s30] sm:$0xff]  ;;  %v1328_v25 = vld [vmem:[%s3190_s30 + $0x8] sm:$0xff] }
 0x188   : > { %v3326_v26 = vpack.c.bf16 %v1328_v25, %v1327_v24 }
 0x18a   : > { %1370 = vmatpush.bf16.msrb.mxu2 %v3326_v26 }
 0x1e9   : > { %v1151_v33 = vpop.f32.mrf.mxu3 }
 0x1ea   : > { %v1156_v35 = vmul.f32 %v1151_v33, %v1110_v28  ;;  %v1321_v33 = vld [vmem:[%s3676_s10] sm:$0xff] }
 0x1ec   : > { %v1158_v36 = vadd.f32 %v1156_v35, %v1112_v34 }
 0x1ee   : > { %v1184_v37 = vmul.f32 0.25, %v1158_v36 }
 0x1f0   : > { %1186 = vst.msk [vmem:[#allocation3] sm:$0xff] %vm912_vm1, %v1184_v37 }
 0x1f1   : > { %v1153_v40 = vpop.f32.mrf.mxu3 }
 0x1f2   : > { %v1157_v42 = vmul.f32 %v1153_v40, %v1111_v39 }
 0x1f3   : > { %v1175_v43 = vpop.f32.mrf.mxu0 }
 0x1f4   : > { %v1159_v45 = vadd.f32 %v1157_v42, %v1113_v41  ;;  %v1180_v46 = vmul.f32 %v1175_v43, %v1110_v28 }
 0x1f6   : > { %v1185_v47 = vmul.f32 0.25, %v1159_v45  ;;  %v1182_v48 = vadd.f32 %v1180_v46, %v1160_v44 }
 0x1f7   : > { %v1450_v49 = vld [vmem:[#allocation3] sm:$0xff] }
 0x1f8   : > { %1187 = vst.msk [vmem:[#allocation3 + $0x8] sm:$0xff] %vm912_vm1, %v1185_v47  ;;  %v3358_v50 = vpack.c.bf16 %v1450_v49, %v1450_v49 }
 0x1f9   : > { %1188 = vst.msk [vmem:[#allocation4] sm:$0xff] %vm912_vm1, %v1182_v48 }
 0x1fa   : > { %1459 = vrot.lane.b32.xlu0 %v3358_v50, %s2984_s11 }
 0x1fb   : > { %v1177_v51 = vpop.f32.mrf.mxu0 }
 0x1fc   : > { %v1181_v53 = vmul.f32 %v1177_v51, %v1111_v39 }
 0x1fe   : > { %v1183_v54 = vadd.f32 %v1181_v53, %v1161_v52 }
 0x1ff   : > { %v1790_v55 = vld [vmem:[#allocation3 + $0x8] sm:$0xff] }
 0x200   : > { %v1209_v56 = vld [vmem:[#allocation4] sm:$0x1]  ;;  %v3364_v57 = vpack.c.bf16 %v1790_v55, %v1790_v55  ;;  %1189 = vst.msk [vmem:[#allocation4 + $0x8] sm:$0xff] %vm912_vm1, %v1183_v54  ;;  %v1224_v60 = vld [vmem:[#allocation4 + $0x1] sm:$0x1] }
 0x201   : > { %1212 = vst.msk [vmem:[%s1210_s24] sm:$0x1] %vm1211_vm9, %v1209_v56  ;;  %v1238_v61 = vld [vmem:[#allocation4 + $0x2] sm:$0x1]  ;;  %v1252_v63 = vld [vmem:[#allocation4 + $0x3] sm:$0x1] }
 0x202   : > { %1799 = vrot.lane.b32.xlu0 %v3364_v57, %s2985_s8  ;;  %v1266_v1 = vld [vmem:[#allocation4 + $0x4] sm:$0x1]  ;;  %v1280_v3 = vld [vmem:[#allocation4 + $0x5] sm:$0x1]  ;;  %v1294_v5 = vld [vmem:[#allocation4 + $0x6] sm:$0x1] }
 0x203   : > { %v1308_v7 = vld [vmem:[#allocation4 + $0x7] sm:$0x1] }
 0x207   : > { %v1216_v58 = vld [vmem:[#allocation4 + $0x8] sm:$0x1]  ;;  %v1230_v59 = vld [vmem:[#allocation4 + $0x9] sm:$0x1]  ;;  %v1244_v62 = vld [vmem:[#allocation4 + $0xa] sm:$0x1] }
 0x208   : > { %2648 = vst.msk [vmem:[%s1210_s24 + $0x10] sm:$0x1] %vm1211_vm9, %v1216_v58  ;;  %v1258_v0 = vld [vmem:[#allocation4 + $0xb] sm:$0x1]  ;;  %v1272_v2 = vld [vmem:[#allocation4 + $0xc] sm:$0x1] }
 0x209   : > { %1226 = vst.msk [vmem:[%s1225_s26] sm:$0x1] %vm1211_vm9, %v1224_v60  ;;  %v1286_v4 = vld [vmem:[#allocation4 + $0xd] sm:$0x1]  ;;  %v1300_v6 = vld [vmem:[#allocation4 + $0xe] sm:$0x1] }
 0x20a   : > { %2651 = vst.msk [vmem:[%s1225_s26 + $0x10] sm:$0x1] %vm1211_vm9, %v1230_v59  ;;  %v1314_v8 = vld [vmem:[#allocation4 + $0xf] sm:$0x1]  ;;  %s3678_s26 = sld [smem:[#allocation28_spill]] (!%p2786_p8) }
 0x20b   : > { %1240 = vst.msk [vmem:[%s1239_s5] sm:$0x1] %vm1211_vm9, %v1238_v61 }
 0x20c   : > { %2654 = vst.msk [vmem:[%s1239_s5 + $0x10] sm:$0x1] %vm1211_vm9, %v1244_v62 }
 0x20d   : > { %1254 = vst.msk [vmem:[%s1253_s12] sm:$0x1] %vm1211_vm9, %v1252_v63 }
 0x20e   : > { %2657 = vst.msk [vmem:[%s1253_s12 + $0x10] sm:$0x1] %vm1211_vm9, %v1258_v0 }
 0x20f   : > { %1268 = vst.msk [vmem:[%s1267_s0] sm:$0x1] %vm1211_vm9, %v1266_v1 }
 0x210   : > { %2660 = vst.msk [vmem:[%s1267_s0 + $0x10] sm:$0x1] %vm1211_vm9, %v1272_v2 }
 0x211   : > { %1282 = vst.msk [vmem:[%s1281_s13] sm:$0x1] %vm1211_vm9, %v1280_v3 }
 0x212   : > { %2663 = vst.msk [vmem:[%s1281_s13 + $0x10] sm:$0x1] %vm1211_vm9, %v1286_v4 }
 0x213   : > { %1296 = vst.msk [vmem:[%s1295_s18] sm:$0x1] %vm1211_vm9, %v1294_v5  ;;  %v2687_v5 = vld [vmem:[%s3190_s30 + $0x10] sm:$0xff] }
 0x214   : > { %2666 = vst.msk [vmem:[%s1295_s18 + $0x10] sm:$0x1] %vm1211_vm9, %v1300_v6  ;;  %v2688_v6 = vld [vmem:[%s3190_s30 + $0x18] sm:$0xff]  ;;  %s2987_s30 = smov 32  }
 0x215   : > { %1310 = vst.msk [vmem:[%s1309_s25] sm:$0x1] %vm1211_vm9, %v1308_v7  ;;  %v1657_v7 = vpack.c.bf16 %v2688_v6, %v2687_v5 }
 0x216   : > { %2669 = vst.msk [vmem:[%s1309_s25 + $0x10] sm:$0x1] %vm1211_vm9, %v1314_v8 }
 0x21d   : > { %v1452_v9 = vld [vmem:[%s3185_s1] sm:$0xff]  ;;  %v1453_v10 = vld [vmem:[%s3185_s1 + $0x8] sm:$0xff]  ;;  %v2685_v13 = vld [vmem:[%s3185_s1 + $0x10] sm:$0xff] }
 0x21e   : > { %v1454_v11 = vpack.c.bf16 %v1453_v10, %v1452_v9  ;;  %v2686_v14 = vld [vmem:[%s3185_s1 + $0x18] sm:$0xff] }
 0x21f   : > { %v1654_v15 = vpack.c.bf16 %v2686_v14, %v2685_v13 }
 0x220   : > { %1462 = vrot.lane.b32.xlu2 %v1454_v11, %s2984_s11  ;;  %1391 = vrot.lane.b32.xlu1 %v1454_v11, %s2986_s2  ;;  %v1335_v12 = vsel %vm1330_vm10, %v1454_v11, 0 }
 0x221   : > { %1344 = vmatpush.bf16.xpose.msra.mxu1 %v1335_v12  ;;  %v1606_v18 = vsel %vm1330_vm10, %v1654_v15, 0 }
 0x228   : > { %1533 = vrot.lane.b32.xlu2 %v1454_v11, %s2985_s8  ;;  %1388 = vrot.lane.b32.xlu1 %v3358_v50, %s2986_s2 }
 0x229   : > { %2671 = vmatmul.msk.bf16.vlgmr.msra.gmra.mxu1 %vm1330_vm10, %v3358_v50 }
 0x230   : > { %1662 = vrot.lane.b32.xlu2 %v1654_v15, %s2986_s2  ;;  %1530 = vrot.lane.b32.xlu1 %v3358_v50, %s2985_s8 }
 0x238   : > { %1732 = vrot.lane.b32.xlu2 %v1654_v15, %s2984_s11  ;;  %1659 = vrot.lane.b32.xlu1 %v3364_v57, %s2986_s2 }
 0x240   : > { %1729 = vrot.lane.b32.xlu2 %v3364_v57, %s2984_s11  ;;  %1802 = vrot.lane.b32.xlu1 %v1654_v15, %s2985_s8 }
 0x26c   : > { %v1460_v19 = vpop.permute.xlu0 %1459 }
 0x274   : > { %v1800_v41 = vpop.permute.xlu0 %1799 }
 0x27a   : > { %v1463_v16 = vpop.permute.xlu2 %1462 }
 0x27b   : > { %v1468_v17 = vsel %vm1330_vm10, %v1463_v16, 0 }
 0x27c   : > { %1477 = vmatpush.bf16.xpose.msrb.mxu1 %v1468_v17 }
 0x282   : > { %v1534_v21 = vpop.permute.xlu2 %1533 }
 0x283   : > { %2675 = vmatmul.msk.bf16.vlgmr.msrb.gmra.mxu1 %vm1330_vm10, %v1460_v19  ;;  %v1539_v28 = vsel %vm1330_vm10, %v1534_v21, 0 }
 0x284   : > { %1615 = vmatpush.bf16.xpose.msra.mxu1 %v1606_v18 }
 0x28a   : > { %v1663_v22 = vpop.permute.xlu2 %1662 }
 0x28b   : > { %v1668_v30 = vsel %vm1330_vm10, %v1663_v22, 0 }
 0x292   : > { %v1733_v23 = vpop.permute.xlu2 %1732  ;;  %v1392_v24 = vpop.permute.xlu1 %1391 }
 0x293   : > { %v1738_v25 = vsel %vm1330_vm10, %v1733_v23, 0  ;;  %2683 = vmatmul.msk.bf16.vlgmr.msra.gmra.mxu1 %vm1330_vm10, %v3364_v57  ;;  %v1397_v27 = vsel %vm1330_vm10, %v1392_v24, 0 }
 0x294   : > { %1406 = vmatpush.bf16.xpose.msrb.mxu3 %v1397_v27  ;;  %1747 = vmatpush.bf16.xpose.msrb.mxu1 %v1738_v25 }
 0x29a   : > { %v1389_v29 = vpop.permute.xlu1 %1388  ;;  %v1730_v31 = vpop.permute.xlu2 %1729 }
 0x29b   : > { %2673 = vmatmul.msk.bf16.vlgmr.msrb.gmra.mxu3 %vm1330_vm10, %v1389_v29 }
 0x29c   : > { %1548 = vmatpush.bf16.xpose.msra.mxu3 %v1539_v28 }
 0x2a2   : > { %v1531_v32 = vpop.permute.xlu1 %1530 }
 0x2a3   : > { %2695 = vmatmul.msk.bf16.vlgmr.msrb.gmra.mxu1 %vm1330_vm10, %v1730_v31 }
 0x2a4   : > { %1677 = vmatpush.bf16.xpose.msrb.mxu3 %v1668_v30 }
 0x2a6   : > { %v1346_v34 = vpop.f32.mrf.mxu1 }
 0x2a7   : > { %v1347_v35 = vadd.f32 %v1346_v34, %v1321_v33 }
 0x2a9   : > { %v1350_v36 = vsel %vm1330_vm10, %v1347_v35, -inf }
 0x2aa   : > { %1351 = vmax.xlane.f32.xlu1 %v1350_v36  ;;  %v1660_v37 = vpop.permute.xlu1 %1659 }
 0x2ab   : > { %2677 = vmatmul.msk.bf16.vlgmr.msra.gmra.mxu3 %vm1330_vm10, %v1531_v32 }
 0x2ae   : > { %v1348_v38 = vpop.f32.mrf.mxu1 }
 0x2b2   : > { %v1803_v39 = vpop.permute.xlu1 %1802 }
 0x2b3   : > { %v1808_v40 = vsel %vm1330_vm10, %v1803_v39, 0 }
 0x2b4   : > { %1817 = vmatpush.bf16.xpose.msra.mxu3 %v1808_v40 }
 0x2bb   : > { %2689 = vmatmul.msk.bf16.vlgmr.msrb.gmra.mxu3 %vm1330_vm10, %v1660_v37 }
 0x2c3   : > { %1565 = vrot.lane.b32.xlu1 %v3326_v26, %s2985_s8 }
 0x2cb   : > { %2701 = vmatmul.msk.bf16.vlgmr.msra.gmra.mxu3 %vm1330_vm10, %v1800_v41 }
 0x300   : > { %v1479_v42 = vpop.f32.mrf.mxu1 }
 0x301   : > { %v1480_v43 = vadd.f32 %v1479_v42, %v1321_v33 }
 0x303   : > { %v1483_v44 = vsel %vm1330_vm10, %v1480_v43, -inf }
 0x304   : > { %1484 = vmax.xlane.f32.xlu0 %v1483_v44 }
 0x308   : > { %v1481_v45 = vpop.f32.mrf.mxu1 }
 0x310   : > { %v1617_v46 = vpop.f32.mrf.mxu1 }
 0x311   : > { %v1618_v47 = vadd.f32 %v1617_v46, %v1321_v33 }
 0x313   : > { %v1621_v48 = vsel %vm1330_vm10, %v1618_v47, -inf }
 0x314   : > { %1622 = vmax.xlane.f32.xlu1 %v1621_v48 }
 0x318   : > { %v1619_v49 = vpop.f32.mrf.mxu1  ;;  %1494 = vrot.lane.b32.xlu0 %v3326_v26, %s2984_s11 }
 0x31d   : > { %v1352_v50 = vpop.xlane.xlu1 %1351 }
 0x31e   : > { %v1353_v51 = vsub.f32 %v1347_v35, %v1352_v50  ;;  %v1408_v52 = vpop.f32.mrf.mxu3 }
 0x31f   : > { %v1409_v53 = vadd.f32 %v1408_v52, %v1321_v33 }
 0x320   : > { %v1354_v54 = vmul.f32 1.442695, %v1353_v51  ;;  %v1749_v55 = vpop.f32.mrf.mxu1 }
 0x321   : > { %v1412_v56 = vsel %vm1330_vm10, %v1409_v53, -inf  ;;  %v3456_v1 = vadd.f32 %v1749_v55, %v1321_v33 }
 0x322   : > { %2911 = vpow2.f32 %v1354_v54  ;;  %1413 = vmax.xlane.f32.xlu2 %v1412_v56 }
 0x323   : > { %v1753_v3 = vsel %vm1330_vm10, %v3456_v1, -inf }
 0x326   : > { %v1410_v57 = vpop.f32.mrf.mxu3 }
 0x328   : > { %v3448_v58 = vpop.eup %2911  ;;  %v1751_v59 = vpop.f32.mrf.mxu1 }
 0x329   : > { %v1359_v60 = vpack.c.bf16 %v3448_v58, %v3448_v58  ;;  %v1356_v51 = vsel %vm1330_vm10, %v3448_v58, 0.0 }
 0x32b   : > { %2672 = vmatmul.msk.bf16.vlgmr.msrb.gmra.mxu2 %vm1330_vm10, %v1359_v60 }
 0x32e   : > { %v1550_v61 = vpop.f32.mrf.mxu3 }
 0x32f   : > { %v1551_v62 = vadd.f32 %v1550_v61, %v1321_v33 }
 0x331   : > { %v1554_v63 = vsel %vm1330_vm10, %v1551_v62, -inf }
 0x332   : > { %1555 = vmax.xlane.f32.xlu1 %v1554_v63 }
 0x335   : > { %v1566_v16 = vpop.permute.xlu1 %1565 }
 0x336   : > { %v1552_v0 = vpop.f32.mrf.mxu3 }
 0x33a   : > { %1423 = vrot.lane.b32.xlu2 %v3326_v26, %s2986_s2 }
 0x33e   : > { %v1679_v2 = vpop.f32.mrf.mxu3 }
 0x33f   : > { %v3464_v10 = vadd.f32 %v1679_v2, %v1321_v33 }
 0x341   : > { %v1683_v26 = vsel %vm1330_vm10, %v3464_v10, -inf }
 0x342   : > { %1754 = vmax.xlane.f32.xlu0 %v1753_v3 }
 0x346   : > { %v1681_v4 = vpop.f32.mrf.mxu3 }
 0x34b   : > { %1694 = vrot.lane.b32.xlu1 %v1657_v7, %s2986_s2 }
 0x34e   : > { %v1819_v8 = vpop.f32.mrf.mxu3 }
 0x34f   : > { %v3468_v11 = vadd.f32 %v1819_v8, %v1321_v33 }
 0x351   : > { %v1823_v12 = vsel %vm1330_vm10, %v3468_v11, -inf }
 0x356   : > { %v1821_v9 = vpop.f32.mrf.mxu3  ;;  %1834 = vrot.lane.b32.xlu0 %v1657_v7, %s2985_s8 }
 0x363   : > { %1684 = vmax.xlane.f32.xlu2 %v1683_v26 }
 0x375   : > { %1824 = vmax.xlane.f32.xlu1 %v1823_v12 }
 0x377   : > { %v1485_v13 = vpop.xlane.xlu0 %1484 }
 0x378   : > { %v1486_v14 = vsub.f32 %v1480_v43, %v1485_v13 }
 0x37a   : > { %v1487_v15 = vmul.f32 1.442695, %v1486_v14 }
 0x37b   : > { %1764 = vrot.lane.b32.xlu2 %v1657_v7, %s2984_s11  ;;  %s2989_s11 = smov 48  }
 0x37c   : > { %2913 = vpow2.f32 %v1487_v15 }
 0x382   : > { %v2914_v17 = vpop.eup %2913 }
 0x383   : > { %v1489_v18 = vsel %vm1330_vm10, %v2914_v17, 0.0  ;;  %v1492_v23 = vpack.c.bf16 %v2914_v17, %v2914_v17 }
 0x384   : > { %1490 = vadd.xlane.f32.xlu1 %v1489_v18 }
 0x387   : > { %v1623_v19 = vpop.xlane.xlu1 %1622 }
 0x388   : > { %v1624_v22 = vsub.f32 %v1618_v47, %v1623_v19 }
 0x38a   : > { %v1495_v21 = vpop.permute.xlu0 %1494  ;;  %v1625_v24 = vmul.f32 1.442695, %v1624_v22 }
 0x38b   : > { %1507 = vmatpush.bf16.msra.mxu2 %v1495_v21 }
 0x38c   : > { %2915 = vpow2.f32 %v1625_v24 }
 0x38e   : > { %2676 = vmatmul.msk.bf16.vlgmr.msra.gmra.mxu2 %vm1330_vm10, %v1492_v23 }
 0x38f   : > { %1641 = vmatpush.bf16.msrb.mxu2 %v1657_v7 }
 0x392   : > { %v2916_v29 = vpop.eup %2915 }
 0x393   : > { %v1630_v30 = vpack.c.bf16 %v2916_v29, %v2916_v29  ;;  %v1627_v38 = vsel %vm1330_vm10, %v2916_v29, 0.0 }
 0x395   : > { %v1414_v25 = vpop.xlane.xlu2 %1413 }
 0x396   : > { %v1415_v27 = vsub.f32 %v1409_v53, %v1414_v25 }
 0x398   : > { %v1416_v28 = vmul.f32 1.442695, %v1415_v27 }
 0x39a   : > { %2917 = vpow2.f32 %v1416_v28 }
 0x39d   : > { %v1424_v31 = vpop.permute.xlu2 %1423 }
 0x39e   : > { %1436 = vmatpush.bf16.msrb.mxu0 %v1424_v31  ;;  %2684 = vmatmul.msk.bf16.vlgmr.msrb.gmra.mxu2 %vm1330_vm10, %v1630_v30 }
 0x3a0   : > { %v2918_v32 = vpop.eup %2917 }
 0x3a1   : > { %v1418_v33 = vsel %vm1330_vm10, %v2918_v32, 0.0  ;;  %v1421_v34 = vpack.c.bf16 %v2918_v32, %v2918_v32 }
 0x3a2   : > { %1578 = vmatpush.bf16.msra.mxu0 %v1566_v16  ;;  %1419 = vadd.xlane.f32.xlu0 %v1418_v33 }
 0x3a3   : > { %2674 = vmatmul.msk.bf16.vlgmr.msrb.gmra.mxu0 %vm1330_vm10, %v1421_v34 }
 0x3a5   : > { %v1556_v35 = vpop.xlane.xlu1 %1555 }
 0x3a6   : > { %v1557_v36 = vsub.f32 %v1551_v62, %v1556_v35 }
 0x3a8   : > { %v1558_v37 = vmul.f32 1.442695, %v1557_v36 }
 0x3aa   : > { %2919 = vpow2.f32 %v1558_v37  ;;  %1628 = vadd.xlane.f32.xlu0 %v1627_v38 }
 0x3ae   : > { %v3479_v39 = vpop.f32.mrf.mxu2 }
 0x3b0   : > { %v2920_v40 = vpop.eup %2919 }
 0x3b1   : > { %v1563_v41 = vpack.c.bf16 %v2920_v40, %v2920_v40  ;;  %v1560_v50 = vsel %vm1330_vm10, %v2920_v40, 0.0 }
 0x3b3   : > { %2678 = vmatmul.msk.bf16.vlgmr.msra.gmra.mxu0 %vm1330_vm10, %v1563_v41 }
 0x3b5   : > { %v1755_v42 = vpop.xlane.xlu0 %1754 }
 0x3b6   : > { %v1756_v43 = vsub.f32 %v3456_v1, %v1755_v42  ;;  %v1374_v44 = vpop.f32.mrf.mxu2 }
 0x3b8   : > { %v1757_v45 = vmul.f32 1.442695, %v1756_v43  ;;  %v2854_v43 = vld [vmem:[%s3160_s23 + $0x18] sm:$0xff] }
 0x3b9   : > { %1902 = vmatpush.bf16.msra.mxu1 %v2854_v43  ;;  %v2864_v43 = vld [vmem:[%s3180_s28 + $0x8] sm:$0xff] }
 0x3ba   : > { %2921 = vpow2.f32 %v1757_v45  ;;  %v2853_v45 = vld [vmem:[%s3160_s23 + $0x10] sm:$0xff] }
 0x3bd   : > { %v1695_v46 = vpop.permute.xlu1 %1694  ;;  %1903 = vmatpush.bf16.msra.mxu1 %v2853_v45 }
 0x3be   : > { %1707 = vmatpush.bf16.msrb.mxu0 %v1695_v46  ;;  %v2852_v46 = vld [vmem:[%s3160_s23 + $0x8] sm:$0xff] }
 0x3c0   : > { %v2922_v47 = vpop.eup %2921 }
 0x3c1   : > { %v1759_v48 = vsel %vm1330_vm10, %v2922_v47, 0.0  ;;  %v1762_v56 = vpack.c.bf16 %v2922_v47, %v2922_v47  ;;  %1904 = vmatpush.bf16.msra.mxu1 %v2852_v46  ;;  %v2851_v47 = vld [vmem:[%s3160_s23] sm:$0xff]  ;;  %s3680_s23 = sld [smem:[#allocation29_spill]] (!%p2786_p8) }
 0x3c2   : > { %1760 = vadd.xlane.f32.xlu1 %v1759_v48 }
 0x3c5   : > { %1905 = vmatpush.bf16.msra.mxu1 %v2851_v47 }
 0x3c8   : > { %v1835_v49 = vpop.permute.xlu0 %1834 }
 0x3c9   : > { %1847 = vmatpush.bf16.msra.mxu0 %v1835_v49 }
 0x3ca   : > { %1561 = vadd.xlane.f32.xlu1 %v1560_v50 }
 0x3d2   : > { %1357 = vadd.xlane.f32.xlu1 %v1356_v51 }
 0x3d6   : > { %v1685_v52 = vpop.xlane.xlu2 %1684 }
 0x3d7   : > { %v1686_v53 = vsub.f32 %v3464_v10, %v1685_v52 }
 0x3d9   : > { %v1687_v54 = vmul.f32 1.442695, %v1686_v53 }
 0x3db   : > { %2923 = vpow2.f32 %v1687_v54 }
 0x3de   : > { %v1765_v55 = vpop.permute.xlu2 %1764 }
 0x3df   : > { %1777 = vmatpush.bf16.msra.mxu2 %v1765_v55  ;;  %v2951_v55 = vld [vmem:[#allocation2] sm:$0xff] }
 0x3e1   : > { %v2924_v57 = vpop.eup %2923 }
 0x3e2   : > { %v1692_v59 = vpack.c.bf16 %v2924_v57, %v2924_v57  ;;  %2696 = vmatmul.msk.bf16.vlgmr.msra.gmra.mxu2 %vm1330_vm10, %v1762_v56  ;;  %v1689_v60 = vsel %vm1330_vm10, %v2924_v57, 0.0 }
 0x3e3   : > { %1690 = vadd.xlane.f32.xlu2 %v1689_v60 }
 0x3e4   : > { %2690 = vmatmul.msk.bf16.vlgmr.msrb.gmra.mxu0 %vm1330_vm10, %v1692_v59 }
 0x3e8   : > { %v1825_v61 = vpop.xlane.xlu1 %1824 }
 0x3e9   : > { %v1826_v58 = vsub.f32 %v3468_v11, %v1825_v61  ;;  %v2952_v61 = vld [vmem:[#allocation2 + $0x8] sm:$0xff] }
 0x3eb   : > { %v1827_v62 = vmul.f32 1.442695, %v1826_v58 }
 0x3ed   : > { %2925 = vpow2.f32 %v1827_v62 }
 0x3f3   : > { %v2926_v63 = vpop.eup %2925 }
 0x3f4   : > { %v1832_v0 = vpack.c.bf16 %v2926_v63, %v2926_v63  ;;  %v1829_v1 = vsel %vm1330_vm10, %v2926_v63, 0.0 }
 0x3f5   : > { %1830 = vadd.xlane.f32.xlu1 %v1829_v1  ;;  %v2862_v1 = vld [vmem:[%s3174_s27 + $0x18] sm:$0xff] }
 0x3f6   : > { %2702 = vmatmul.msk.bf16.vlgmr.msra.gmra.mxu0 %vm1330_vm10, %v1832_v0  ;;  %v2858_v0 = vld [vmem:[%s3169_s7 + $0x18] sm:$0xff]  ;;  %2041 = vmatpush.bf16.msrb.mxu3 %v2862_v1 }
 0x3f7   : > { %v1491_v2 = vpop.xlane.xlu1 %1490  ;;  %1995 = vmatpush.bf16.msrb.mxu2 %v2858_v0 }
 0x3f8   : > { %2927 = vrcp.f32 %v1491_v2  ;;  %v2857_v2 = vld [vmem:[%s3169_s7 + $0x10] sm:$0xff] }
 0x3fb   : > { %1996 = vmatpush.bf16.msrb.mxu2 %v2857_v2 }
 0x3fe   : > { %v2928_v3 = vpop.eup %2927 }
 0x411   : > { %v1509_v4 = vpop.f32.mrf.mxu2 }
 0x412   : > { %v1514_v5 = vmul.f32 %v2928_v3, %v1509_v4  ;;  %v2861_v3 = vld [vmem:[%s3174_s27 + $0x10] sm:$0xff]  ;;  %v2856_v4 = vld [vmem:[%s3169_s7 + $0x8] sm:$0xff] }
 0x413   : > { %2042 = vmatpush.bf16.msrb.mxu3 %v2861_v3  ;;  %1997 = vmatpush.bf16.msrb.mxu2 %v2856_v4 }
 0x414   : > { %1516 = vrot.lane.b32.xlu0 %v1514_v5, %s2987_s30  ;;  %v2860_v5 = vld [vmem:[%s3174_s27 + $0x8] sm:$0xff] }
 0x415   : > { %v1420_v6 = vpop.xlane.xlu0 %1419 }
 0x416   : > { %2929 = vrcp.f32 %v1420_v6 }
 0x417   : > { %2043 = vmatpush.bf16.msrb.mxu3 %v2860_v5 }
 0x419   : > { %v1511_v7 = vpop.f32.mrf.mxu2 }
 0x41c   : > { %v2930_v9 = vpop.eup %2929 }
 0x41d   : > { %v1629_v8 = vpop.xlane.xlu0 %1628 }
 0x41e   : > { %2931 = vrcp.f32 %v1629_v8  ;;  %v2855_v8 = vld [vmem:[%s3169_s7] sm:$0xff] }
 0x41f   : > { %1998 = vmatpush.bf16.msrb.mxu2 %v2855_v8 }
 0x420   : > { %v1438_v10 = vpop.f32.mrf.mxu0 }
 0x421   : > { %v1443_v26 = vmul.f32 %v2930_v9, %v1438_v10  ;;  %v1643_v11 = vpop.f32.mrf.mxu2  ;;  %v2859_v9 = vld [vmem:[%s3174_s27] sm:$0xff]  ;;  %s3677_s27 = scalar_lea.vmem %s3626_s14, %s3125_s6  ;;  %s2158_s6 = sld [smem:[#allocation7]] (!%p2786_p8) }
 0x422   : > { %2044 = vmatpush.bf16.msrb.mxu3 %v2859_v9 }
 0x423   : > { %1445 = vrot.lane.b32.xlu2 %v1443_v26, %s2988_s3 }
 0x424   : > { %v2932_v12 = vpop.eup %2931 }
 0x425   : > { %v1648_v13 = vmul.f32 %v2932_v12, %v1643_v11 }
 0x427   : > { %1649 = vst.msk [vmem:[#allocation6 + $0x8] sm:$0xff] %vm1330_vm10, %v1648_v13 }
 0x428   : > { %v1440_v14 = vpop.f32.mrf.mxu0 }
 0x429   : > { %v1645_v15 = vpop.f32.mrf.mxu2 }
 0x430   : > { %v1580_v16 = vpop.f32.mrf.mxu0 }
 0x435   : > { %v1761_v17 = vpop.xlane.xlu1 %1760 }
 0x438   : > { %v1582_v18 = vpop.f32.mrf.mxu0 }
 0x43d   : > { %v1562_v19 = vpop.xlane.xlu1 %1561 }
 0x43e   : > { %2933 = vrcp.f32 %v1562_v19 }
 0x444   : > { %v2934_v21 = vpop.eup %2933 }
 0x445   : > { %v1358_v22 = vpop.xlane.xlu1 %1357  ;;  %v1585_v23 = vmul.f32 %v2934_v21, %v1580_v16  ;;  %v1914_v21 = vld [vmem:[%s3677_s27] sm:$0x1] }
 0x446   : > { %2935 = vrcp.f32 %v1358_v22 }
 0x447   : > { %1587 = vrot.lane.b32.xlu0 %v1585_v23, %s2989_s11 }
 0x44c   : > { %v2936_v24 = vpop.eup %2935 }
 0x44d   : > { %v1377_v25 = vmul.f32 %v2936_v24, %v3479_v39 }
 0x44f   : > { %1378 = vst.msk [vmem:[#allocation6] sm:$0xff] %vm1330_vm10, %v1377_v25  ;;  %v1949_v25 = vadd.f32 1.0, %v1914_v21 }
 0x456   : > { %v1691_v27 = vpop.xlane.xlu2 %1690 }
 0x457   : > { %2937 = vrcp.f32 %v1691_v27 }
 0x458   : > { %2939 = vrcp.f32 %v1761_v17 }
 0x45d   : > { %v2938_v28 = vpop.eup %2937 }
 0x45e   : > { %v2940_v31 = vpop.eup %2939 }
 0x461   : > { %v1709_v29 = vpop.f32.mrf.mxu0 }
 0x462   : > { %v1714_v30 = vmul.f32 %v2938_v28, %v1709_v29 }
 0x464   : > { %1716 = vrot.lane.b32.xlu1 %v1714_v30, %s2988_s3  ;;  %v1951_v30 = vperm.slane %v1949_v25, 0 }
 0x465   : > { %v1779_v32 = vpop.f32.mrf.mxu2 }
 0x466   : > { %v1784_v33 = vmul.f32 %v2940_v31, %v1779_v32 }
 0x468   : > { %1786 = vrot.lane.b32.xlu2 %v1784_v33, %s2987_s30  ;;  %v1831_v35 = vpop.xlane.xlu1 %1830  ;;  %s3679_s30 = sld [smem:[#allocation27_spill]] (!%p2786_p8) }
 0x469   : > { %v1711_v34 = vpop.f32.mrf.mxu0  ;;  %2941 = vrcp.f32 %v1831_v35 }
 0x46d   : > { %v1781_v36 = vpop.f32.mrf.mxu2 }
 0x46f   : > { %v2942_v37 = vpop.eup %2941 }
 0x473   : > { %v1849_v38 = vpop.f32.mrf.mxu0 }
 0x474   : > { %v1854_v39 = vmul.f32 %v2942_v37, %v1849_v38  ;;  %v2870_v37 = vld [vmem:[%s3180_s28 + $0x38] sm:$0xff]  ;;  %v2869_v38 = vld [vmem:[%s3180_s28 + $0x30] sm:$0xff] }
 0x475   : > { %2136 = vmatpush.bf16.msrb.mxu0 %v2870_v37 }
 0x476   : > { %1856 = vrot.lane.b32.xlu1 %v1854_v39, %s2989_s11  ;;  %v2868_v39 = vld [vmem:[%s3180_s28 + $0x28] sm:$0xff] }
 0x479   : > { %2137 = vmatpush.bf16.msrb.mxu0 %v2869_v38 }
 0x47b   : > { %v1851_v40 = vpop.f32.mrf.mxu0 }
 0x47c   : > { %v2867_v40 = vld [vmem:[%s3180_s28 + $0x20] sm:$0xff] }
 0x47d   : > { %v1446_v41 = vpop.permute.xlu2 %1445  ;;  %2138 = vmatpush.bf16.msrb.mxu0 %v2868_v39 }
 0x47e   : > { %1449 = vst.msk [vmem:[#allocation6] sm:$0xff] %vm1448_vm11, %v1446_v41  ;;  %v2866_v41 = vld [vmem:[%s3180_s28 + $0x18] sm:$0xff] }
 0x481   : > { %2139 = vmatpush.bf16.msrb.mxu0 %v2867_v40 }
 0x485   : > { %2140 = vmatpush.bf16.msrb.mxu0 %v2866_v41 }
 0x486   : > { %v1517_v42 = vpop.permute.xlu0 %1516 }
 0x487   : > { %1520 = vst.msk [vmem:[#allocation6] sm:$0xff] %vm1519_vm12, %v1517_v42  ;;  %v2865_v42 = vld [vmem:[%s3180_s28 + $0x10] sm:$0xff] }
 0x489   : > { %2141 = vmatpush.bf16.msrb.mxu0 %v2865_v42 }
 0x48d   : > { %2142 = vmatpush.bf16.msrb.mxu0 %v2864_v43 }
 0x4b9   : > { %v1588_v44 = vpop.permute.xlu0 %1587 }
 0x4ba   : > { %1591 = vst.msk [vmem:[#allocation6] sm:$0xff] %vm1590_vm13, %v1588_v44  ;;  %v2863_v44 = vld [vmem:[%s3180_s28] sm:$0xff]  ;;  %s2159_s28 = scalar_lea.vmem (!%p2786_p8), [#allocation2], %s2158_s6 }
 0x4bb   : > { %2143 = vmatpush.bf16.msrb.mxu0 %v2863_v44 }
 0x4c1   : > { %v1860_v51 = vld [vmem:[#allocation6] sm:$0xff] }
 0x4c2   : > { %v1787_v49 = vpop.permute.xlu2 %1786 }
 0x4d6   : > { %v1717_v48 = vpop.permute.xlu1 %1716 }
 0x4d7   : > { %1719 = vst.msk [vmem:[#allocation6 + $0x8] sm:$0xff] %vm1448_vm11, %v1717_v48 }
 0x4d8   : > { %1789 = vst.msk [vmem:[#allocation6 + $0x8] sm:$0xff] %vm1519_vm12, %v1787_v49 }
 0x4e8   : > { %v1857_v50 = vpop.permute.xlu1 %1856 }
 0x4e9   : > { %1859 = vst.msk [vmem:[#allocation6 + $0x8] sm:$0xff] %vm1590_vm13, %v1857_v50 }
 0x4f0   : > { %v1861_v52 = vld [vmem:[#allocation6 + $0x8] sm:$0xff] }
 0x4f1   : > { %v1862_v53 = vpack.c.bf16 %v1861_v52, %v1860_v51 }
 0x4f3   : > { %2719 = vmatmul.msk.bf16.vlgmr.msra.gmra.mxu1 %vm912_vm1, %v1862_v53 }
 0x570   : > { %v1907_v54 = vpop.f32.mrf.mxu1 }
 0x571   : > { %v3510_v56 = vadd.f32 %v2951_v55, %v1907_v54 }
 0x573   : > { %v1915_v57 = vmul.f32 %v3510_v56, %v3510_v56 }
 0x575   : > { %v1917_v59 = vsel %vm912_vm1, %v1915_v57, 0.0 }
 0x576   : > { %1918 = vadd.xlane.f32.xlu2 %v1917_v59 }
 0x578   : > { %v1909_v60 = vpop.f32.mrf.mxu1 }
 0x579   : > { %v3515_v58 = vadd.f32 %v2952_v61, %v1909_v60 }
 0x57b   : > { %v1916_v62 = vmul.f32 %v3515_v58, %v3515_v58 }
 0x57d   : > { %v1920_v63 = vsel %vm912_vm1, %v1916_v62, 0.0 }
 0x57e   : > { %1921 = vadd.xlane.f32.xlu0 %v1920_v63 }
 0x5e9   : > { %v1919_v6 = vpop.xlane.xlu2 %1918 }
 0x5ea   : > { %v1923_v7 = vmul.f32 %v1919_v6, %v3216_v20 }
 0x5ec   : > { %v1925_v10 = vadd.f32 1e-06, %v1923_v7 }
 0x5ee   : > { %2943 = vrsqrt.f32 %v1925_v10  ;;  %vm1933_vm15 = vweird.f32 %v1925_v10 }
 0x5f1   : > { %v1922_v26 = vpop.xlane.xlu0 %1921 }
 0x5f2   : > { %v1924_v11 = vmul.f32 %v1922_v26, %v3216_v20 }
 0x5f4   : > { %v2944_v12 = vpop.eup %2943  ;;  %v1926_v13 = vadd.f32 1e-06, %v1924_v11 }
 0x5f5   : > { %v1928_v14 = vmul.f32 %v2944_v12, %v1925_v10  ;;  %vm1934_vm14 = vweird.f32 %v2944_v12 }
 0x5f6   : > { %2945 = vrsqrt.f32 %v1926_v13  ;;  %vm1935_vm0 = vmor %vm1933_vm15, %vm1934_vm14  ;;  %vm1943_vm3 = vweird.f32 %v1926_v13 }
 0x5f7   : > { %v1929_v15 = vmul.f32 %v2944_v12, %v1928_v14 }
 0x5f9   : > { %v1930_v16 = vmul.f32 0.5, %v1929_v15 }
 0x5fb   : > { %v1931_v17 = vsub.f32 1.5, %v1930_v16 }
 0x5fc   : > { %v2946_v18 = vpop.eup %2945 }
 0x5fd   : > { %v1938_v19 = vmul.f32 %v2946_v18, %v1926_v13  ;;  %v1932_v22 = vmul.f32 %v2944_v12, %v1931_v17  ;;  %vm1944_vm2 = vweird.f32 %v2946_v18 }
 0x5fe   : > { %vm1945_vm4 = vmor %vm1943_vm3, %vm1944_vm2 }
 0x5ff   : > { %v1939_v23 = vmul.f32 %v2946_v18, %v1938_v19  ;;  %v1936_v27 = vsel %vm1935_vm0, %v2944_v12, %v1932_v22 }
 0x600   : > { %v1947_v31 = vmul.f32 %v1936_v27, %v3510_v56 }
 0x601   : > { %v1940_v24 = vmul.f32 0.5, %v1939_v23 }
 0x602   : > { %v1953_v34 = vmul.f32 %v1951_v30, %v1947_v31 }
 0x603   : > { %v1941_v28 = vsub.f32 1.5, %v1940_v24 }
 0x605   : > { %v1942_v29 = vmul.f32 %v2946_v18, %v1941_v28 }
 0x607   : > { %v1946_v32 = vsel %vm1945_vm4, %v2946_v18, %v1942_v29 }
 0x608   : > { %v1948_v33 = vmul.f32 %v1946_v32, %v3515_v58 }
 0x60a   : > { %v1954_v35 = vmul.f32 %v1951_v30, %v1948_v33 }
 0x60c   : > { %v1955_v36 = vpack.c.bf16 %v1954_v35, %v1953_v34 }
 0x60e   : > { %2736 = vmatmul.msk.bf16.vlgmr.msrb.gmra.mxu2 %vm912_vm1, %v1955_v36  ;;  %2753 = vmatmul.msk.bf16.vlgmr.msrb.gmra.mxu3 %vm912_vm1, %v1955_v36 }
 0x691   : > { %v2000_v45 = vpop.f32.mrf.mxu2  ;;  %v2046_v60 = vpop.f32.mrf.mxu3 }
 0x692   : > { %v2053_v46 = vmul.f32 0.044715, %v2000_v45  ;;  %v2051_v62 = vmul.f32 0.5, %v2000_v45 }
 0x694   : > { %v2055_v47 = vmul.f32 %v2053_v46, %v2000_v45 }
 0x696   : > { %v2057_v48 = vmul.f32 %v2055_v47, %v2000_v45 }
 0x698   : > { %v2059_v49 = vadd.f32 %v2057_v48, %v2000_v45 }
 0x699   : > { %v2002_v50 = vpop.f32.mrf.mxu2  ;;  %v2048_v4 = vpop.f32.mrf.mxu3 }
 0x69a   : > { %v2061_v51 = vmul.f32 0.7978846, %v2059_v49  ;;  %v2054_v52 = vmul.f32 0.044715, %v2002_v50  ;;  %v2052_v1 = vmul.f32 0.5, %v2002_v50 }
 0x69c   : > { %v2056_v53 = vmul.f32 %v2054_v52, %v2002_v50  ;;  %2947 = vtanh.f32 %v2061_v51 }
 0x69e   : > { %v2058_v54 = vmul.f32 %v2056_v53, %v2002_v50 }
 0x6a0   : > { %v2060_v55 = vadd.f32 %v2058_v54, %v2002_v50 }
 0x6a2   : > { %v2062_v57 = vmul.f32 0.7978846, %v2060_v55  ;;  %v2948_v59 = vpop.eup %2947 }
 0x6a3   : > { %v2065_v61 = vadd.f32 1.0, %v2948_v59 }
 0x6a4   : > { %2949 = vtanh.f32 %v2062_v57 }
 0x6a5   : > { %v2067_v0 = vmul.f32 %v2065_v61, %v2051_v62 }
 0x6a7   : > { %v2069_v5 = vmul.f32 %v2067_v0, %v2046_v60 }
 0x6aa   : > { %v2950_v63 = vpop.eup %2949 }
 0x6ab   : > { %v2066_v2 = vadd.f32 1.0, %v2950_v63 }
 0x6ad   : > { %v2068_v3 = vmul.f32 %v2066_v2, %v2052_v1 }
 0x6af   : > { %v2070_v6 = vmul.f32 %v2068_v3, %v2048_v4 }
 0x6b1   : > { %v2071_v7 = vpack.c.bf16 %v2070_v6, %v2069_v5 }
 0x6b3   : > { %2144 = vmatmul.bf16.vlgmr.msrb.gmra.mxu0 %v2071_v7 }
 0x730   : > { %v2145_v8 = vpop.f32.mrf.mxu0 }
 0x731   : > { %v2150_v9 = vadd.f32 %v2145_v8, %v3510_v56 }
 0x733   : > { %2152 = vst.msk [vmem:[#allocation2] sm:$0xff] %vm912_vm1, %v2150_v9 }
 0x737   : > { %2157 = sbr.rel (%p2786_p8) target bundleno = 2143 (0x85f), region = 112 }
 0x738   : > { %v2147_v10 = vpop.f32.mrf.mxu0 }
 0x739   : > { %v2151_v26 = vadd.f32 %v2147_v10, %v3515_v58 }
 0x73b   : > { %2153 = vst.msk [vmem:[#allocation2 + $0x8] sm:$0xff] %vm912_vm1, %v2151_v26 }
 0x73c   : > { %vm2167_vm5 = vcmask 1040384   ;;  %vm2171_vm6 = vcmask 517120   ;;  %v2814_v58 = vld [vmem:[%s3678_s26 + $0x30] sm:$0xf]  ;;  %v2878_v16 = vld [vmem:[%s3678_s26 + $0x34] sm:$0xf0] }
 0x73d   : > { %v2877_v17 = vld [vmem:[%s3678_s26 + $0x34] sm:$0xf]  ;;  %v2815_v18 = vor.u32 %v2878_v16, %v2814_v58  ;;  %v2816_v19 = vld [vmem:[%s3678_s26 + $0x38] sm:$0xf0]  ;;  %v2806_v22 = vld [vmem:[%s3678_s26 + $0x20] sm:$0xf] }
 0x73e   : > { %v2819_v21 = vor.u32 %v2877_v17, %v2816_v19  ;;  %v2876_v23 = vld [vmem:[%s3678_s26 + $0x24] sm:$0xf0]  ;;  %v2875_v24 = vld [vmem:[%s3678_s26 + $0x24] sm:$0xf]  ;;  %v2808_v27 = vld [vmem:[%s3678_s26 + $0x28] sm:$0xf0] }
 0x73f   : > { %2249 = vmatpush.bf16.msra.mxu0 %v2815_v18  ;;  %v2807_v25 = vor.u32 %v2876_v23, %v2806_v22  ;;  %v2811_v28 = vor.u32 %v2875_v24, %v2808_v27  ;;  %v2798_v29 = vld [vmem:[%s3678_s26 + $0x10] sm:$0xf]  ;;  %v2874_v30 = vld [vmem:[%s3678_s26 + $0x14] sm:$0xf0]  ;;  %v2873_v31 = vld [vmem:[%s3678_s26 + $0x14] sm:$0xf] }
 0x740   : > { %2262 = vmatpush.bf16.msra.mxu1 %v2819_v21  ;;  %v2799_v32 = vor.u32 %v2874_v30, %v2798_v29  ;;  %v2800_v33 = vld [vmem:[%s3678_s26 + $0x18] sm:$0xf0]  ;;  %v2790_v34 = vld [vmem:[%s3678_s26] sm:$0xf]  ;;  %v2872_v35 = vld [vmem:[%s3678_s26 + $0x4] sm:$0xf0] }
 0x741   : > { %v2803_v36 = vor.u32 %v2873_v31, %v2800_v33  ;;  %v2871_v37 = vld [vmem:[%s3678_s26 + $0x4] sm:$0xf]  ;;  %v2792_v38 = vld [vmem:[%s3678_s26 + $0x8] sm:$0xf0]  ;;  %v2791_v39 = vor.u32 %v2872_v35, %v2790_v34  ;;  %v2169_v47 = vld [vmem:[%s3679_s30] sm:$0x1] }
 0x742   : > { %v2160_v11 = vld [vmem:[%s2159_s28] sm:$0x1]  ;;  %v2787_v12 = vld [vmem:[%s2159_s28 + $0x8] sm:$0x1]  ;;  %v2795_v40 = vor.u32 %v2871_v37, %v2792_v38  ;;  %v2188_v49 = vadd.f32 1.0, %v2169_v47  ;;  %vm2274_vm10 = vcmask 1041408  }
 0x743   : > { %v2165_v13 = vrot.slane %v2787_v12, 7  ;;  %2250 = vmatpush.bf16.msra.mxu0 %v2807_v25 }
 0x744   : > { %2263 = vmatpush.bf16.msra.mxu1 %v2811_v28  ;;  %v2190_v52 = vperm.slane %v2188_v49, 0 }
 0x745   : > { %v2168_v14 = vsel %vm2167_vm5, %v2160_v11, %v2165_v13 }
 0x746   : > { %v2170_v15 = vmul.f32 %v2168_v14, %v2168_v14 }
 0x747   : > { %2251 = vmatpush.bf16.msra.mxu0 %v2799_v32 }
 0x748   : > { %v2172_v56 = vsel %vm2171_vm6, %v2170_v15, 0.0  ;;  %2264 = vmatpush.bf16.msra.mxu1 %v2803_v36 }
 0x749   : > { %2173 = vadd.xlane.f32.xlu0 %v2172_v56 }
 0x74b   : > { %2252 = vmatpush.bf16.msra.mxu0 %v2791_v39 }
 0x74c   : > { %2265 = vmatpush.bf16.msra.mxu1 %v2795_v40 }
 0x7bc   : > { %v2174_v41 = vpop.xlane.xlu0 %2173 }
 0x7bd   : > { %v2175_v42 = vmul.f32 %v2174_v41, %v3216_v20 }
 0x7bf   : > { %v2176_v43 = vadd.f32 1e-06, %v2175_v42 }
 0x7c1   : > { %2953 = vrsqrt.f32 %v2176_v43  ;;  %vm2183_vm8 = vweird.f32 %v2176_v43 }
 0x7c7   : > { %v2954_v44 = vpop.eup %2953 }
 0x7c8   : > { %v2178_v45 = vmul.f32 %v2954_v44, %v2176_v43  ;;  %vm2184_vm7 = vweird.f32 %v2954_v44 }
 0x7c9   : > { %vm2185_vm9 = vmor %vm2183_vm8, %vm2184_vm7 }
 0x7ca   : > { %v2179_v46 = vmul.f32 %v2954_v44, %v2178_v45 }
 0x7cc   : > { %v2180_v48 = vmul.f32 0.5, %v2179_v46 }
 0x7ce   : > { %v2181_v50 = vsub.f32 1.5, %v2180_v48 }
 0x7d0   : > { %v2182_v51 = vmul.f32 %v2954_v44, %v2181_v50 }
 0x7d2   : > { %v2186_v53 = vsel %vm2185_vm9, %v2954_v44, %v2182_v51 }
 0x7d3   : > { %v2187_v54 = vmul.f32 %v2186_v53, %v2168_v14 }
 0x7d5   : > { %v2192_v20 = vmul.f32 %v2190_v52, %v2187_v54 }
 0x7d7   : > { %v2193_v55 = vpack.c.bf16 %v2192_v20, %v2192_v20 }
 0x7d9   : > { %2820 = vmatmul.msk.bf16.vlgmr.msra.gmra.mxu0 %vm912_vm1, %v2193_v55  ;;  %2821 = vmatmul.msk.bf16.vlgmr.msra.gmra.mxu1 %vm912_vm1, %v2193_v55 }
 0x856   : > { %v2254_v57 = vpop.f32.mrf.mxu0  ;;  %v2267_v59 = vpop.f32.mrf.mxu1 }
 0x857   : > { %v2273_v60 = vrot.slane %v2267_v59, 6 }
 0x859   : > { %v2275_v61 = vsel %vm2274_vm10, %v2254_v57, %v2273_v60 }
 0x85a   : > { %2277 = vst [vmem:[%s3680_s23] sm:$0xf] %v2275_v61 }
 0x85e   : > { %v2256_v62 = vpop.f32.mrf.mxu0  ;;  %v2269_v63 = vpop.f32.mrf.mxu1 }
 0x85f PF: > { %s3681_s7 = sld [smem:[#allocation11_spill]] }
 0x865   : > { %s35_s30 = sadd.s32 1, %s3681_s7  }
 0x866   : > { %p32_p9 = scmp.ge.s32.totalorder %s35_s30, 4  }
 0x868   :  { %34 = sbr.rel (!%p32_p9) target bundleno = 26 (0x1a), region = 229 }
 0x86d   :  { %2321 = vsyncpa [#allocation9], 1 }
 0x86e   :  { %2323 = vsyncpa [#allocation9 + $0x1], 1 }

</bundles_post_ra>
